<compile_context>
chip_gen: v5e
topology: v5e:2x2
jax: 0.10.0
libtpu: 0.0.40
codegen_flags: <defaults>
</compile_context>

<pallas_src>
import functools

import jax
import jax.numpy as jnp
from jax import lax
from jax.experimental import pallas as pl
from jax.experimental.pallas import tpu as pltpu


def _round_up(x, m):
    return (x + m - 1) // m * m


def classifier_head_kernel(enc_ref, segw_ref, w1_ref, b1_ref, w2_ref, b2_ref,
                           tgt_ref, logits_ref, nll_ref, acc_ref, *, labels_num):
    """Grid = (batch tiles [parallel], sequence tiles [arbitrary])."""
    k = pl.program_id(1)

    @pl.when(k == 0)
    def _init():
        acc_ref[...] = jnp.zeros_like(acc_ref)

    # Masked-mean partial sum for this sequence tile.  seg weights are already
    # normalized (seg / sum(seg)) in the wrapper, so there is no in-kernel
    # divide; segw is [TB, TS, 1] so the broadcast is along the lane axis only.
    enc = enc_ref[...].astype(jnp.float32)           # [TB, TS, H] (bf16 streamed)
    acc_ref[...] += jnp.sum(enc * segw_ref[...], axis=1)   # [TB, H]

    @pl.when(k == pl.num_programs(1) - 1)
    def _finalize():
        feats = acc_ref[...]                         # [TB, H]
        # output_layers_1[dataset_id] + tanh   (M = TB >= 128 MXU rows)
        h = jnp.tanh(jnp.dot(feats, w1_ref[...],
                             preferred_element_type=jnp.float32) + b1_ref[...])
        # output_layers_2[dataset_id]  (label dim padded to 128 lanes)
        logits = jnp.dot(h, w2_ref[...],
                         preferred_element_type=jnp.float32) + b2_ref[...]
        logits_ref[...] = logits                     # lane-dense [TB, L_pad] store

        tb, lp = logits.shape
        col = lax.broadcasted_iota(jnp.int32, (tb, lp), 1)
        # Exclude padded label columns from the softmax normalization.
        masked = jnp.where(col < labels_num, logits, jnp.float32(-1e30))
        m = jnp.max(masked, axis=-1, keepdims=True)
        lse = jnp.log(jnp.sum(jnp.exp(masked - m), axis=-1, keepdims=True)) + m
        logp = masked - lse
        # NLLLoss: pick the target column via iota == tgt (no one-hot tensor).
        hit = col == tgt_ref[...]                    # [TB, 1] -> [TB, L_pad]
        nll_ref[...] = -jnp.sum(jnp.where(hit, logp, 0.0), axis=-1, keepdims=True)


def classifier_head(enc_out, seg, w1, b1, w2, b2, tgt, *,
                    tb=128, max_ts=512, stream_dtype=jnp.bfloat16):
    """Pallas masked-mean pooling + 2-layer head + NLL. Returns (loss, logits)."""
    B, S, H = enc_out.shape
    L = w2.shape[1]

    TB = tb
    itemsize = jnp.dtype(stream_dtype).itemsize
    # Keep one [TB, TS, H] activation buffer <= ~8 MiB so double buffering plus
    # resident weights + the lane-padded segw tile stay well inside a 32 MiB
    # scoped-VMEM budget (safe on v5e/v6e 128 MiB and v7x 64 MiB parts).
    fit = max(8, ((8 << 20) // (TB * H * itemsize)) // 8 * 8)
    TS = int(min(max_ts, fit, _round_up(S, 8)))
    B_pad = _round_up(B, TB)
    S_pad = _round_up(S, TS)
    L_pad = _round_up(L, 128)

    # Normalized pooling weights: seg / sum(seg)  (guard all-padding rows).
    segf = seg.astype(jnp.float32)
    denom = jnp.maximum(jnp.sum(segf, axis=1, keepdims=True), 1.0)
    segw = (segf / denom)[:, :, None]                               # [B, S, 1]

    # Pad batch / seq / label dims to tile boundaries.  Zero padding is inert:
    # padded tokens carry segw == 0, padded label columns are masked in-kernel,
    # padded batch rows are sliced away below.
    enc_p = jnp.zeros((B_pad, S_pad, H), stream_dtype).at[:B, :S, :].set(
        enc_out.astype(stream_dtype))
    segw_p = jnp.zeros((B_pad, S_pad, 1), jnp.float32).at[:B, :S, :].set(segw)
    w2_p = jnp.zeros((H, L_pad), jnp.float32).at[:, :L].set(w2)
    b2_p = jnp.zeros((1, L_pad), jnp.float32).at[:, :L].set(b2)
    tgt_p = jnp.zeros((B_pad, 1), jnp.int32).at[:B, 0].set(tgt.astype(jnp.int32))

    grid = (B_pad // TB, S_pad // TS)
    kernel = functools.partial(classifier_head_kernel, labels_num=L)

    logits_p, nll = pl.pallas_call(
        kernel,
        out_shape=(jax.ShapeDtypeStruct((B_pad, L_pad), jnp.float32),
                   jax.ShapeDtypeStruct((B_pad, 1), jnp.float32)),
        grid_spec=pltpu.PrefetchScalarGridSpec(
            num_scalar_prefetch=0,
            grid=grid,
            in_specs=[
                pl.BlockSpec((TB, TS, H), lambda i, k: (i, k, 0)),   # enc stream
                pl.BlockSpec((TB, TS, 1), lambda i, k: (i, k, 0)),   # pooling wts
                pl.BlockSpec((H, H),      lambda i, k: (0, 0)),      # W1 (resident)
                pl.BlockSpec((1, H),      lambda i, k: (0, 0)),      # b1 (resident)
                pl.BlockSpec((H, L_pad),  lambda i, k: (0, 0)),      # W2 (resident)
                pl.BlockSpec((1, L_pad),  lambda i, k: (0, 0)),      # b2 (resident)
                pl.BlockSpec((TB, 1),     lambda i, k: (i, 0)),      # int32 targets
            ],
            out_specs=(pl.BlockSpec((TB, L_pad), lambda i, k: (i, 0)),
                       pl.BlockSpec((TB, 1),     lambda i, k: (i, 0))),
            scratch_shapes=[pltpu.VMEM((TB, H), jnp.float32)],
        ),
        compiler_params=pltpu.CompilerParams(
            dimension_semantics=("parallel", "arbitrary"),
            vmem_limit_bytes=32 * 1024 * 1024),
    )(enc_p, segw_p, w1, b1, w2_p, b2_p, tgt_p)

    # Per-row NLL -> mean over the real batch, done in the wrapper (tiny) so the
    # batch grid axis stays "parallel" / shardable across both v7x TensorCores.
    loss = jnp.sum(nll[:B, 0]) / B
    return loss, logits_p[:B, :L]


def classifier_head_ref(enc_out, seg, w1, b1, w2, b2, tgt):
    """Pure-JAX f32 reference of the module forward (for correctness check)."""
    segf = seg.astype(jnp.float32)
    denom = jnp.maximum(jnp.sum(segf, axis=1, keepdims=True), 1.0)
    feats = jnp.sum(enc_out * segf[:, :, None], axis=1) / denom
    h = jnp.tanh(feats @ w1 + b1)
    logits = h @ w2 + b2
    logp = jax.nn.log_softmax(logits, axis=-1)
    nll = -jnp.take_along_axis(logp, tgt[:, None].astype(jnp.int32), axis=1)[:, 0]
    return jnp.mean(nll), logits


def make_params(key, vocab_size, seq_len, hidden, labels_num):
    ks = jax.random.split(key, 7)
    word_emb = 0.02 * jax.random.normal(ks[0], (vocab_size, hidden), jnp.float32)
    pos_emb = 0.02 * jax.random.normal(ks[1], (seq_len, hidden), jnp.float32)
    seg_emb = 0.02 * jax.random.normal(ks[2], (3, hidden), jnp.float32)
    lim = 1.0 / float(hidden) ** 0.5
    w1 = jax.random.uniform(ks[3], (hidden, hidden), jnp.float32, -lim, lim)
    b1 = jax.random.uniform(ks[4], (1, hidden), jnp.float32, -lim, lim)
    w2 = jax.random.uniform(ks[5], (hidden, labels_num), jnp.float32, -lim, lim)
    b2 = jax.random.uniform(ks[6], (1, labels_num), jnp.float32, -lim, lim)
    return dict(word_emb=word_emb, pos_emb=pos_emb, seg_emb=seg_emb,
                w1=w1, b1=b1, w2=w2, b2=b2)


def embed_and_encode(src, seg, params):
    # TODO(synk): str2embedding[args.embedding] / str2encoder[args.encoder] are
    # external UER registry modules; a deterministic word+position+segment
    # embedding with an identity encoder stands in for them here.
    B, S = src.shape
    emb = (params["word_emb"][src]
           + params["pos_emb"][None, :S, :]
           + params["seg_emb"][seg])
    return emb  # identity encoder


if __name__ == "__main__":
    B, S, H, L, V = 2, 8, 32, 4, 100

    key = jax.random.PRNGKey(0)
    k_param, k_src, k_tgt = jax.random.split(key, 3)
    params = make_params(k_param, V, S, H, L)

    src = jax.random.randint(k_src, (B, S), 1, V, dtype=jnp.int32)
    # seg: UER convention — nonzero (1/2) for tokens, 0 for padding.
    seg = jnp.concatenate(
        [jnp.ones((B, S - 2), jnp.int32), jnp.zeros((B, 2), jnp.int32)], axis=1)
    tgt = jax.random.randint(k_tgt, (B,), 0, L, dtype=jnp.int32)

    enc_out = embed_and_encode(src, seg, params)                     # [B, S, H]
    loss, logits = classifier_head(enc_out, seg,
                                   params["w1"], params["b1"],
                                   params["w2"], params["b2"], tgt)
    jax.block_until_ready((loss, logits))

    ref_loss, ref_logits = classifier_head_ref(enc_out, seg,
                                               params["w1"], params["b1"],
                                               params["w2"], params["b2"], tgt)

    assert logits.shape == (B, L)
    assert bool(jnp.isfinite(loss))
    # bf16 activation streaming -> generous (but still tight) tolerance.
    assert jnp.allclose(logits, ref_logits, atol=5e-3, rtol=5e-2)
    assert jnp.allclose(loss, ref_loss, atol=5e-3, rtol=5e-2)
    print("KERNEL_OK")
</pallas_src>

<mosaic_0001>
module attributes {stable_mosaic.version = 11 : i64} {
  func.func @classifier_head_kernel(%arg0: i32, %arg1: i32, %arg2: memref<128x8x32xbf16, #tpu.memory_space<vmem>>, %arg3: memref<128x8x1xf32, #tpu.memory_space<vmem>>, %arg4: memref<32x32xf32, #tpu.memory_space<vmem>>, %arg5: memref<1x32xf32, #tpu.memory_space<vmem>>, %arg6: memref<32x128xf32, #tpu.memory_space<vmem>>, %arg7: memref<1x128xf32, #tpu.memory_space<vmem>>, %arg8: memref<128x1xi32, #tpu.memory_space<vmem>>, %arg9: memref<128x128xf32, #tpu.memory_space<vmem>>, %arg10: memref<128x1xf32, #tpu.memory_space<vmem>>, %arg11: memref<128x32xf32, #tpu.memory_space<vmem>>) attributes {dimension_semantics = [#tpu.dimension_semantics<parallel>, #tpu.dimension_semantics<arbitrary>], iteration_bounds = array<i64: 1, 1>, scalar_prefetch = 0 : i64, scratch_operands = 1 : i64, tpu.core_type = #tpu.core_type<tc>, window_params = [{transform_indices = @transform_0, window_bounds = array<i64: 128, 8, 32>}, {transform_indices = @transform_1, window_bounds = array<i64: 128, 8, 1>}, {pipeline_mode = #tpu.pipeline_mode<synchronous>, transform_indices = @transform_2, window_bounds = array<i64: 32, 32>}, {pipeline_mode = #tpu.pipeline_mode<synchronous>, transform_indices = @transform_3, window_bounds = array<i64: 1, 32>}, {pipeline_mode = #tpu.pipeline_mode<synchronous>, transform_indices = @transform_4, window_bounds = array<i64: 32, 128>}, {pipeline_mode = #tpu.pipeline_mode<synchronous>, transform_indices = @transform_5, window_bounds = array<i64: 1, 128>}, {transform_indices = @transform_6, window_bounds = array<i64: 128, 1>}, {transform_indices = @transform_7, window_bounds = array<i64: 128, 128>}, {transform_indices = @transform_8, window_bounds = array<i64: 128, 1>}]} {
    %c0_i32 = arith.constant 0 : i32
    %0 = arith.cmpi eq, %arg1, %c0_i32 : i32
    %1 = arith.extui %0 : i1 to i32
    %c0_i32_0 = arith.constant 0 : i32
    %2 = arith.cmpi ne, %1, %c0_i32_0 : i32
    scf.if %2 {
      %cst_12 = arith.constant 0.000000e+00 : f32
      %15 = vector.broadcast %cst_12 : f32 to vector<128x32xf32>
      %c0_13 = arith.constant 0 : index
      %c0_14 = arith.constant 0 : index
      %16 = vector.load %arg11[%c0_13, %c0_14] : memref<128x32xf32, #tpu.memory_space<vmem>>, vector<128x32xf32>
      tpu.vector_store %arg11[%c0_13, %c0_14], %15 {strides = array<i32>} : memref<128x32xf32, #tpu.memory_space<vmem>>, vector<128x32xf32>,
    } else {
    }
    %c0 = arith.constant 0 : index
    %c0_1 = arith.constant 0 : index
    %c0_2 = arith.constant 0 : index
    %3 = vector.load %arg2[%c0, %c0_1, %c0_2] : memref<128x8x32xbf16, #tpu.memory_space<vmem>>, vector<128x8x32xbf16>
    %4 = arith.extf %3 : vector<128x8x32xbf16> to vector<128x8x32xf32>
    %c0_3 = arith.constant 0 : index
    %c0_4 = arith.constant 0 : index
    %5 = vector.load %arg11[%c0_3, %c0_4] : memref<128x32xf32, #tpu.memory_space<vmem>>, vector<128x32xf32>
    %c0_5 = arith.constant 0 : index
    %c0_6 = arith.constant 0 : index
    %c0_7 = arith.constant 0 : index
    %6 = vector.load %arg3[%c0_5, %c0_6, %c0_7] : memref<128x8x1xf32, #tpu.memory_space<vmem>>, vector<128x8x1xf32>
    %7 = vector.broadcast %6 : vector<128x8x1xf32> to vector<128x8x32xf32>
    %8 = arith.mulf %4, %7 : vector<128x8x32xf32>
    %cst = arith.constant dense<0.000000e+00> : vector<128x32xf32>
    %9 = vector.multi_reduction <add>, %8, %cst [1] : vector<128x8x32xf32> to vector<128x32xf32>
    %10 = arith.addf %5, %9 : vector<128x32xf32>
    %c0_8 = arith.constant 0 : index
    %c0_9 = arith.constant 0 : index
    %11 = vector.load %arg11[%c0_8, %c0_9] : memref<128x32xf32, #tpu.memory_space<vmem>>, vector<128x32xf32>
    tpu.vector_store %arg11[%c0_8, %c0_9], %10 {strides = array<i32>} : memref<128x32xf32, #tpu.memory_space<vmem>>, vector<128x32xf32>,
    %c0_i32_10 = arith.constant 0 : i32
    %12 = arith.cmpi eq, %arg1, %c0_i32_10 : i32
    %13 = arith.extui %12 : i1 to i32
    %c0_i32_11 = arith.constant 0 : i32
    %14 = arith.cmpi ne, %13, %c0_i32_11 : i32
    scf.if %14 {
      %c0_12 = arith.constant 0 : index
      %c0_13 = arith.constant 0 : index
      %15 = vector.load %arg11[%c0_12, %c0_13] : memref<128x32xf32, #tpu.memory_space<vmem>>, vector<128x32xf32>
      %c0_14 = arith.constant 0 : index
      %c0_15 = arith.constant 0 : index
      %16 = vector.load %arg4[%c0_14, %c0_15] : memref<32x32xf32, #tpu.memory_space<vmem>>, vector<32x32xf32>
      %cst_16 = arith.constant dense<0.000000e+00> : vector<128x32xf32>
      %17 = tpu.matmul %15, %16, %cst_16 {dimension_numbers = #tpu.dot_dimension_numbers<[1], [0], [0], [1], [0, 0, 1, 1], [], []>} : vector<128x32xf32>, vector<32x32xf32>, vector<128x32xf32> -> vector<128x32xf32>
      %c0_17 = arith.constant 0 : index
      %c0_18 = arith.constant 0 : index
      %18 = vector.load %arg5[%c0_17, %c0_18] : memref<1x32xf32, #tpu.memory_space<vmem>>, vector<1x32xf32>
      %19 = vector.broadcast %18 : vector<1x32xf32> to vector<128x32xf32>
      %20 = arith.addf %17, %19 : vector<128x32xf32>
      %21 = math.tanh %20 : vector<128x32xf32>
      %c0_19 = arith.constant 0 : index
      %c0_20 = arith.constant 0 : index
      %22 = vector.load %arg6[%c0_19, %c0_20] : memref<32x128xf32, #tpu.memory_space<vmem>>, vector<32x128xf32>
      %cst_21 = arith.constant dense<0.000000e+00> : vector<128x128xf32>
      %23 = tpu.matmul %21, %22, %cst_21 {dimension_numbers = #tpu.dot_dimension_numbers<[1], [0], [0], [1], [0, 0, 1, 1], [], []>} : vector<128x32xf32>, vector<32x128xf32>, vector<128x128xf32> -> vector<128x128xf32>
      %c0_22 = arith.constant 0 : index
      %c0_23 = arith.constant 0 : index
      %24 = vector.load %arg7[%c0_22, %c0_23] : memref<1x128xf32, #tpu.memory_space<vmem>>, vector<1x128xf32>
      %25 = vector.broadcast %24 : vector<1x128xf32> to vector<128x128xf32>
      %26 = arith.addf %23, %25 : vector<128x128xf32>
      %c0_24 = arith.constant 0 : index
      %c0_25 = arith.constant 0 : index
      %27 = vector.load %arg9[%c0_24, %c0_25] : memref<128x128xf32, #tpu.memory_space<vmem>>, vector<128x128xf32>
      tpu.vector_store %arg9[%c0_24, %c0_25], %26 {strides = array<i32>} : memref<128x128xf32, #tpu.memory_space<vmem>>, vector<128x128xf32>,
      %28 = tpu.iota {dimensions = array<i32: 1>} : vector<128x128xi32>
      %c4_i32 = arith.constant 4 : i32
      %29 = vector.broadcast %c4_i32 : i32 to vector<128x128xi32>
      %30 = arith.cmpi slt, %28, %29 : vector<128x128xi32>
      %cst_26 = arith.constant -1.000000e+30 : f32
      %31 = vector.broadcast %cst_26 : f32 to vector<128x128xf32>
      %32 = arith.select %30, %26, %31 : vector<128x128xi1>, vector<128x128xf32>
      %cst_27 = arith.constant dense<0xFF800000> : vector<128xf32>
      %33 = vector.multi_reduction <maximumf>, %32, %cst_27 [1] : vector<128x128xf32> to vector<128xf32>
      %34 = vector.shape_cast %33 : vector<128xf32> to vector<128x1xf32>
      %35 = vector.broadcast %34 : vector<128x1xf32> to vector<128x128xf32>
      %36 = arith.subf %32, %35 : vector<128x128xf32>
      %37 = math.exp %36 : vector<128x128xf32>
      %cst_28 = arith.constant dense<0.000000e+00> : vector<128xf32>
      %38 = vector.multi_reduction <add>, %37, %cst_28 [1] : vector<128x128xf32> to vector<128xf32>
      %39 = vector.shape_cast %38 : vector<128xf32> to vector<128x1xf32>
      %40 = math.log %39 : vector<128x1xf32>
      %41 = arith.addf %40, %34 : vector<128x1xf32>
      %42 = vector.broadcast %41 : vector<128x1xf32> to vector<128x128xf32>
      %43 = arith.subf %32, %42 : vector<128x128xf32>
      %c0_29 = arith.constant 0 : index
      %c0_30 = arith.constant 0 : index
      %44 = vector.load %arg8[%c0_29, %c0_30] : memref<128x1xi32, #tpu.memory_space<vmem>>, vector<128x1xi32>
      %45 = vector.broadcast %44 : vector<128x1xi32> to vector<128x128xi32>
      %46 = arith.cmpi eq, %28, %45 : vector<128x128xi32>
      %cst_31 = arith.constant 0.000000e+00 : f32
      %47 = vector.broadcast %cst_31 : f32 to vector<128x128xf32>
      %48 = arith.select %46, %43, %47 : vector<128x128xi1>, vector<128x128xf32>
      %cst_32 = arith.constant dense<0.000000e+00> : vector<128xf32>
      %49 = vector.multi_reduction <add>, %48, %cst_32 [1] : vector<128x128xf32> to vector<128xf32>
      %50 = vector.shape_cast %49 : vector<128xf32> to vector<128x1xf32>
      %cst_33 = arith.constant 0.000000e+00 : f32
      %51 = vector.broadcast %cst_33 : f32 to vector<128x1xf32>
      %52 = arith.subf %51, %50 : vector<128x1xf32>
      %c0_34 = arith.constant 0 : index
      %c0_35 = arith.constant 0 : index
      %53 = vector.load %arg10[%c0_34, %c0_35] : memref<128x1xf32, #tpu.memory_space<vmem>>, vector<128x1xf32>
      tpu.vector_store %arg10[%c0_34, %c0_35], %52 {strides = array<i32>} : memref<128x1xf32, #tpu.memory_space<vmem>>, vector<128x1xf32>,
    } else {
    }
    return
  }
  func.func @transform_0(%arg0: i32, %arg1: i32) -> (i32, i32, i32) {
    %c0_i32 = arith.constant 0 : i32
    %c0_i32_0 = arith.constant 0 : i32
    return %arg0, %arg1, %c0_i32 : i32, i32, i32
  }
  func.func @transform_1(%arg0: i32, %arg1: i32) -> (i32, i32, i32) {
    %c0_i32 = arith.constant 0 : i32
    %c0_i32_0 = arith.constant 0 : i32
    return %arg0, %arg1, %c0_i32 : i32, i32, i32
  }
  func.func @transform_2(%arg0: i32, %arg1: i32) -> (i32, i32) {
    %c0_i32 = arith.constant 0 : i32
    %c0_i32_0 = arith.constant 0 : i32
    %c0_i32_1 = arith.constant 0 : i32
    return %c0_i32, %c0_i32_0 : i32, i32
  }
  func.func @transform_3(%arg0: i32, %arg1: i32) -> (i32, i32) {
    %c0_i32 = arith.constant 0 : i32
    %c0_i32_0 = arith.constant 0 : i32
    %c0_i32_1 = arith.constant 0 : i32
    return %c0_i32, %c0_i32_0 : i32, i32
  }
  func.func @transform_4(%arg0: i32, %arg1: i32) -> (i32, i32) {
    %c0_i32 = arith.constant 0 : i32
    %c0_i32_0 = arith.constant 0 : i32
    %c0_i32_1 = arith.constant 0 : i32
    return %c0_i32, %c0_i32_0 : i32, i32
  }
  func.func @transform_5(%arg0: i32, %arg1: i32) -> (i32, i32) {
    %c0_i32 = arith.constant 0 : i32
    %c0_i32_0 = arith.constant 0 : i32
    %c0_i32_1 = arith.constant 0 : i32
    return %c0_i32, %c0_i32_0 : i32, i32
  }
  func.func @transform_6(%arg0: i32, %arg1: i32) -> (i32, i32) {
    %c0_i32 = arith.constant 0 : i32
    %c0_i32_0 = arith.constant 0 : i32
    return %arg0, %c0_i32 : i32, i32
  }
  func.func @transform_7(%arg0: i32, %arg1: i32) -> (i32, i32) {
    %c0_i32 = arith.constant 0 : i32
    %c0_i32_0 = arith.constant 0 : i32
    return %arg0, %c0_i32 : i32, i32
  }
  func.func @transform_8(%arg0: i32, %arg1: i32) -> (i32, i32) {
    %c0_i32 = arith.constant 0 : i32
    %c0_i32_0 = arith.constant 0 : i32
    return %arg0, %c0_i32 : i32, i32
  }
}

</mosaic_0001>

<bundles_post_ra>
// kernel: tpu_custom_call.1
= control target key start
LH: loop header
LB: loop body
LE: loop exit
PB: predicated region body
PF: predicated region fallthrough
CT: control target
= control target key end

     0   :  { %v3573_v3 = vmov 0   ;;  %s5238_s0 = inlined_call_operand.vmem [shape: bf16[128,8,32], index: 0, kind: input, shape index: {}]   ;;  %s5239_s1 = inlined_call_operand.vmem [shape: f32[128,8,1], index: 1, kind: input, shape index: {}]   ;;  %s5240_s2 = inlined_call_operand.vmem [shape: f32[32,32], index: 2, kind: input, shape index: {}]   ;;  %s5241_s3 = inlined_call_operand.vmem [shape: f32[1,32], index: 3, kind: input, shape index: {}]   ;;  %s5242_s4 = inlined_call_operand.vmem [shape: f32[32,128], index: 4, kind: input, shape index: {}]   ;;  %s5243_s5 = inlined_call_operand.vmem [shape: f32[1,128], index: 5, kind: input, shape index: {}]   ;;  %s5244_s6 = inlined_call_operand.vmem [shape: s32[128,1], index: 6, kind: input, shape index: {}]   ;;  %s5245_s7 = inlined_call_operand.hbm [shape: f32[128,128], index: 7, kind: output, shape index: {0}]   ;;  %s5246_s8 = inlined_call_operand.vmem [shape: f32[128,1], index: 8, kind: output, shape index: {1}]  }
   0x1   :  { %v326_v0 = vld [vmem:[%s5239_s1 + $0x20] sm:$0xff]  ;;  %v324_v1 = vld [vmem:[%s5239_s1 + $0x10] sm:$0xff]  ;;  %3447 = vset.pattern.permute.xlu2 %v3573_v3  ;;  %3446 = vset.pattern.permute.xlu1 %v3573_v3 }
   0x2   :  { %v322_v2 = vld [vmem:[%s5239_s1] sm:$0xff]  ;;  %3445 = vset.pattern.permute.xlu0 %v3573_v3  ;;  %472 = vperm.xlu2 %3447, %v326_v0  }
   0x3   :  { %462 = vperm.xlu1 %3446, %v324_v1   ;;  %452 = vperm.xlu0 %3445, %v322_v2  }
   0x4   :  { %14 = vsyncpa [#allocation4], 0  ;;  %v327_v4 = vld [vmem:[%s5239_s1 + $0x28] sm:$0xff]  ;;  %v325_v5 = vld [vmem:[%s5239_s1 + $0x18] sm:$0xff]  ;;  %vm33_vm0 = vcmask 261120   ;;  %v3574_v58 = vmov 0.0  }
   0x5   :  { %v323_v6 = vld [vmem:[%s5239_s1 + $0x8] sm:$0xff]  ;;  %v330_v7 = vld [vmem:[%s5239_s1 + $0x40] sm:$0xff]  ;;  %v329_v8 = vld [vmem:[%s5239_s1 + $0x38] sm:$0xff]  ;;  %34 = vst.msk [vmem:[#allocation2] sm:$0xff] %vm33_vm0, %v3574_v58  ;;  %vm2243_vm1 = vcmask 1041409   ;;  %vm2245_vm2 = vcmask 1042434  }
   0x6   :  { %v328_v9 = vld [vmem:[%s5239_s1 + $0x30] sm:$0xff]  ;;  %v333_v10 = vld [vmem:[%s5239_s1 + $0x58] sm:$0xff]  ;;  %v331_v12 = vld [vmem:[%s5239_s1 + $0x48] sm:$0xff]  ;;  %35 = vst.msk [vmem:[#allocation2 + $0x8] sm:$0xff] %vm33_vm0, %v3574_v58  ;;  %vm2247_vm3 = vcmask 1043459   ;;  %vm2249_vm4 = vcmask 1044484  }
   0x7   :  { %v332_v11 = vld [vmem:[%s5239_s1 + $0x50] sm:$0xff]  ;;  %v335_v14 = vld [vmem:[%s5239_s1 + $0x68] sm:$0xff]  ;;  %v334_v15 = vld [vmem:[%s5239_s1 + $0x60] sm:$0xff]  ;;  %36 = vst.msk [vmem:[#allocation2 + $0x10] sm:$0xff] %vm33_vm0, %v3574_v58  ;;  %vm2251_vm5 = vcmask 1045509   ;;  %vm2253_vm6 = vcmask 1046534  }
   0x8   :  { %v336_v13 = vld [vmem:[%s5239_s1 + $0x70] sm:$0xff]  ;;  %v339_v16 = vld [vmem:[%s5239_s1 + $0x88] sm:$0xff]  ;;  %v338_v17 = vld [vmem:[%s5239_s1 + $0x80] sm:$0xff]  ;;  %37 = vst.msk [vmem:[#allocation2 + $0x18] sm:$0xff] %vm33_vm0, %v3574_v58  ;;  %vm2255_vm7 = vcmask 1047559   ;;  %s3065_s20 = sshll.u32 %s5245_s7, 4  ;;  %s3066_s20 = int_to_ptr.hbm [resolvable:$true] %s3065_s20 }
   0x9   :  { %v337_v18 = vld [vmem:[%s5239_s1 + $0x78] sm:$0xff]  ;;  %v342_v19 = vld [vmem:[%s5239_s1 + $0xa0] sm:$0xff]  ;;  %v340_v21 = vld [vmem:[%s5239_s1 + $0x90] sm:$0xff]  ;;  %38 = vst.msk [vmem:[#allocation2 + $0x20] sm:$0xff] %vm33_vm0, %v3574_v58  ;;  %s3575_s21 = smov [#allocation3]   ;;  %s3576_s23 = smov 128  }
   0xa   :  { %477 = vperm.xlu2 %3447, %v327_v4   ;;  %v341_v20 = vld [vmem:[%s5239_s1 + $0x98] sm:$0xff]  ;;  %v344_v23 = vld [vmem:[%s5239_s1 + $0xb0] sm:$0xff]  ;;  %v343_v24 = vld [vmem:[%s5239_s1 + $0xa8] sm:$0xff]  ;;  %39 = vst.msk [vmem:[#allocation2 + $0x28] sm:$0xff] %vm33_vm0, %v3574_v58  ;;  %s3063_s22 = sshll.u32 %s3575_s21, 4  ;;  %s3577_s24 = smov 8   ;;  %s3064_s22 = int_to_ptr.vmem [resolvable:$true] %s3063_s22 }
   0xb   :  { %467 = vperm.xlu1 %3446, %v325_v5   ;;  %457 = vperm.xlu0 %3445, %v323_v6   ;;  %v345_v22 = vld [vmem:[%s5239_s1 + $0xb8] sm:$0xff]  ;;  %v348_v25 = vld [vmem:[%s5239_s1 + $0xd0] sm:$0xff]  ;;  %v347_v26 = vld [vmem:[%s5239_s1 + $0xc8] sm:$0xff]  ;;  %40 = vst.msk [vmem:[#allocation2 + $0x30] sm:$0xff] %vm33_vm0, %v3574_v58 }
   0xc   :  { %v346_v27 = vld [vmem:[%s5239_s1 + $0xc0] sm:$0xff]  ;;  %v351_v28 = vld [vmem:[%s5239_s1 + $0xe8] sm:$0xff]  ;;  %v349_v30 = vld [vmem:[%s5239_s1 + $0xd8] sm:$0xff]  ;;  %41 = vst.msk [vmem:[#allocation2 + $0x38] sm:$0xff] %vm33_vm0, %v3574_v58 }
   0xd   :  { %v350_v29 = vld [vmem:[%s5239_s1 + $0xe0] sm:$0xff]  ;;  %v353_v32 = vld [vmem:[%s5239_s1 + $0xf8] sm:$0xff]  ;;  %v352_v33 = vld [vmem:[%s5239_s1 + $0xf0] sm:$0xff]  ;;  %42 = vst.msk [vmem:[#allocation2 + $0x40] sm:$0xff] %vm33_vm0, %v3574_v58 }
   0xe   :  { %v354_v31 = vld [vmem:[%s5239_s1 + $0x100] sm:$0xff]  ;;  %v357_v34 = vld [vmem:[%s5239_s1 + $0x118] sm:$0xff]  ;;  %v356_v35 = vld [vmem:[%s5239_s1 + $0x110] sm:$0xff]  ;;  %43 = vst.msk [vmem:[#allocation2 + $0x48] sm:$0xff] %vm33_vm0, %v3574_v58 }
   0xf   :  { %v355_v36 = vld [vmem:[%s5239_s1 + $0x108] sm:$0xff]  ;;  %v360_v38 = vld [vmem:[%s5239_s1 + $0x130] sm:$0xff]  ;;  %v358_v40 = vld [vmem:[%s5239_s1 + $0x120] sm:$0xff]  ;;  %44 = vst.msk [vmem:[#allocation2 + $0x50] sm:$0xff] %vm33_vm0, %v3574_v58 }
  0x10   :  { %v359_v39 = vld [vmem:[%s5239_s1 + $0x128] sm:$0xff]  ;;  %v3370_v41 = vld [vmem:[%s5238_s0 + $0x10] sm:$0xff]   ;;  %v362_v45 = vld [vmem:[%s5239_s1 + $0x140] sm:$0xff]  ;;  %45 = vst.msk [vmem:[#allocation2 + $0x58] sm:$0xff] %vm33_vm0, %v3574_v58 }
  0x11   :  { %v3123_v43 = vunpack.c.l.bf16 %v3370_v41  ;;  %v363_v44 = vld [vmem:[%s5239_s1 + $0x148] sm:$0xff]  ;;  %v361_v46 = vld [vmem:[%s5239_s1 + $0x138] sm:$0xff]  ;;  %v3124_v48 = vunpack.c.h.bf16 %v3370_v41  ;;  %v366_v51 = vld [vmem:[%s5239_s1 + $0x160] sm:$0xff]  ;;  %46 = vst.msk [vmem:[#allocation2 + $0x60] sm:$0xff] %vm33_vm0, %v3574_v58 }
  0x12   :  { %492 = vperm.xlu2 %3447, %v330_v7   ;;  %v3369_v52 = vld [vmem:[%s5238_s0 + $0x8] sm:$0xff]   ;;  %v3114_v53 = vld [vmem:[%s5238_s0] sm:$0xff]   ;;  %v365_v56 = vld [vmem:[%s5239_s1 + $0x158] sm:$0xff]  ;;  %47 = vst.msk [vmem:[#allocation2 + $0x68] sm:$0xff] %vm33_vm0, %v3574_v58 }
  0x13   :  { %487 = vperm.xlu1 %3446, %v329_v8   ;;  %482 = vperm.xlu0 %3445, %v328_v9   ;;  %v364_v57 = vld [vmem:[%s5239_s1 + $0x150] sm:$0xff]  ;;  %v3119_v59 = vunpack.c.l.bf16 %v3369_v52  ;;  %v3115_v60 = vunpack.c.l.bf16 %v3114_v53  ;;  %v369_v5 = vld [vmem:[%s5239_s1 + $0x178] sm:$0xff]  ;;  %48 = vst.msk [vmem:[#allocation2 + $0x70] sm:$0xff] %vm33_vm0, %v3574_v58 }
  0x14   :  { %v368_v9 = vld [vmem:[%s5239_s1 + $0x170] sm:$0xff]  ;;  %49 = vst.msk [vmem:[#allocation2 + $0x78] sm:$0xff] %vm33_vm0, %v3574_v58 }
  0x1a   :  { %507 = vperm.xlu2 %3447, %v333_v10   ;;  %v367_v10 = vld [vmem:[%s5239_s1 + $0x168] sm:$0xff] }
  0x1b   :  { %502 = vperm.xlu1 %3446, %v332_v11   ;;  %497 = vperm.xlu0 %3445, %v331_v12  }
  0x22   :  { %522 = vperm.xlu2 %3447, %v336_v13   ;;  %v3807_v13 = vld [vmem:[%s5238_s0 + $0x20] sm:$0xff]  }
  0x23   :  { %517 = vperm.xlu1 %3446, %v335_v14   ;;  %512 = vperm.xlu0 %3445, %v334_v15   ;;  %v3120_v14 = vunpack.c.h.bf16 %v3369_v52  ;;  %v3116_v15 = vunpack.c.h.bf16 %v3114_v53 }
  0x2a   :  { %537 = vperm.xlu2 %3447, %v339_v16  }
  0x2b   :  { %532 = vperm.xlu1 %3446, %v338_v17   ;;  %527 = vperm.xlu0 %3445, %v337_v18   ;;  %v2432_v18 = vld [vmem:[%s5240_s2 + $0x18] sm:$0xff] }
  0x2c   :  { %2497 = vmatpush.msra.mxu0 %v2432_v18  ;;  %3432 = vmatpush.msra.mxu2 %v2432_v18  ;;  %v3132_v18 = vunpack.c.h.bf16 %v3807_v13 }
  0x32   :  { %552 = vperm.xlu2 %3447, %v342_v19  }
  0x33   :  { %547 = vperm.xlu1 %3446, %v341_v20   ;;  %542 = vperm.xlu0 %3445, %v340_v21  }
  0x3a   :  { %567 = vperm.xlu2 %3447, %v345_v22   ;;  %v3131_v22 = vunpack.c.l.bf16 %v3807_v13 }
  0x3b   :  { %562 = vperm.xlu1 %3446, %v344_v23   ;;  %557 = vperm.xlu0 %3445, %v343_v24  }
  0x42   :  { %582 = vperm.xlu2 %3447, %v348_v25   ;;  %v2431_v25 = vld [vmem:[%s5240_s2 + $0x10] sm:$0xff] }
  0x43   :  { %577 = vperm.xlu1 %3446, %v347_v26   ;;  %572 = vperm.xlu0 %3445, %v346_v27   ;;  %v3829_v26 = vld [vmem:[%s5238_s0 + $0x28] sm:$0xff]  }
  0x44   :  { %2498 = vmatpush.msra.mxu0 %v2431_v25  ;;  %3433 = vmatpush.msra.mxu2 %v2431_v25 }
  0x4a   :  { %597 = vperm.xlu2 %3447, %v351_v28  }
  0x4b   :  { %592 = vperm.xlu1 %3446, %v350_v29   ;;  %587 = vperm.xlu0 %3445, %v349_v30  }
  0x52   :  { %612 = vperm.xlu2 %3447, %v354_v31   ;;  %v372_v31 = vld [vmem:[%s5239_s1 + $0x190] sm:$0xff] }
  0x53   :  { %607 = vperm.xlu1 %3446, %v353_v32   ;;  %602 = vperm.xlu0 %3445, %v352_v33   ;;  %v3371_v32 = vld [vmem:[%s5238_s0 + $0x18] sm:$0xff]   ;;  %v2430_v33 = vld [vmem:[%s5240_s2 + $0x8] sm:$0xff] }
  0x54   :  { %2499 = vmatpush.msra.mxu0 %v2430_v33  ;;  %3434 = vmatpush.msra.mxu2 %v2430_v33 }
  0x5a   :  { %627 = vperm.xlu2 %3447, %v357_v34  }
  0x5b   :  { %622 = vperm.xlu1 %3446, %v356_v35   ;;  %617 = vperm.xlu0 %3445, %v355_v36  }
  0x5c   :  { %v473_v37 = vpop.permute.xlu2 %472 }
  0x5d   :  { %v1094_v47 = vmul.f32 %v3123_v43, %v473_v37  ;;  %v370_v43 = vld [vmem:[%s5239_s1 + $0x180] sm:$0xff] }
  0x5f   :  { %v1247_v50 = vsel %vm33_vm0, %v1094_v47, 0.0  ;;  %v3127_v47 = vunpack.c.l.bf16 %v3371_v32 }
  0x60   :  { %v1248_v54 = vrot.slane %v1247_v50, 4 }
  0x62   :  { %642 = vperm.xlu2 %3447, %v360_v38   ;;  %v1249_v61 = vadd.f32 %v1248_v54, %v1247_v50  ;;  %v371_v38 = vld [vmem:[%s5239_s1 + $0x188] sm:$0xff] }
  0x63   :  { %637 = vperm.xlu1 %3446, %v359_v39   ;;  %632 = vperm.xlu0 %3445, %v358_v40   ;;  %v3853_v40 = vld [vmem:[%s5238_s0 + $0x38] sm:$0xff]  }
  0x64   :  { %v478_v42 = vpop.permute.xlu2 %477  ;;  %v1250_v6 = vrot.slane %v1249_v61, 2  ;;  %v3143_v54 = vunpack.c.l.bf16 %v3853_v40 }
  0x65   :  { %v1095_v55 = vmul.f32 %v3124_v48, %v478_v42 }
  0x66   :  { %v1251_v19 = vadd.f32 %v1250_v6, %v1249_v61 }
  0x67   :  { %v1254_v62 = vsel %vm33_vm0, %v1095_v55, 0.0 }
  0x68   :  { %v1255_v4 = vrot.slane %v1254_v62, 4  ;;  %v1252_v34 = vrot.slane %v1251_v19, 1 }
  0x6a   :  { %657 = vperm.xlu2 %3447, %v363_v44   ;;  %v1256_v16 = vadd.f32 %v1255_v4, %v1254_v62  ;;  %v2429_v44 = vld [vmem:[%s5240_s2] sm:$0xff]  ;;  %v3862_v52 = vadd.f32 %v1252_v34, %v1251_v19 }
  0x6b   :  { %652 = vperm.xlu1 %3446, %v362_v45   ;;  %647 = vperm.xlu0 %3445, %v361_v46   ;;  %v3136_v45 = vunpack.c.h.bf16 %v3829_v26  ;;  %v3128_v46 = vunpack.c.h.bf16 %v3371_v32 }
  0x6c   :  { %v3752_v49 = vpop.permute.xlu2 %492  ;;  %v1257_v29 = vrot.slane %v1256_v16, 2  ;;  %2500 = vmatpush.msra.mxu0 %v2429_v44  ;;  %3435 = vmatpush.msra.mxu2 %v2429_v44 }
  0x6d   :  { %v1098_v39 = vmul.f32 %v3131_v22, %v3752_v49 }
  0x6e   :  { %v1258_v48 = vadd.f32 %v1257_v29, %v1256_v16 }
  0x72   :  { %672 = vperm.xlu2 %3447, %v366_v51  }
  0x73   :  { %667 = vperm.xlu1 %3446, %v365_v56   ;;  %662 = vperm.xlu0 %3445, %v364_v57   ;;  %v1275_v56 = vsel %vm33_vm0, %v1098_v39, 0.0 }
  0x74   :  { %v3779_v63 = vpop.permute.xlu2 %507  ;;  %v1276_v6 = vrot.slane %v1275_v56, 4 }
  0x75   :  { %v463_v0 = vpop.permute.xlu1 %462  ;;  %v453_v1 = vpop.permute.xlu0 %452  ;;  %v1101_v61 = vmul.f32 %v3136_v45, %v3779_v63  ;;  %v374_v63 = vld [vmem:[%s5239_s1 + $0x1a0] sm:$0xff] }
  0x76   :  { %v1092_v2 = vmul.f32 %v3119_v59, %v463_v0  ;;  %v1090_v3 = vmul.f32 %v3115_v60, %v453_v1  ;;  %v1259_v1 = vrot.slane %v1258_v48, 1  ;;  %v1277_v25 = vadd.f32 %v1276_v6, %v1275_v56 }
  0x77   :  { %v1296_v16 = vsel %vm33_vm0, %v1101_v61, 0.0 }
  0x78   :  { %v1233_v7 = vsel %vm33_vm0, %v1092_v2, 0.0  ;;  %v1219_v8 = vsel %vm33_vm0, %v1090_v3, 0.0  ;;  %v1297_v13 = vrot.slane %v1296_v16, 4 }
  0x79   :  { %v1234_v11 = vrot.slane %v1233_v7, 4  ;;  %v1220_v12 = vrot.slane %v1219_v8, 4 }
  0x7a   :  { %687 = vperm.xlu2 %3447, %v369_v5   ;;  %v375_v5 = vld [vmem:[%s5239_s1 + $0x1a8] sm:$0xff] }
  0x7b   :  { %v1221_v17 = vadd.f32 %v1220_v12, %v1219_v8  ;;  %682 = vperm.xlu1 %3446, %v368_v9   ;;  %677 = vperm.xlu0 %3445, %v367_v10   ;;  %v1235_v20 = vadd.f32 %v1234_v11, %v1233_v7 }
  0x7c   :  { %v3816_v21 = vpop.permute.xlu2 %522 }
  0x7d   :  { %v468_v23 = vpop.permute.xlu1 %467  ;;  %v458_v24 = vpop.permute.xlu0 %457  ;;  %v1222_v30 = vrot.slane %v1221_v17, 2  ;;  %v1236_v35 = vrot.slane %v1235_v20, 2  ;;  %v1104_v44 = vmul.f32 %v3143_v54, %v3816_v21  ;;  %v376_v21 = vld [vmem:[%s5239_s1 + $0x1b0] sm:$0xff] }
  0x7e   :  { %v1093_v27 = vmul.f32 %v3120_v14, %v468_v23  ;;  %v1091_v28 = vmul.f32 %v3116_v15, %v458_v24  ;;  %v373_v15 = vld [vmem:[%s5239_s1 + $0x198] sm:$0xff]  ;;  %v1260_v24 = vadd.f32 %v1259_v1, %v1258_v48 }
  0x7f   :  { %v1223_v49 = vadd.f32 %v1222_v30, %v1221_v17  ;;  %v1237_v53 = vadd.f32 %v1236_v35, %v1235_v20  ;;  %v3135_v17 = vunpack.c.l.bf16 %v3829_v26 }
  0x80   :  { %v1240_v36 = vsel %vm33_vm0, %v1093_v27, 0.0  ;;  %v1226_v37 = vsel %vm33_vm0, %v1091_v28, 0.0 }
  0x81   :  { %v1241_v41 = vrot.slane %v1240_v36, 4  ;;  %v1227_v42 = vrot.slane %v1226_v37, 4  ;;  %v1224_v2 = vrot.slane %v1223_v49, 1  ;;  %v1238_v7 = vrot.slane %v1237_v53, 1 }
  0x82   :  { %702 = vperm.xlu2 %3447, %v372_v31  }
  0x83   :  { %v1242_v50 = vadd.f32 %v1241_v41, %v1240_v36  ;;  %v1228_v51 = vadd.f32 %v1227_v42, %v1226_v37  ;;  %697 = vperm.xlu1 %3446, %v371_v38   ;;  %692 = vperm.xlu0 %3445, %v370_v43   ;;  %v1225_v19 = vadd.f32 %v1224_v2, %v1223_v49  ;;  %v378_v41 = vld [vmem:[%s5239_s1 + $0x1c0] sm:$0xff]  ;;  %v3374_v42 = vld [vmem:[%s5238_s0 + $0x30] sm:$0xff]   ;;  %v1278_v43 = vrot.slane %v1277_v25, 2 }
  0x84   :  { %v3865_v55 = vpop.permute.xlu2 %537  ;;  %v1239_v27 = vadd.f32 %v1238_v7, %v1237_v53  ;;  %v1298_v53 = vadd.f32 %v1297_v13, %v1296_v16  ;;  %v3140_v56 = vunpack.c.h.bf16 %v3374_v42 }
  0x85   :  { %v1243_v57 = vrot.slane %v1242_v50, 2  ;;  %v1229_v58 = vrot.slane %v1228_v51, 2  ;;  %v488_v59 = vpop.permute.xlu1 %487  ;;  %v483_v60 = vpop.permute.xlu0 %482 }
  0x86   :  { %v1097_v62 = vmul.f32 %v3128_v46, %v488_v59  ;;  %v1096_v0 = vmul.f32 %v3127_v47, %v483_v60  ;;  %v377_v46 = vld [vmem:[%s5239_s1 + $0x1b8] sm:$0xff]  ;;  %v3904_v47 = vld [vmem:[%s5238_s0 + $0x40] sm:$0xff]  }
  0x87   :  { %v1244_v3 = vadd.f32 %v1243_v57, %v1242_v50  ;;  %v1230_v4 = vadd.f32 %v1229_v58, %v1228_v51  ;;  %v3139_v57 = vunpack.c.l.bf16 %v3374_v42 }
  0x88   :  { %v1268_v8 = vsel %vm33_vm0, %v1097_v62, 0.0  ;;  %v1261_v9 = vsel %vm33_vm0, %v1096_v0, 0.0  ;;  %v1279_v62 = vadd.f32 %v1278_v43, %v1277_v25  ;;  %v3148_v0 = vunpack.c.h.bf16 %v3904_v47 }
  0x89   :  { %v1245_v10 = vrot.slane %v1244_v3, 1  ;;  %v1231_v11 = vrot.slane %v1230_v4, 1  ;;  %v1269_v12 = vrot.slane %v1268_v8, 4  ;;  %v1262_v14 = vrot.slane %v1261_v9, 4 }
  0x8a   :  { %717 = vperm.xlu2 %3447, %v375_v5   ;;  %v3921_v5 = vld [vmem:[%s5238_s0 + $0x50] sm:$0xff]  }
  0x8b   :  { %v1232_v20 = vadd.f32 %v1231_v11, %v1230_v4  ;;  %v1270_v22 = vadd.f32 %v1269_v12, %v1268_v8  ;;  %v1263_v23 = vadd.f32 %v1262_v14, %v1261_v9  ;;  %712 = vperm.xlu1 %3446, %v374_v63   ;;  %707 = vperm.xlu0 %3445, %v373_v15   ;;  %v1299_v63 = vrot.slane %v1298_v53, 2 }
  0x8c   :  { %v3883_v28 = vpop.permute.xlu2 %552  ;;  %v1246_v29 = vadd.f32 %v1245_v10, %v1244_v3  ;;  %v1317_v3 = vsel %vm33_vm0, %v1104_v44, 0.0 }
  0x8d   :  { %v2244_v30 = vsel %vm2243_vm1, %v1232_v20, %v1225_v19  ;;  %v1271_v31 = vrot.slane %v1270_v22, 2  ;;  %v1264_v32 = vrot.slane %v1263_v23, 2  ;;  %v503_v26 = vpop.permute.xlu1 %502  ;;  %v498_v33 = vpop.permute.xlu0 %497  ;;  %v3155_v19 = vunpack.c.l.bf16 %v3921_v5 }
  0x8e   :  { %v2246_v34 = vsel %vm2245_vm2, %v1239_v27, %v2244_v30  ;;  %v1100_v35 = vmul.f32 %v3135_v17, %v503_v26  ;;  %v1099_v36 = vmul.f32 %v3132_v18, %v498_v33  ;;  %v381_v17 = vld [vmem:[%s5239_s1 + $0x1d8] sm:$0xff]  ;;  %v1318_v18 = vrot.slane %v1317_v3, 4 }
  0x8f   :  { %v2248_v37 = vsel %vm2247_vm3, %v1246_v29, %v2246_v34  ;;  %v1272_v38 = vadd.f32 %v1271_v31, %v1270_v22  ;;  %v1265_v39 = vadd.f32 %v1264_v32, %v1263_v23  ;;  %v380_v23 = vld [vmem:[%s5239_s1 + $0x1d0] sm:$0xff]  ;;  %v3938_v27 = vld [vmem:[%s5238_s0 + $0x58] sm:$0xff]   ;;  %v379_v31 = vld [vmem:[%s5239_s1 + $0x1c8] sm:$0xff]  ;;  %v1280_v32 = vrot.slane %v1279_v62, 1 }
  0x90   :  { %v1289_v45 = vsel %vm33_vm0, %v1100_v35, 0.0  ;;  %v2250_v50 = vsel %vm2249_vm4, %v3862_v52, %v2248_v37  ;;  %v1282_v54 = vsel %vm33_vm0, %v1099_v36, 0.0  ;;  %v306_v52 = vld [vmem:[#allocation2] sm:$0xff]  ;;  %v1300_v26 = vadd.f32 %v1299_v63, %v1298_v53 }
  0x91   :  { %v1273_v48 = vrot.slane %v1272_v38, 1  ;;  %v1266_v49 = vrot.slane %v1265_v39, 1  ;;  %v1290_v51 = vrot.slane %v1289_v45, 4  ;;  %v1283_v61 = vrot.slane %v1282_v54, 4 }
  0x92   :  { %732 = vperm.xlu2 %3447, %v378_v41   ;;  %v2252_v1 = vsel %vm2251_vm5, %v1260_v24, %v2250_v50  ;;  %v1107_v24 = vmul.f32 %v3148_v0, %v3865_v55  ;;  %v3147_v33 = vunpack.c.l.bf16 %v3904_v47  ;;  %v3144_v55 = vunpack.c.h.bf16 %v3853_v40  ;;  %v3377_v50 = vld [vmem:[%s5238_s0 + $0x48] sm:$0xff]  }
  0x93   :  { %v1274_v58 = vadd.f32 %v1273_v48, %v1272_v38  ;;  %v1267_v59 = vadd.f32 %v1266_v49, %v1265_v39  ;;  %v1291_v60 = vadd.f32 %v1290_v51, %v1289_v45  ;;  %727 = vperm.xlu1 %3446, %v377_v46   ;;  %722 = vperm.xlu0 %3445, %v376_v21   ;;  %v3160_v38 = vunpack.c.h.bf16 %v3938_v27 }
  0x94   :  { %v3914_v2 = vpop.permute.xlu2 %567  ;;  %v1284_v7 = vadd.f32 %v1283_v61, %v1282_v54  ;;  %v1319_v37 = vadd.f32 %v1318_v18, %v1317_v3  ;;  %v1338_v41 = vsel %vm33_vm0, %v1107_v24, 0.0  ;;  %v1281_v47 = vadd.f32 %v1280_v32, %v1279_v62  ;;  %v383_v61 = vld [vmem:[%s5239_s1 + $0x1e8] sm:$0xff] }
  0x95   :  { %v2254_v4 = vsel %vm2253_vm6, %v1267_v59, %v2252_v1  ;;  %v1292_v6 = vrot.slane %v1291_v60, 2  ;;  %v518_v8 = vpop.permute.xlu1 %517  ;;  %v513_v9 = vpop.permute.xlu0 %512  ;;  %v1110_v40 = vmul.f32 %v3155_v19, %v3883_v28  ;;  %v1301_v51 = vrot.slane %v1300_v26, 1  ;;  %v387_v32 = vld [vmem:[%s5239_s1 + $0x208] sm:$0xff] }
  0x96   :  { %v2256_v10 = vsel %vm2255_vm7, %v1274_v58, %v2254_v4  ;;  %v1103_v11 = vmul.f32 %v3140_v56, %v518_v8  ;;  %v1102_v12 = vmul.f32 %v3139_v57, %v513_v9  ;;  %v1285_v16 = vrot.slane %v1284_v7, 2  ;;  %v384_v56 = vld [vmem:[%s5239_s1 + $0x1f0] sm:$0xff] }
  0x97   :  { %v2378_v14 = vadd.f32 %v2256_v10, %v306_v52  ;;  %v1293_v15 = vadd.f32 %v1292_v6, %v1291_v60  ;;  %v1320_v57 = vrot.slane %v1319_v37, 2  ;;  %v1339_v58 = vrot.slane %v1338_v41, 4  ;;  %v382_v52 = vld [vmem:[%s5239_s1 + $0x1e0] sm:$0xff] }
  0x98   :  { %v1310_v20 = vsel %vm33_vm0, %v1103_v11, 0.0  ;;  %v1303_v22 = vsel %vm33_vm0, %v1102_v12, 0.0  ;;  %v1286_v25 = vadd.f32 %v1285_v16, %v1284_v7  ;;  %v3152_v1 = vunpack.c.h.bf16 %v3377_v50 }
  0x99   :  { %2394 = vst.msk [vmem:[#allocation2] sm:$0xff] %vm33_vm0, %v2378_v14  ;;  %v1311_v29 = vrot.slane %v1310_v20, 4  ;;  %v1304_v30 = vrot.slane %v1303_v22, 4  ;;  %v1294_v13 = vrot.slane %v1293_v15, 1  ;;  %v3151_v3 = vunpack.c.l.bf16 %v3377_v50 }
  0x9a   :  { %747 = vperm.xlu2 %3447, %v381_v17   ;;  %v1287_v34 = vrot.slane %v1286_v25, 1  ;;  %v1359_v4 = vsel %vm33_vm0, %v1110_v40, 0.0  ;;  %v1113_v6 = vmul.f32 %v3160_v38, %v3914_v2  ;;  %v1302_v12 = vadd.f32 %v1301_v51, %v1300_v26 }
  0x9b   :  { %v1312_v35 = vadd.f32 %v1311_v29, %v1310_v20  ;;  %v1305_v36 = vadd.f32 %v1304_v30, %v1303_v22  ;;  %742 = vperm.xlu1 %3446, %v380_v23   ;;  %737 = vperm.xlu0 %3445, %v379_v31   ;;  %v1295_v21 = vadd.f32 %v1294_v13, %v1293_v15  ;;  %v1360_v17 = vrot.slane %v1359_v4, 4 }
  0x9c   :  { %v3946_v39 = vpop.permute.xlu2 %582  ;;  %v1288_v42 = vadd.f32 %v1287_v34, %v1286_v25  ;;  %v1321_v14 = vadd.f32 %v1320_v57, %v1319_v37  ;;  %v1340_v15 = vadd.f32 %v1339_v58, %v1338_v41  ;;  %v1380_v25 = vsel %vm33_vm0, %v1113_v6, 0.0  ;;  %v386_v34 = vld [vmem:[%s5239_s1 + $0x200] sm:$0xff] }
  0x9d   :  { %v1313_v43 = vrot.slane %v1312_v35, 2  ;;  %v1306_v44 = vrot.slane %v1305_v36, 2  ;;  %v533_v45 = vpop.permute.xlu1 %532  ;;  %v528_v46 = vpop.permute.xlu0 %527  ;;  %v390_v6 = vld [vmem:[%s5239_s1 + $0x220] sm:$0xff] }
  0x9e   :  { %v1106_v48 = vmul.f32 %v3147_v33, %v533_v45  ;;  %v1105_v49 = vmul.f32 %v3144_v55, %v528_v46  ;;  %v2257_v59 = vsel %vm2243_vm1, %v1288_v42, %v1281_v47  ;;  %v1322_v26 = vrot.slane %v1321_v14, 1  ;;  %v385_v42 = vld [vmem:[%s5239_s1 + $0x1f8] sm:$0xff] }
  0x9f   :  { %v1314_v53 = vadd.f32 %v1313_v43, %v1312_v35  ;;  %v1307_v54 = vadd.f32 %v1306_v44, %v1305_v36  ;;  %v2258_v9 = vsel %vm2245_vm2, %v1295_v21, %v2257_v59  ;;  %v1341_v33 = vrot.slane %v1340_v15, 2  ;;  %v3985_v36 = vld [vmem:[%s5238_s0 + $0x68] sm:$0xff]  }
  0xa0   :  { %v1331_v28 = vsel %vm33_vm0, %v1106_v48, 0.0  ;;  %v2413_v60 = vld [vmem:[#allocation2] sm:$0xff]  ;;  %v1324_v8 = vsel %vm33_vm0, %v1105_v49, 0.0  ;;  %v2259_v22 = vsel %vm2247_vm3, %v1302_v12, %v2258_v9  ;;  %v1361_v35 = vadd.f32 %v1360_v17, %v1359_v4 }
  0xa1   :  { %v1308_v62 = vrot.slane %v1307_v54, 1  ;;  %v1332_v0 = vrot.slane %v1331_v28, 4  ;;  %3081 = vmatmul.msk.f32.vlgmr.msra.gmra.mxu0 %vm33_vm0, %v2413_v60  ;;  %v1315_v7 = vrot.slane %v1314_v53, 1  ;;  %v1325_v11 = vrot.slane %v1324_v8, 4 }
  0xa2   :  { %762 = vperm.xlu2 %3447, %v384_v56   ;;  %v1381_v43 = vrot.slane %v1380_v25, 4  ;;  %v3159_v45 = vunpack.c.l.bf16 %v3938_v27  ;;  %v3156_v46 = vunpack.c.h.bf16 %v3921_v5  ;;  %v1323_v50 = vadd.f32 %v1322_v26, %v1321_v14  ;;  %v307_v56 = vld [vmem:[#allocation2 + $0x8] sm:$0xff] }
  0xa3   :  { %v1309_v63 = vadd.f32 %v1308_v62, %v1307_v54  ;;  %v1333_v10 = vadd.f32 %v1332_v0, %v1331_v28  ;;  %757 = vperm.xlu1 %3446, %v383_v61   ;;  %752 = vperm.xlu0 %3445, %v382_v52   ;;  %v1326_v18 = vadd.f32 %v1325_v11, %v1324_v8  ;;  %v3167_v21 = vunpack.c.l.bf16 %v3985_v36  ;;  %v389_v11 = vld [vmem:[%s5239_s1 + $0x218] sm:$0xff] }
  0xa4   :  { %v3969_v16 = vpop.permute.xlu2 %597  ;;  %v1316_v20 = vadd.f32 %v1315_v7, %v1314_v53  ;;  %v1342_v51 = vadd.f32 %v1341_v33, %v1340_v15  ;;  %v3997_v53 = vld [vmem:[%s5238_s0 + $0x70] sm:$0xff]   ;;  %v1362_v27 = vrot.slane %v1361_v35, 2  ;;  %v1382_v60 = vadd.f32 %v1381_v43, %v1380_v25  ;;  %v3380_v7 = vld [vmem:[%s5238_s0 + $0x60] sm:$0xff]  }
  0xa5   :  { %v548_v19 = vpop.permute.xlu1 %547  ;;  %v543_v2 = vpop.permute.xlu0 %542  ;;  %v2260_v29 = vsel %vm2249_vm4, %v1309_v63, %v2259_v22  ;;  %v1334_v30 = vrot.slane %v1333_v10, 2  ;;  %v1327_v31 = vrot.slane %v1326_v18, 2  ;;  %v1116_v8 = vmul.f32 %v3167_v21, %v3946_v39 }
  0xa6   :  { %v1109_v23 = vmul.f32 %v3152_v1, %v548_v19  ;;  %v1108_v24 = vmul.f32 %v3151_v3, %v543_v2  ;;  %v2261_v44 = vsel %vm2251_vm5, %v1316_v20, %v2260_v29  ;;  %v3172_v3 = vunpack.c.h.bf16 %v3997_v53 }
  0xa7   :  { %v1328_v37 = vadd.f32 %v1327_v31, %v1326_v18  ;;  %v1335_v47 = vadd.f32 %v1334_v30, %v1333_v10  ;;  %v2262_v61 = vsel %vm2253_vm6, %v1323_v50, %v2261_v44  ;;  %v1343_v12 = vrot.slane %v1342_v51, 1  ;;  %v388_v18 = vld [vmem:[%s5239_s1 + $0x210] sm:$0xff] }
  0xa8   :  { %v1352_v55 = vsel %vm33_vm0, %v1109_v23, 0.0  ;;  %v1345_v13 = vsel %vm33_vm0, %v1108_v24, 0.0  ;;  %v1363_v14 = vadd.f32 %v1362_v27, %v1361_v35  ;;  %v1383_v19 = vrot.slane %v1382_v60, 2  ;;  %v392_v50 = vld [vmem:[%s5239_s1 + $0x230] sm:$0xff] }
  0xa9   :  { %v1353_v38 = vrot.slane %v1352_v55, 4  ;;  %v1346_v41 = vrot.slane %v1345_v13, 4  ;;  %v1329_v40 = vrot.slane %v1328_v37, 1  ;;  %v1336_v52 = vrot.slane %v1335_v47, 1 }
  0xaa   :  { %777 = vperm.xlu2 %3447, %v387_v32   ;;  %v3164_v2 = vunpack.c.h.bf16 %v3380_v7  ;;  %v3163_v20 = vunpack.c.l.bf16 %v3380_v7  ;;  %v1119_v23 = vmul.f32 %v3172_v3, %v3969_v16  ;;  %v1401_v25 = vsel %vm33_vm0, %v1116_v8, 0.0 }
  0xab   :  { %v1354_v48 = vadd.f32 %v1353_v38, %v1352_v55  ;;  %v1347_v49 = vadd.f32 %v1346_v41, %v1345_v13  ;;  %772 = vperm.xlu1 %3446, %v386_v34   ;;  %767 = vperm.xlu0 %3445, %v385_v42   ;;  %v1330_v5 = vadd.f32 %v1329_v40, %v1328_v37  ;;  %v1364_v26 = vrot.slane %v1363_v14, 1 }
  0xac   :  { %v3999_v54 = vpop.permute.xlu2 %612  ;;  %v1337_v22 = vadd.f32 %v1336_v52, %v1335_v47  ;;  %v1344_v32 = vadd.f32 %v1343_v12, %v1342_v51  ;;  %v1384_v35 = vadd.f32 %v1383_v19, %v1382_v60  ;;  %v1402_v16 = vrot.slane %v1401_v25, 4  ;;  %v4032_v47 = vld [vmem:[%s5238_s0 + $0x80] sm:$0xff]   ;;  %v396_v19 = vld [vmem:[%s5239_s1 + $0x250] sm:$0xff] }
  0xad   :  { %v1355_v57 = vrot.slane %v1354_v48, 2  ;;  %v1348_v58 = vrot.slane %v1347_v49, 2  ;;  %v563_v59 = vpop.permute.xlu1 %562  ;;  %v558_v28 = vpop.permute.xlu0 %557  ;;  %v2263_v1 = vsel %vm2255_vm7, %v1330_v5, %v2262_v61  ;;  %v1422_v43 = vsel %vm33_vm0, %v1119_v23, 0.0 }
  0xae   :  { %v1112_v62 = vmul.f32 %v3159_v45, %v563_v59  ;;  %v1111_v0 = vmul.f32 %v3156_v46, %v558_v28  ;;  %v2379_v9 = vadd.f32 %v2263_v1, %v307_v56  ;;  %v2264_v42 = vsel %vm2243_vm1, %v1344_v32, %v1337_v22  ;;  %v393_v45 = vld [vmem:[%s5239_s1 + $0x238] sm:$0xff]  ;;  %v4062_v22 = vld [vmem:[%s5238_s0 + $0x88] sm:$0xff]  }
  0xaf   :  { %v1349_v4 = vadd.f32 %v1348_v58, %v1347_v49  ;;  %v1356_v63 = vadd.f32 %v1355_v57, %v1354_v48  ;;  %v391_v57 = vld [vmem:[%s5239_s1 + $0x228] sm:$0xff]  ;;  %v1423_v58 = vrot.slane %v1422_v43, 4  ;;  %v3171_v28 = vunpack.c.l.bf16 %v3997_v53 }
  0xb0   :  { %v1373_v10 = vsel %vm33_vm0, %v1112_v62, 0.0  ;;  %2395 = vst.msk [vmem:[#allocation2 + $0x8] sm:$0xff] %vm33_vm0, %v2379_v9  ;;  %v1366_v39 = vsel %vm33_vm0, %v1111_v0, 0.0  ;;  %v3168_v60 = vunpack.c.h.bf16 %v3985_v36  ;;  %v1385_v61 = vrot.slane %v1384_v35, 1 }
  0xb1   :  { %v1350_v15 = vrot.slane %v1349_v4, 1  ;;  %v1374_v17 = vrot.slane %v1373_v10, 4  ;;  %v1357_v29 = vrot.slane %v1356_v63, 1  ;;  %v1367_v30 = vrot.slane %v1366_v39, 4 }
  0xb2   :  { %792 = vperm.xlu2 %3447, %v390_v6   ;;  %v3179_v62 = vunpack.c.l.bf16 %v4032_v47  ;;  %v1365_v1 = vadd.f32 %v1364_v26, %v1363_v14  ;;  %v1403_v7 = vadd.f32 %v1402_v16, %v1401_v25  ;;  %v1424_v36 = vadd.f32 %v1423_v58, %v1422_v43  ;;  %v395_v25 = vld [vmem:[%s5239_s1 + $0x248] sm:$0xff]  ;;  %v394_v26 = vld [vmem:[%s5239_s1 + $0x240] sm:$0xff] }
  0xb3   :  { %v1375_v24 = vadd.f32 %v1374_v17, %v1373_v10  ;;  %787 = vperm.xlu1 %3446, %v389_v11   ;;  %782 = vperm.xlu0 %3445, %v388_v18   ;;  %v1351_v33 = vadd.f32 %v1350_v15, %v1349_v4  ;;  %v1368_v37 = vadd.f32 %v1367_v30, %v1366_v39  ;;  %v3383_v39 = vld [vmem:[%s5238_s0 + $0x78] sm:$0xff]   ;;  %v399_v58 = vld [vmem:[%s5239_s1 + $0x268] sm:$0xff] }
  0xb4   :  { %v4022_v31 = vpop.permute.xlu2 %627  ;;  %v1358_v46 = vadd.f32 %v1357_v29, %v1356_v63  ;;  %v1386_v17 = vadd.f32 %v1385_v61, %v1384_v35  ;;  %v1122_v18 = vmul.f32 %v3179_v62, %v3999_v54  ;;  %v1404_v29 = vrot.slane %v1403_v7, 2  ;;  %v398_v62 = vld [vmem:[%s5239_s1 + $0x260] sm:$0xff] }
  0xb5   :  { %v1376_v55 = vrot.slane %v1375_v24, 2  ;;  %v578_v13 = vpop.permute.xlu1 %577  ;;  %v573_v34 = vpop.permute.xlu0 %572  ;;  %v1369_v40 = vrot.slane %v1368_v37, 2  ;;  %v2265_v51 = vsel %vm2245_vm2, %v1351_v33, %v2264_v42  ;;  %v1425_v33 = vrot.slane %v1424_v36, 2 }
  0xb6   :  { %v1115_v38 = vmul.f32 %v3164_v2, %v578_v13  ;;  %v1114_v41 = vmul.f32 %v3163_v20, %v573_v34  ;;  %v2266_v3 = vsel %vm2247_vm3, %v1358_v46, %v2265_v51  ;;  %v308_v2 = vld [vmem:[#allocation2 + $0x10] sm:$0xff]  ;;  %v3176_v34 = vunpack.c.h.bf16 %v3383_v39 }
  0xb7   :  { %v1377_v44 = vadd.f32 %v1376_v55, %v1375_v24  ;;  %v2414_v5 = vld [vmem:[#allocation2 + $0x8] sm:$0xff]  ;;  %v1370_v59 = vadd.f32 %v1369_v40, %v1368_v37  ;;  %v2267_v14 = vsel %vm2249_vm4, %v1365_v1, %v2266_v3  ;;  %v3184_v37 = vunpack.c.h.bf16 %v4062_v22  ;;  %v4094_v3 = vld [vmem:[%s5238_s0 + $0x98] sm:$0xff]  }
  0xb8   :  { %v1394_v48 = vsel %vm33_vm0, %v1115_v38, 0.0  ;;  %v1387_v49 = vsel %vm33_vm0, %v1114_v41, 0.0  ;;  %3082 = vmatmul.msk.f32.gmra.mxu0 %vm33_vm0, %v2414_v5  ;;  %v3175_v41 = vunpack.c.l.bf16 %v3383_v39  ;;  %v1443_v16 = vsel %vm33_vm0, %v1122_v18, 0.0 }
  0xb9   :  { %v1378_v21 = vrot.slane %v1377_v44, 1  ;;  %v1395_v27 = vrot.slane %v1394_v48, 4  ;;  %v1388_v56 = vrot.slane %v1387_v49, 4  ;;  %v1371_v4 = vrot.slane %v1370_v59, 1 }
  0xba   :  { %807 = vperm.xlu2 %3447, %v393_v45   ;;  %v1405_v46 = vadd.f32 %v1404_v29, %v1403_v7  ;;  %v3191_v39 = vunpack.c.l.bf16 %v4094_v3 }
  0xbb   :  { %v1396_v0 = vadd.f32 %v1395_v27, %v1394_v48  ;;  %v1389_v52 = vadd.f32 %v1388_v56, %v1387_v49  ;;  %802 = vperm.xlu1 %3446, %v392_v50   ;;  %797 = vperm.xlu0 %3445, %v391_v57   ;;  %v1379_v8 = vadd.f32 %v1378_v21, %v1377_v44  ;;  %v1444_v27 = vrot.slane %v1443_v16, 4 }
  0xbc   :  { %v4048_v6 = vpop.permute.xlu2 %642  ;;  %v1372_v11 = vadd.f32 %v1371_v4, %v1370_v59  ;;  %v1426_v50 = vadd.f32 %v1425_v33, %v1424_v36  ;;  %v1125_v56 = vmul.f32 %v3184_v37, %v4022_v31  ;;  %v397_v31 = vld [vmem:[%s5239_s1 + $0x258] sm:$0xff]  ;;  %v3180_v36 = vunpack.c.h.bf16 %v4032_v47  ;;  %v3386_v33 = vld [vmem:[%s5238_s0 + $0x90] sm:$0xff]  }
  0xbd   :  { %v1397_v9 = vrot.slane %v1396_v0, 2  ;;  %v1390_v63 = vrot.slane %v1389_v52, 2  ;;  %v593_v53 = vpop.permute.xlu1 %592  ;;  %v588_v10 = vpop.permute.xlu0 %587  ;;  %v401_v37 = vld [vmem:[%s5239_s1 + $0x278] sm:$0xff] }
  0xbe   :  { %v1118_v12 = vmul.f32 %v3171_v28, %v593_v53  ;;  %v1117_v15 = vmul.f32 %v3168_v60, %v588_v10  ;;  %v2268_v20 = vsel %vm2251_vm5, %v1372_v11, %v2267_v14  ;;  %v1445_v53 = vadd.f32 %v1444_v27, %v1443_v16 }
  0xbf   :  { %v1398_v23 = vadd.f32 %v1397_v9, %v1396_v0  ;;  %v1391_v54 = vadd.f32 %v1390_v63, %v1389_v52  ;;  %v2269_v30 = vsel %vm2253_vm6, %v1379_v8, %v2268_v20  ;;  %v1406_v0 = vrot.slane %v1405_v46, 1 }
  0xc0   :  { %v1415_v24 = vsel %vm33_vm0, %v1118_v12, 0.0  ;;  %v2270_v55 = vsel %vm2255_vm7, %v1386_v17, %v2269_v30  ;;  %v1408_v13 = vsel %vm33_vm0, %v1117_v15, 0.0  ;;  %v3183_v9 = vunpack.c.l.bf16 %v4062_v22 }
  0xc1   :  { %v1416_v32 = vrot.slane %v1415_v24, 4  ;;  %v2380_v35 = vadd.f32 %v2270_v55, %v308_v2  ;;  %v1399_v42 = vrot.slane %v1398_v23, 1  ;;  %v1392_v43 = vrot.slane %v1391_v54, 1 }
  0xc2   :  { %822 = vperm.xlu2 %3447, %v396_v19   ;;  %v1409_v44 = vrot.slane %v1408_v13, 4  ;;  %v1427_v63 = vrot.slane %v1426_v50, 1  ;;  %v1464_v11 = vsel %vm33_vm0, %v1125_v56, 0.0  ;;  %v1407_v19 = vadd.f32 %v1406_v0, %v1405_v46 }
  0xc3   :  { %v1417_v38 = vadd.f32 %v1416_v32, %v1415_v24  ;;  %817 = vperm.xlu1 %3446, %v395_v25   ;;  %812 = vperm.xlu0 %3445, %v394_v26   ;;  %2396 = vst.msk [vmem:[#allocation2 + $0x10] sm:$0xff] %vm33_vm0, %v2380_v35  ;;  %v1400_v59 = vadd.f32 %v1399_v42, %v1398_v23  ;;  %v1465_v25 = vrot.slane %v1464_v11, 4  ;;  %v402_v26 = vld [vmem:[%s5239_s1 + $0x280] sm:$0xff] }
  0xc4   :  { %v4076_v45 = vpop.permute.xlu2 %657  ;;  %v1410_v51 = vadd.f32 %v1409_v44, %v1408_v13  ;;  %v1393_v28 = vadd.f32 %v1392_v43, %v1391_v54  ;;  %v1428_v55 = vadd.f32 %v1427_v63, %v1426_v50  ;;  %v1446_v13 = vrot.slane %v1445_v53, 2  ;;  %v400_v44 = vld [vmem:[%s5239_s1 + $0x270] sm:$0xff]  ;;  %v405_v63 = vld [vmem:[%s5239_s1 + $0x298] sm:$0xff] }
  0xc5   :  { %v1418_v40 = vrot.slane %v1417_v38, 2  ;;  %v608_v48 = vpop.permute.xlu1 %607  ;;  %v603_v49 = vpop.permute.xlu0 %602 }
  0xc6   :  { %v1121_v21 = vmul.f32 %v3176_v34, %v608_v48  ;;  %v1120_v57 = vmul.f32 %v3175_v41, %v603_v49  ;;  %v1411_v60 = vrot.slane %v1410_v51, 2  ;;  %v2271_v12 = vsel %vm2243_vm1, %v1400_v59, %v1393_v28  ;;  %v4119_v41 = vld [vmem:[%s5238_s0 + $0xa0] sm:$0xff]  }
  0xc7   :  { %v1419_v5 = vadd.f32 %v1418_v40, %v1417_v38  ;;  %v2272_v29 = vsel %vm2245_vm2, %v1407_v19, %v2271_v12  ;;  %v1128_v38 = vmul.f32 %v3191_v39, %v4048_v6  ;;  %v3188_v48 = vunpack.c.h.bf16 %v3386_v33 }
  0xc8   :  { %v1436_v61 = vsel %vm33_vm0, %v1121_v21, 0.0  ;;  %v1429_v1 = vsel %vm33_vm0, %v1120_v57, 0.0  ;;  %v1412_v7 = vadd.f32 %v1411_v60, %v1410_v51  ;;  %v3187_v6 = vunpack.c.l.bf16 %v3386_v33 }
  0xc9   :  { %v1437_v52 = vrot.slane %v1436_v61, 4  ;;  %v1420_v4 = vrot.slane %v1419_v5, 1  ;;  %v1430_v8 = vrot.slane %v1429_v1, 4  ;;  %v1466_v49 = vadd.f32 %v1465_v25, %v1464_v11 }
  0xca   :  { %837 = vperm.xlu2 %3447, %v399_v58   ;;  %v1413_v15 = vrot.slane %v1412_v7, 1  ;;  %v2415_v18 = vld [vmem:[#allocation2 + $0x10] sm:$0xff]  ;;  %v3196_v27 = vunpack.c.h.bf16 %v4119_v41  ;;  %v1485_v57 = vsel %vm33_vm0, %v1128_v38, 0.0  ;;  %v309_v58 = vld [vmem:[#allocation2 + $0x18] sm:$0xff]  ;;  %v1447_v0 = vadd.f32 %v1446_v13, %v1445_v53 }
  0xcb   :  { %v1438_v10 = vadd.f32 %v1437_v52, %v1436_v61  ;;  %832 = vperm.xlu1 %3446, %v398_v62   ;;  %v1431_v17 = vadd.f32 %v1430_v8, %v1429_v1  ;;  %827 = vperm.xlu0 %3445, %v397_v31   ;;  %v1421_v23 = vadd.f32 %v1420_v4, %v1419_v5  ;;  %v1467_v4 = vrot.slane %v1466_v49, 2  ;;  %v404_v53 = vld [vmem:[%s5239_s1 + $0x290] sm:$0xff] }
  0xcc   :  { %v4100_v14 = vpop.permute.xlu2 %672  ;;  %3083 = vmatmul.msk.f32.gmra.mxu0 %vm33_vm0, %v2415_v18  ;;  %v1414_v47 = vadd.f32 %v1413_v15, %v1412_v7  ;;  %v4145_v15 = vld [vmem:[%s5238_s0 + $0xb0] sm:$0xff]  }
  0xcd   :  { %v1439_v2 = vrot.slane %v1438_v10, 2  ;;  %v623_v20 = vpop.permute.xlu1 %622  ;;  %v618_v22 = vpop.permute.xlu0 %617  ;;  %v1432_v54 = vrot.slane %v1431_v17, 2 }
  0xce   :  { %v1124_v24 = vmul.f32 %v3183_v9, %v623_v20  ;;  %v1123_v32 = vmul.f32 %v3180_v36, %v618_v22  ;;  %v2273_v34 = vsel %vm2247_vm3, %v1414_v47, %v2272_v29  ;;  %v1131_v36 = vmul.f32 %v3196_v27, %v4076_v45  ;;  %v403_v45 = vld [vmem:[%s5239_s1 + $0x288] sm:$0xff]  ;;  %v4155_v20 = vld [vmem:[%s5238_s0 + $0xb8] sm:$0xff]  }
  0xcf   :  { %v1440_v30 = vadd.f32 %v1439_v2, %v1438_v10  ;;  %v1433_v35 = vadd.f32 %v1432_v54, %v1431_v17  ;;  %v2274_v46 = vsel %vm2249_vm4, %v1421_v23, %v2273_v34  ;;  %v1486_v10 = vrot.slane %v1485_v57, 4 }
  0xd0   :  { %v1457_v42 = vsel %vm33_vm0, %v1124_v24, 0.0  ;;  %v1450_v43 = vsel %vm33_vm0, %v1123_v32, 0.0  ;;  %v2275_v59 = vsel %vm2251_vm5, %v1428_v55, %v2274_v46  ;;  %v1448_v2 = vrot.slane %v1447_v0, 1 }
  0xd1   :  { %v1441_v16 = vrot.slane %v1440_v30, 1  ;;  %v1434_v40 = vrot.slane %v1433_v35, 1  ;;  %v1458_v51 = vrot.slane %v1457_v42, 4  ;;  %v1451_v21 = vrot.slane %v1450_v43, 4 }
  0xd2   :  { %852 = vperm.xlu2 %3447, %v402_v26   ;;  %v3195_v23 = vunpack.c.l.bf16 %v4119_v41  ;;  %v3192_v47 = vunpack.c.h.bf16 %v4094_v3  ;;  %v1468_v54 = vadd.f32 %v1467_v4, %v1466_v49  ;;  %v3203_v32 = vunpack.c.l.bf16 %v4145_v15 }
  0xd3   :  { %v1442_v50 = vadd.f32 %v1441_v16, %v1440_v30  ;;  %847 = vperm.xlu1 %3446, %v401_v37   ;;  %v1435_v56 = vadd.f32 %v1434_v40, %v1433_v35  ;;  %842 = vperm.xlu0 %3445, %v400_v44   ;;  %v1459_v28 = vadd.f32 %v1458_v51, %v1457_v42  ;;  %v1506_v55 = vsel %vm33_vm0, %v1131_v36, 0.0  ;;  %v408_v40 = vld [vmem:[%s5239_s1 + $0x2b0] sm:$0xff] }
  0xd4   :  { %v4128_v5 = vpop.permute.xlu2 %687  ;;  %v1452_v60 = vadd.f32 %v1451_v21, %v1450_v43  ;;  %v1487_v30 = vadd.f32 %v1486_v10, %v1485_v57  ;;  %v3208_v34 = vunpack.c.h.bf16 %v4155_v20  ;;  %v1449_v38 = vadd.f32 %v1448_v2, %v1447_v0  ;;  %v407_v21 = vld [vmem:[%s5239_s1 + $0x2a8] sm:$0xff] }
  0xd5   :  { %v638_v61 = vpop.permute.xlu1 %637  ;;  %v633_v62 = vpop.permute.xlu0 %632  ;;  %v2276_v52 = vsel %vm2253_vm6, %v1435_v56, %v2275_v59  ;;  %v1460_v8 = vrot.slane %v1459_v28, 2  ;;  %v1469_v43 = vrot.slane %v1468_v54, 1  ;;  %v1507_v49 = vrot.slane %v1506_v55, 4  ;;  %v411_v2 = vld [vmem:[%s5239_s1 + $0x2c8] sm:$0xff] }
  0xd6   :  { %v1127_v1 = vmul.f32 %v3188_v48, %v638_v61  ;;  %v1126_v31 = vmul.f32 %v3187_v6, %v633_v62  ;;  %v2277_v7 = vsel %vm2255_vm7, %v1442_v50, %v2276_v52  ;;  %v1453_v9 = vrot.slane %v1452_v60, 2  ;;  %v3389_v48 = vld [vmem:[%s5238_s0 + $0xa8] sm:$0xff]  }
  0xd7   :  { %v2381_v11 = vadd.f32 %v2277_v7, %v309_v58  ;;  %v1461_v17 = vadd.f32 %v1460_v8, %v1459_v28  ;;  %v1488_v6 = vrot.slane %v1487_v30, 2  ;;  %v1134_v27 = vmul.f32 %v3203_v32, %v4100_v14  ;;  %v406_v28 = vld [vmem:[%s5239_s1 + $0x2a0] sm:$0xff] }
  0xd8   :  { %v1478_v12 = vsel %vm33_vm0, %v1127_v1, 0.0  ;;  %v1454_v18 = vadd.f32 %v1453_v9, %v1452_v60  ;;  %v1471_v39 = vsel %vm33_vm0, %v1126_v31, 0.0  ;;  %v1137_v56 = vmul.f32 %v3208_v34, %v4128_v5 }
  0xd9   :  { %v1479_v19 = vrot.slane %v1478_v12, 4  ;;  %2397 = vst.msk [vmem:[#allocation2 + $0x18] sm:$0xff] %vm33_vm0, %v2381_v11  ;;  %v1472_v22 = vrot.slane %v1471_v39, 4  ;;  %v1462_v24 = vrot.slane %v1461_v17, 1  ;;  %v3200_v62 = vunpack.c.h.bf16 %v3389_v48 }
  0xda   :  { %867 = vperm.xlu2 %3447, %v405_v63   ;;  %v1455_v25 = vrot.slane %v1454_v18, 1  ;;  %v3199_v5 = vunpack.c.l.bf16 %v3389_v48  ;;  %v1470_v1 = vadd.f32 %v1469_v43, %v1468_v54  ;;  %v1489_v31 = vadd.f32 %v1488_v6, %v1487_v30  ;;  %v310_v48 = vld [vmem:[#allocation2 + $0x20] sm:$0xff] }
  0xdb   :  { %v1480_v29 = vadd.f32 %v1479_v19, %v1478_v12  ;;  %862 = vperm.xlu1 %3446, %v404_v53   ;;  %v1473_v26 = vadd.f32 %v1472_v22, %v1471_v39  ;;  %857 = vperm.xlu0 %3445, %v403_v45   ;;  %v1463_v44 = vadd.f32 %v1462_v24, %v1461_v17  ;;  %v1527_v63 = vsel %vm33_vm0, %v1134_v27, 0.0  ;;  %v410_v24 = vld [vmem:[%s5239_s1 + $0x2c0] sm:$0xff] }
  0xdc   :  { %v4160_v33 = vpop.permute.xlu2 %702  ;;  %v1456_v13 = vadd.f32 %v1455_v25, %v1454_v18  ;;  %v1508_v9 = vadd.f32 %v1507_v49, %v1506_v55  ;;  %v1548_v10 = vsel %vm33_vm0, %v1137_v56, 0.0  ;;  %v1490_v22 = vrot.slane %v1489_v31, 1  ;;  %v4203_v55 = vld [vmem:[%s5238_s0 + $0xc8] sm:$0xff]  }
  0xdd   :  { %v1481_v35 = vrot.slane %v1480_v29, 2  ;;  %v653_v37 = vpop.permute.xlu1 %652  ;;  %v648_v3 = vpop.permute.xlu0 %647  ;;  %v1474_v41 = vrot.slane %v1473_v26, 2  ;;  %v3207_v34 = vunpack.c.l.bf16 %v4155_v20 }
  0xde   :  { %v1130_v16 = vmul.f32 %v3195_v23, %v653_v37  ;;  %v1129_v42 = vmul.f32 %v3192_v47, %v648_v3  ;;  %v2278_v50 = vsel %vm2243_vm1, %v1456_v13, %v1449_v38  ;;  %v1528_v23 = vrot.slane %v1527_v63, 4 }
  0xdf   :  { %v1482_v46 = vadd.f32 %v1481_v35, %v1480_v29  ;;  %v1475_v51 = vadd.f32 %v1474_v41, %v1473_v26  ;;  %v2279_v0 = vsel %vm2245_vm2, %v1463_v44, %v2278_v50  ;;  %v1549_v47 = vrot.slane %v1548_v10, 4  ;;  %v409_v26 = vld [vmem:[%s5239_s1 + $0x2b8] sm:$0xff]  ;;  %v4211_v41 = vld [vmem:[%s5238_s0 + $0xd0] sm:$0xff]  }
  0xe0   :  { %v1499_v57 = vsel %vm33_vm0, %v1130_v16, 0.0  ;;  %v1492_v58 = vsel %vm33_vm0, %v1129_v42, 0.0  ;;  %v2416_v59 = vld [vmem:[#allocation2 + $0x18] sm:$0xff]  ;;  %v2280_v53 = vsel %vm2247_vm3, %v1470_v1, %v2279_v0  ;;  %v1509_v25 = vrot.slane %v1508_v9, 2 }
  0xe1   :  { %v1476_v60 = vrot.slane %v1475_v51, 1  ;;  %v1500_v61 = vrot.slane %v1499_v57, 4  ;;  %3084 = vmatmul.msk.f32.gmra.mxu0 %vm33_vm0, %v2416_v59  ;;  %v1483_v14 = vrot.slane %v1482_v46, 1  ;;  %v1493_v52 = vrot.slane %v1492_v58, 4  ;;  %v413_v1 = vld [vmem:[%s5239_s1 + $0x2d8] sm:$0xff] }
  0xe2   :  { %882 = vperm.xlu2 %3447, %v408_v40   ;;  %v3204_v35 = vunpack.c.h.bf16 %v4145_v15  ;;  %v1491_v42 = vadd.f32 %v1490_v22, %v1489_v31  ;;  %v1529_v43 = vadd.f32 %v1528_v23, %v1527_v63  ;;  %v1550_v44 = vadd.f32 %v1549_v47, %v1548_v10  ;;  %v412_v63 = vld [vmem:[%s5239_s1 + $0x2d0] sm:$0xff] }
  0xe3   :  { %877 = vperm.xlu1 %3446, %v407_v21   ;;  %v1477_v4 = vadd.f32 %v1476_v60, %v1475_v51  ;;  %v1501_v7 = vadd.f32 %v1500_v61, %v1499_v57  ;;  %872 = vperm.xlu0 %3445, %v406_v28   ;;  %v1494_v36 = vadd.f32 %v1493_v52, %v1492_v58  ;;  %v3215_v15 = vunpack.c.l.bf16 %v4203_v55  ;;  %v414_v61 = vld [vmem:[%s5239_s1 + $0x2e0] sm:$0xff] }
  0xe4   :  { %v4183_v8 = vpop.permute.xlu2 %717  ;;  %v1484_v18 = vadd.f32 %v1483_v14, %v1482_v46  ;;  %v1510_v20 = vadd.f32 %v1509_v25, %v1508_v9  ;;  %v3220_v27 = vunpack.c.h.bf16 %v4211_v41  ;;  %v1530_v0 = vrot.slane %v1529_v43, 2 }
  0xe5   :  { %v668_v11 = vpop.permute.xlu1 %667  ;;  %v663_v12 = vpop.permute.xlu0 %662  ;;  %v1502_v19 = vrot.slane %v1501_v7, 2  ;;  %v1495_v39 = vrot.slane %v1494_v36, 2  ;;  %v2281_v54 = vsel %vm2249_vm4, %v1477_v4, %v2280_v53  ;;  %v1551_v14 = vrot.slane %v1550_v44, 2 }
  0xe6   :  { %v1133_v17 = vmul.f32 %v3200_v62, %v668_v11  ;;  %v1132_v45 = vmul.f32 %v3199_v5, %v663_v12  ;;  %v2282_v37 = vsel %vm2251_vm5, %v1484_v18, %v2281_v54  ;;  %v3392_v62 = vld [vmem:[%s5238_s0 + $0xc0] sm:$0xff]   ;;  %v1511_v31 = vrot.slane %v1510_v20, 1 }
  0xe7   :  { %v1496_v29 = vadd.f32 %v1495_v39, %v1494_v36  ;;  %v1503_v3 = vadd.f32 %v1502_v19, %v1501_v7  ;;  %v2283_v21 = vsel %vm2253_vm6, %v1491_v42, %v2282_v37  ;;  %v1140_v10 = vmul.f32 %v3215_v15, %v4160_v33  ;;  %v4238_v36 = vld [vmem:[%s5238_s0 + $0xe0] sm:$0xff]  }
  0xe8   :  { %v1520_v30 = vsel %vm33_vm0, %v1133_v17, 0.0  ;;  %v1513_v32 = vsel %vm33_vm0, %v1132_v45, 0.0  ;;  %v3212_v12 = vunpack.c.h.bf16 %v3392_v62  ;;  %v3211_v53 = vunpack.c.l.bf16 %v3392_v62 }
  0xe9   :  { %v1521_v13 = vrot.slane %v1520_v30, 4  ;;  %v1497_v38 = vrot.slane %v1496_v29, 1  ;;  %v1514_v16 = vrot.slane %v1513_v32, 4  ;;  %v1504_v58 = vrot.slane %v1503_v3, 1 }
  0xea   :  { %897 = vperm.xlu2 %3447, %v411_v2   ;;  %v1531_v45 = vadd.f32 %v1530_v0, %v1529_v43  ;;  %v1552_v2 = vadd.f32 %v1551_v14, %v1550_v44  ;;  %v1512_v23 = vadd.f32 %v1511_v31, %v1510_v20  ;;  %v3227_v54 = vunpack.c.l.bf16 %v4238_v36 }
  0xeb   :  { %892 = vperm.xlu1 %3446, %v410_v24   ;;  %v1522_v46 = vadd.f32 %v1521_v13, %v1520_v30  ;;  %887 = vperm.xlu0 %3445, %v409_v26   ;;  %v1498_v6 = vadd.f32 %v1497_v38, %v1496_v29  ;;  %v1515_v49 = vadd.f32 %v1514_v16, %v1513_v32  ;;  %v1569_v29 = vsel %vm33_vm0, %v1140_v10, 0.0  ;;  %v417_v38 = vld [vmem:[%s5239_s1 + $0x2f8] sm:$0xff] }
  0xec   :  { %v4213_v40 = vpop.permute.xlu2 %732  ;;  %v1505_v17 = vadd.f32 %v1504_v58, %v1503_v3  ;;  %v1143_v30 = vmul.f32 %v3220_v27, %v4183_v8  ;;  %v1532_v16 = vrot.slane %v1531_v45, 1  ;;  %v1553_v42 = vrot.slane %v1552_v2, 1  ;;  %v416_v8 = vld [vmem:[%s5239_s1 + $0x2f0] sm:$0xff] }
  0xed   :  { %v683_v50 = vpop.permute.xlu1 %682  ;;  %v678_v51 = vpop.permute.xlu0 %677  ;;  %v1523_v56 = vrot.slane %v1522_v46, 2  ;;  %v2284_v59 = vsel %vm2255_vm7, %v1498_v6, %v2283_v21  ;;  %v1516_v28 = vrot.slane %v1515_v49, 2  ;;  %v3219_v21 = vunpack.c.l.bf16 %v4211_v41 }
  0xee   :  { %v1136_v57 = vmul.f32 %v3207_v34, %v683_v50  ;;  %v1135_v60 = vmul.f32 %v3204_v35, %v678_v51  ;;  %v2382_v52 = vadd.f32 %v2284_v59, %v310_v48  ;;  %v2285_v34 = vsel %vm2243_vm1, %v1512_v23, %v1505_v17  ;;  %v3395_v17 = vld [vmem:[%s5238_s0 + $0xd8] sm:$0xff]  }
  0xef   :  { %v1524_v5 = vadd.f32 %v1523_v56, %v1522_v46  ;;  %v1517_v4 = vadd.f32 %v1516_v28, %v1515_v49  ;;  %v1570_v46 = vrot.slane %v1569_v29, 4  ;;  %v415_v49 = vld [vmem:[%s5239_s1 + $0x2e8] sm:$0xff]  ;;  %v3216_v27 = vunpack.c.h.bf16 %v4203_v55 }
  0xf0   :  { %v1541_v7 = vsel %vm33_vm0, %v1136_v57, 0.0  ;;  %v1534_v9 = vsel %vm33_vm0, %v1135_v60, 0.0  ;;  %2398 = vst.msk [vmem:[#allocation2 + $0x20] sm:$0xff] %vm33_vm0, %v2382_v52  ;;  %v1590_v56 = vsel %vm33_vm0, %v1143_v30, 0.0  ;;  %v1533_v28 = vadd.f32 %v1532_v16, %v1531_v45  ;;  %v4282_v45 = vld [vmem:[%s5238_s0 + $0xe8] sm:$0xff]  }
  0xf1   :  { %v1542_v11 = vrot.slane %v1541_v7, 4  ;;  %v1525_v18 = vrot.slane %v1524_v5, 1  ;;  %v1518_v19 = vrot.slane %v1517_v4, 1  ;;  %v1535_v39 = vrot.slane %v1534_v9, 4 }
  0xf2   :  { %912 = vperm.xlu2 %3447, %v414_v61   ;;  %v1554_v0 = vadd.f32 %v1553_v42, %v1552_v2  ;;  %v1571_v14 = vadd.f32 %v1570_v46, %v1569_v29  ;;  %v3224_v29 = vunpack.c.h.bf16 %v3395_v17 }
  0xf3   :  { %907 = vperm.xlu1 %3446, %v413_v1   ;;  %v1543_v22 = vadd.f32 %v1542_v11, %v1541_v7  ;;  %902 = vperm.xlu0 %3445, %v412_v63   ;;  %v1519_v47 = vadd.f32 %v1518_v19, %v1517_v4  ;;  %v1536_v24 = vadd.f32 %v1535_v39, %v1534_v9  ;;  %v1591_v1 = vrot.slane %v1590_v56, 4  ;;  %v311_v63 = vld [vmem:[#allocation2 + $0x28] sm:$0xff] }
  0xf4   :  { %v4240_v33 = vpop.permute.xlu2 %747  ;;  %v1526_v35 = vadd.f32 %v1525_v18, %v1524_v5  ;;  %v1146_v9 = vmul.f32 %v3227_v54, %v4213_v40  ;;  %v419_v40 = vld [vmem:[%s5239_s1 + $0x308] sm:$0xff]  ;;  %v1572_v54 = vrot.slane %v1571_v14, 2 }
  0xf5   :  { %v698_v25 = vpop.permute.xlu1 %697  ;;  %v1544_v32 = vrot.slane %v1543_v22, 2  ;;  %v693_v13 = vpop.permute.xlu0 %692  ;;  %v1537_v37 = vrot.slane %v1536_v24, 2  ;;  %v2286_v43 = vsel %vm2245_vm2, %v1519_v47, %v2285_v34  ;;  %v418_v47 = vld [vmem:[%s5239_s1 + $0x300] sm:$0xff] }
  0xf6   :  { %v1139_v26 = vmul.f32 %v3212_v12, %v698_v25  ;;  %v1138_v3 = vmul.f32 %v3211_v53, %v693_v13  ;;  %v2287_v57 = vsel %vm2247_vm3, %v1526_v35, %v2286_v43  ;;  %v420_v53 = vld [vmem:[%s5239_s1 + $0x310] sm:$0xff]  ;;  %v1611_v30 = vsel %vm33_vm0, %v1146_v9, 0.0 }
  0xf7   :  { %v1545_v44 = vadd.f32 %v1544_v32, %v1543_v22  ;;  %v1538_v20 = vadd.f32 %v1537_v37, %v1536_v24  ;;  %v2417_v6 = vld [vmem:[#allocation2 + $0x20] sm:$0xff]  ;;  %v2288_v55 = vsel %vm2249_vm4, %v1533_v28, %v2287_v57  ;;  %v1592_v24 = vadd.f32 %v1591_v1, %v1590_v56  ;;  %v4295_v37 = vld [vmem:[%s5238_s0 + $0xf8] sm:$0xff]   ;;  %v2567_v28 = vld [vmem:[%s5242_s4 + $0x8] sm:$0xff] }
  0xf8   :  { %v1562_v15 = vsel %vm33_vm0, %v1139_v26, 0.0  ;;  %v1555_v48 = vsel %vm33_vm0, %v1138_v3, 0.0  ;;  %3085 = vmatmul.msk.f32.gmra.mxu0 %vm33_vm0, %v2417_v6  ;;  %v3232_v13 = vunpack.c.h.bf16 %v4282_v45  ;;  %v2568_v6 = vld [vmem:[%s5242_s4 + $0x10] sm:$0xff]  ;;  %v4325_v1 = vld [vmem:[%s5238_s0 + $0x100] sm:$0xff]  }
  0xf9   :  { %v1546_v50 = vrot.slane %v1545_v44, 1  ;;  %v1563_v51 = vrot.slane %v1562_v15, 4  ;;  %v1539_v58 = vrot.slane %v1538_v20, 1  ;;  %v1556_v59 = vrot.slane %v1555_v48, 4 }
  0xfa   :  { %927 = vperm.xlu2 %3447, %v417_v38   ;;  %v2569_v38 = vld [vmem:[%s5242_s4 + $0x18] sm:$0xff]  ;;  %v1593_v46 = vrot.slane %v1592_v24, 2 }
  0xfb   :  { %922 = vperm.xlu1 %3446, %v416_v8   ;;  %v1547_v60 = vadd.f32 %v1546_v50, %v1545_v44  ;;  %v1564_v61 = vadd.f32 %v1563_v51, %v1562_v15  ;;  %917 = vperm.xlu0 %3445, %v415_v49   ;;  %v1540_v52 = vadd.f32 %v1539_v58, %v1538_v20  ;;  %v3223_v44 = vunpack.c.l.bf16 %v3395_v17 }
  0xfc   :  { %v4263_v62 = vpop.permute.xlu2 %762  ;;  %v1557_v5 = vadd.f32 %v1556_v59, %v1555_v48  ;;  %2634 = vmatpush.msra.mxu1 %v2569_v38  ;;  %v1573_v8 = vadd.f32 %v1572_v54, %v1571_v14  ;;  %v1612_v20 = vrot.slane %v1611_v30, 4  ;;  %3436 = vmatpush.msra.mxu3 %v2569_v38  ;;  %v3239_v49 = vunpack.c.l.bf16 %v4295_v37  ;;  %v422_v59 = vld [vmem:[%s5239_s1 + $0x320] sm:$0xff]  ;;  %v425_v38 = vld [vmem:[%s5239_s1 + $0x338] sm:$0xff] }
  0xfd   :  { %v713_v41 = vpop.permute.xlu1 %712  ;;  %v1565_v31 = vrot.slane %v1564_v61, 2  ;;  %v708_v7 = vpop.permute.xlu0 %707  ;;  %v2289_v10 = vsel %vm2251_vm5, %v1540_v52, %v2288_v55  ;;  %v3231_v55 = vunpack.c.l.bf16 %v4282_v45 }
  0xfe   :  { %v1142_v4 = vmul.f32 %v3219_v21, %v713_v41  ;;  %v1558_v11 = vrot.slane %v1557_v5, 2  ;;  %v1141_v12 = vmul.f32 %v3216_v27, %v708_v7  ;;  %v2290_v18 = vsel %vm2253_vm6, %v1547_v60, %v2289_v10  ;;  %v423_v21 = vld [vmem:[%s5239_s1 + $0x328] sm:$0xff]  ;;  %2635 = vmatpush.msra.mxu1 %v2568_v6  ;;  %3437 = vmatpush.msra.mxu3 %v2568_v6 }
  0xff   :  { %v1566_v19 = vadd.f32 %v1565_v31, %v1564_v61  ;;  %v2291_v39 = vsel %vm2255_vm7, %v1554_v0, %v2290_v18  ;;  %v1149_v27 = vmul.f32 %v3232_v13, %v4240_v33  ;;  %v421_v33 = vld [vmem:[%s5239_s1 + $0x318] sm:$0xff]  ;;  %v1574_v52 = vrot.slane %v1573_v8, 1  ;;  %v2566_v31 = vld [vmem:[%s5242_s4] sm:$0xff] }
 0x100   :  { %v1559_v2 = vadd.f32 %v1558_v11, %v1557_v5  ;;  %v1583_v22 = vsel %vm33_vm0, %v1142_v4, 0.0  ;;  %v1576_v23 = vsel %vm33_vm0, %v1141_v12, 0.0  ;;  %v2383_v25 = vadd.f32 %v2291_v39, %v311_v63  ;;  %2636 = vmatpush.msra.mxu1 %v2567_v28  ;;  %3438 = vmatpush.msra.mxu3 %v2567_v28 }
 0x101   :  { %v1584_v32 = vrot.slane %v1583_v22, 4  ;;  %v1577_v26 = vrot.slane %v1576_v23, 4  ;;  %v1567_v34 = vrot.slane %v1566_v19, 1  ;;  %v4320_v5 = vadd.f32 %v1593_v46, %v1592_v24 }
 0x102   :  { %942 = vperm.xlu2 %3447, %v420_v53   ;;  %2399 = vst.msk [vmem:[#allocation2 + $0x28] sm:$0xff] %vm33_vm0, %v2383_v25  ;;  %v1560_v35 = vrot.slane %v1559_v2, 1  ;;  %v1613_v41 = vadd.f32 %v1612_v20, %v1611_v30  ;;  %v3228_v10 = vunpack.c.h.bf16 %v4238_v36  ;;  %2637 = vmatpush.msra.mxu1 %v2566_v31  ;;  %v1632_v11 = vsel %vm33_vm0, %v1149_v27, 0.0  ;;  %v426_v30 = vld [vmem:[%s5239_s1 + $0x340] sm:$0xff] }
 0x103   :  { %937 = vperm.xlu1 %3446, %v419_v40   ;;  %932 = vperm.xlu0 %3445, %v418_v47   ;;  %v1585_v16 = vadd.f32 %v1584_v32, %v1583_v22  ;;  %v1578_v42 = vadd.f32 %v1577_v26, %v1576_v23  ;;  %v1568_v56 = vadd.f32 %v1567_v34, %v1566_v19  ;;  %v3244_v39 = vunpack.c.h.bf16 %v4325_v1  ;;  %v3398_v32 = vld [vmem:[%s5238_s0 + $0xf0] sm:$0xff]  }
 0x104   :  { %v4297_v3 = vpop.permute.xlu2 %777  ;;  %v1561_v57 = vadd.f32 %v1560_v35, %v1559_v2  ;;  %v1152_v12 = vmul.f32 %v3239_v49, %v4263_v62  ;;  %3439 = vmatpush.msra.mxu3 %v2566_v31  ;;  %v1575_v36 = vadd.f32 %v1574_v52, %v1573_v8  ;;  %v1614_v22 = vrot.slane %v1613_v41, 2  ;;  %v424_v8 = vld [vmem:[%s5239_s1 + $0x330] sm:$0xff] }
 0x105   :  { %v728_v43 = vpop.permute.xlu1 %727  ;;  %v723_v48 = vpop.permute.xlu0 %722  ;;  %v1586_v50 = vrot.slane %v1585_v16, 2  ;;  %v1579_v51 = vrot.slane %v1578_v42, 2  ;;  %v1595_v54 = vrot.slane %v4320_v5, 1  ;;  %v1633_v24 = vrot.slane %v1632_v11, 4 }
 0x106   :  { %v1145_v15 = vmul.f32 %v3224_v29, %v728_v43  ;;  %v1144_v14 = vmul.f32 %v3223_v44, %v723_v48  ;;  %v2292_v19 = vsel %vm2243_vm1, %v1568_v56, %v1561_v57  ;;  %v1653_v26 = vsel %vm33_vm0, %v1152_v12, 0.0 }
 0x107   :  { %v1587_v60 = vadd.f32 %v1586_v50, %v1585_v16  ;;  %v1580_v61 = vadd.f32 %v1579_v51, %v1578_v42  ;;  %v2293_v34 = vsel %vm2245_vm2, %v1575_v36, %v2292_v19  ;;  %v1615_v46 = vadd.f32 %v1614_v22, %v1613_v41  ;;  %v4361_v50 = vld [vmem:[%s5238_s0 + $0x110] sm:$0xff]  }
 0x108   :  { %v1604_v58 = vsel %vm33_vm0, %v1145_v15, 0.0  ;;  %v1597_v9 = vsel %vm33_vm0, %v1144_v14, 0.0  ;;  %v3236_v48 = vunpack.c.h.bf16 %v3398_v32  ;;  %v1634_v6 = vadd.f32 %v1633_v24, %v1632_v11 }
 0x109   :  { %v1605_v0 = vrot.slane %v1604_v58, 4  ;;  %v1581_v4 = vrot.slane %v1580_v61, 1  ;;  %v2418_v63 = vld [vmem:[#allocation2 + $0x28] sm:$0xff]  ;;  %v1588_v53 = vrot.slane %v1587_v60, 1  ;;  %v1598_v17 = vrot.slane %v1597_v9, 4 }
 0x10a   :  { %957 = vperm.xlu2 %3447, %v423_v21   ;;  %3086 = vmatmul.msk.f32.gmra.mxu0 %vm33_vm0, %v2418_v63  ;;  %v1654_v49 = vrot.slane %v1653_v26, 4  ;;  %v3235_v21 = vunpack.c.l.bf16 %v3398_v32  ;;  %v1155_v56 = vmul.f32 %v3244_v39, %v4297_v3  ;;  %v1596_v28 = vadd.f32 %v1595_v54, %v4320_v5  ;;  %v429_v63 = vld [vmem:[%s5239_s1 + $0x358] sm:$0xff] }
 0x10b   :  { %v1606_v7 = vadd.f32 %v1605_v0, %v1604_v58  ;;  %952 = vperm.xlu1 %3446, %v422_v59   ;;  %947 = vperm.xlu0 %3445, %v421_v33   ;;  %v1582_v40 = vadd.f32 %v1581_v4, %v1580_v61  ;;  %v1599_v23 = vadd.f32 %v1598_v17, %v1597_v9  ;;  %v3251_v33 = vunpack.c.l.bf16 %v4361_v50  ;;  %v312_v4 = vld [vmem:[#allocation2 + $0x30] sm:$0xff] }
 0x10c   :  { %v4336_v18 = vpop.permute.xlu2 %792  ;;  %v1589_v13 = vadd.f32 %v1588_v53, %v1587_v60  ;;  %v1635_v31 = vrot.slane %v1634_v6, 2  ;;  %v1616_v5 = vrot.slane %v1615_v46, 1  ;;  %v1674_v11 = vsel %vm33_vm0, %v1155_v56, 0.0  ;;  %v428_v53 = vld [vmem:[%s5239_s1 + $0x350] sm:$0xff] }
 0x10d   :  { %v1607_v45 = vrot.slane %v1606_v7, 2  ;;  %v743_v2 = vpop.permute.xlu1 %742  ;;  %v738_v62 = vpop.permute.xlu0 %737  ;;  %v1600_v35 = vrot.slane %v1599_v23, 2  ;;  %v2294_v16 = vsel %vm2247_vm3, %v1582_v40, %v2293_v34  ;;  %v3243_v22 = vunpack.c.l.bf16 %v4325_v1 }
 0x10e   :  { %v1148_v47 = vmul.f32 %v3231_v55, %v743_v2  ;;  %v1147_v29 = vmul.f32 %v3228_v10, %v738_v62  ;;  %v2295_v27 = vsel %vm2249_vm4, %v1589_v13, %v2294_v16  ;;  %v1655_v10 = vadd.f32 %v1654_v49, %v1653_v26  ;;  %v4388_v62 = vld [vmem:[%s5238_s0 + $0x118] sm:$0xff]  }
 0x10f   :  { %v1608_v25 = vadd.f32 %v1607_v45, %v1606_v7  ;;  %v1601_v20 = vadd.f32 %v1600_v35, %v1599_v23  ;;  %v2296_v3 = vsel %vm2251_vm5, %v1596_v28, %v2295_v27  ;;  %v427_v45 = vld [vmem:[%s5239_s1 + $0x348] sm:$0xff]  ;;  %v1636_v23 = vadd.f32 %v1635_v31, %v1634_v6  ;;  %v432_v6 = vld [vmem:[%s5239_s1 + $0x370] sm:$0xff] }
 0x110   :  { %v1625_v43 = vsel %vm33_vm0, %v1148_v47, 0.0  ;;  %v1618_v44 = vsel %vm33_vm0, %v1147_v29, 0.0  ;;  %v1675_v29 = vrot.slane %v1674_v11, 4  ;;  %v1617_v32 = vadd.f32 %v1616_v5, %v1615_v46  ;;  %v3401_v35 = vld [vmem:[%s5238_s0 + $0x108] sm:$0xff]  }
 0x111   :  { %v1609_v42 = vrot.slane %v1608_v25, 1  ;;  %v1626_v15 = vrot.slane %v1625_v43, 4  ;;  %v1619_v51 = vrot.slane %v1618_v44, 4  ;;  %v1602_v57 = vrot.slane %v1601_v20, 1 }
 0x112   :  { %972 = vperm.xlu2 %3447, %v426_v30   ;;  %v1158_v1 = vmul.f32 %v3251_v33, %v4336_v18  ;;  %v3256_v16 = vunpack.c.h.bf16 %v4388_v62  ;;  %v1637_v18 = vrot.slane %v1636_v23, 1  ;;  %v3248_v27 = vunpack.c.h.bf16 %v3401_v35 }
 0x113   :  { %967 = vperm.xlu1 %3446, %v425_v38   ;;  %v1627_v58 = vadd.f32 %v1626_v15, %v1625_v43  ;;  %962 = vperm.xlu0 %3445, %v424_v8   ;;  %v1610_v60 = vadd.f32 %v1609_v42, %v1608_v25  ;;  %v1620_v61 = vadd.f32 %v1619_v51, %v1618_v44  ;;  %v1656_v25 = vrot.slane %v1655_v10, 2  ;;  %v4402_v8 = vld [vmem:[%s5241_s3] ss:$0 sm:$0xff] }
 0x114   :  { %v4365_v59 = vpop.permute.xlu2 %807  ;;  %v1603_v14 = vadd.f32 %v1602_v57, %v1601_v20  ;;  %v3240_v44 = vunpack.c.h.bf16 %v4295_v37  ;;  %v1676_v51 = vadd.f32 %v1675_v29, %v1674_v11  ;;  %v431_v37 = vld [vmem:[%s5239_s1 + $0x368] sm:$0xff]  ;;  %v1695_v56 = vsel %vm33_vm0, %v1158_v1, 0.0  ;;  %v434_v29 = vld [vmem:[%s5239_s1 + $0x380] sm:$0xff] }
 0x115   :  { %v758_v0 = vpop.permute.xlu1 %757  ;;  %v1628_v52 = vrot.slane %v1627_v58, 2  ;;  %v753_v55 = vpop.permute.xlu0 %752  ;;  %v1621_v7 = vrot.slane %v1620_v61, 2  ;;  %v4407_v49 = vadd.f32 %v1656_v25, %v1655_v10  ;;  %v1638_v5 = vadd.f32 %v1637_v18, %v1636_v23  ;;  %v435_v23 = vld [vmem:[%s5239_s1 + $0x388] sm:$0xff] }
 0x116   :  { %v1151_v41 = vmul.f32 %v3236_v48, %v758_v0  ;;  %v1150_v9 = vmul.f32 %v3235_v21, %v753_v55  ;;  %v2297_v12 = vsel %vm2253_vm6, %v1603_v14, %v2296_v3  ;;  %v1161_v0 = vmul.f32 %v3256_v16, %v4365_v59  ;;  %v4421_v14 = vld [vmem:[%s5238_s0 + $0x128] sm:$0xff]  }
 0x117   :  { %v2298_v17 = vsel %vm2255_vm7, %v1610_v60, %v2297_v12  ;;  %v1622_v19 = vadd.f32 %v1621_v7, %v1620_v61  ;;  %v1629_v36 = vadd.f32 %v1628_v52, %v1627_v58  ;;  %v430_v60 = vld [vmem:[%s5239_s1 + $0x360] sm:$0xff]  ;;  %v3247_v3 = vunpack.c.l.bf16 %v3401_v35  ;;  %v4447_v35 = vld [vmem:[%s5238_s0 + $0x130] sm:$0xff]  }
 0x118   :  { %v1646_v40 = vsel %vm33_vm0, %v1151_v41, 0.0  ;;  %v1639_v39 = vsel %vm33_vm0, %v1150_v9, 0.0  ;;  %v2384_v2 = vadd.f32 %v2298_v17, %v312_v4  ;;  %v1677_v7 = vrot.slane %v1676_v51, 2 }
 0x119   :  { %v1623_v47 = vrot.slane %v1622_v19, 1  ;;  %v1647_v54 = vrot.slane %v1646_v40, 4  ;;  %v1640_v24 = vrot.slane %v1639_v39, 4  ;;  %v1630_v38 = vrot.slane %v1629_v36, 1 }
 0x11a   :  { %987 = vperm.xlu2 %3447, %v429_v63   ;;  %2400 = vst.msk [vmem:[#allocation2 + $0x30] sm:$0xff] %vm33_vm0, %v2384_v2  ;;  %v1696_v9 = vrot.slane %v1695_v56, 4  ;;  %v3263_v11 = vunpack.c.l.bf16 %v4421_v14  ;;  %v1658_v2 = vrot.slane %v4407_v49, 1 }
 0x11b   :  { %982 = vperm.xlu1 %3446, %v428_v53   ;;  %977 = vperm.xlu0 %3445, %v427_v45   ;;  %v1648_v26 = vadd.f32 %v1647_v54, %v1646_v40  ;;  %v1641_v13 = vadd.f32 %v1640_v24, %v1639_v39  ;;  %v1624_v46 = vadd.f32 %v1623_v47, %v1622_v19  ;;  %v1716_v19 = vsel %vm33_vm0, %v1161_v0, 0.0 }
 0x11c   :  { %v4391_v30 = vpop.permute.xlu2 %822  ;;  %v1631_v61 = vadd.f32 %v1630_v38, %v1629_v36  ;;  %v4436_v54 = vadd.f32 %v1677_v7, %v1676_v51  ;;  %v1697_v24 = vadd.f32 %v1696_v9, %v1695_v56  ;;  %v1717_v1 = vrot.slane %v1716_v19, 4  ;;  %v433_v38 = vld [vmem:[%s5239_s1 + $0x378] sm:$0xff] }
 0x11d   :  { %v773_v34 = vpop.permute.xlu1 %772  ;;  %v768_v43 = vpop.permute.xlu0 %767  ;;  %v1649_v20 = vrot.slane %v1648_v26, 2  ;;  %v1642_v15 = vrot.slane %v1641_v13, 2  ;;  %v2299_v41 = vsel %vm2243_vm1, %v1624_v46, %v1617_v32  ;;  %v3255_v32 = vunpack.c.l.bf16 %v4388_v62 }
 0x11e   :  { %v1154_v42 = vmul.f32 %v3243_v22, %v773_v34  ;;  %v2502_v48 = vpop.f32.mrf.mxu0  ;;  %v1153_v33 = vmul.f32 %v3240_v44, %v768_v43  ;;  %v2300_v17 = vsel %vm2245_vm2, %v1631_v61, %v2299_v41  ;;  %v1164_v43 = vmul.f32 %v3263_v11, %v4391_v30 }
 0x11f   :  { %v1650_v57 = vadd.f32 %v1649_v20, %v1648_v26  ;;  %v1643_v58 = vadd.f32 %v1642_v15, %v1641_v13  ;;  %v2503_v52 = vadd.f32 %v4402_v8, %v2502_v48  ;;  %v2301_v13 = vsel %vm2247_vm3, %v1638_v5, %v2300_v17  ;;  %v437_v5 = vld [vmem:[%s5239_s1 + $0x398] sm:$0xff]  ;;  %v436_v17 = vld [vmem:[%s5239_s1 + $0x390] sm:$0xff] }
 0x120   :  { %v1667_v21 = vsel %vm33_vm0, %v1154_v42, 0.0  ;;  %v1660_v59 = vsel %vm33_vm0, %v1153_v33, 0.0  ;;  %v3252_v15 = vunpack.c.h.bf16 %v4361_v50  ;;  %v1659_v48 = vadd.f32 %v1658_v2, %v4407_v49  ;;  %v313_v33 = vld [vmem:[#allocation2 + $0x38] sm:$0xff] }
 0x121   :  { %v1668_v28 = vrot.slane %v1667_v21, 4  ;;  %v1644_v55 = vrot.slane %v1643_v58, 1  ;;  %v2419_v4 = vld [vmem:[#allocation2 + $0x30] sm:$0xff]  ;;  %3450 = vtanh.f32 %v2503_v52  ;;  %v1651_v10 = vrot.slane %v1650_v57, 1 }
 0x122   :  { %1002 = vperm.xlu2 %3447, %v432_v6   ;;  %3087 = vmatmul.msk.f32.gmra.mxu0 %vm33_vm0, %v2419_v4  ;;  %v1661_v12 = vrot.slane %v1660_v59, 4  ;;  %v1698_v6 = vrot.slane %v1697_v24, 2  ;;  %v3268_v51 = vunpack.c.h.bf16 %v4447_v35  ;;  %v3404_v4 = vld [vmem:[%s5238_s0 + $0x120] sm:$0xff]  }
 0x123   :  { %v1669_v31 = vadd.f32 %v1668_v28, %v1667_v21  ;;  %997 = vperm.xlu1 %3446, %v431_v37   ;;  %992 = vperm.xlu0 %3445, %v430_v60   ;;  %v1645_v40 = vadd.f32 %v1644_v55, %v1643_v58  ;;  %v1652_v26 = vadd.f32 %v1651_v10, %v1650_v57  ;;  %v1679_v28 = vrot.slane %v4436_v54, 1 }
 0x124   :  { %v4427_v63 = vpop.permute.xlu2 %837  ;;  %v1662_v22 = vadd.f32 %v1661_v12, %v1660_v59  ;;  %v1718_v37 = vadd.f32 %v1717_v1, %v1716_v19  ;;  %v1737_v60 = vsel %vm33_vm0, %v1164_v43, 0.0 }
 0x125   :  { %v788_v53 = vpop.permute.xlu1 %787  ;;  %v783_v45 = vpop.permute.xlu0 %782  ;;  %v1670_v36 = vrot.slane %v1669_v31, 2  ;;  %v2302_v42 = vsel %vm2249_vm4, %v1645_v40, %v2301_v13  ;;  %v1738_v11 = vrot.slane %v1737_v60, 4 }
 0x126   :  { %v1157_v39 = vmul.f32 %v3248_v27, %v788_v53  ;;  %v1156_v47 = vmul.f32 %v3247_v3, %v783_v45  ;;  %v1663_v34 = vrot.slane %v1662_v22, 2  ;;  %v2303_v27 = vsel %vm2251_vm5, %v1652_v26, %v2302_v42 }
 0x127   :  { %v3451_v16 = vpop.eup %3450  ;;  %v1671_v18 = vadd.f32 %v1670_v36, %v1669_v31  ;;  %v438_v31 = vld [vmem:[%s5239_s1 + $0x3a0] sm:$0xff]  ;;  %v1699_v3 = vadd.f32 %v1698_v6, %v1697_v24  ;;  %v2304_v7 = vsel %vm2253_vm6, %v1659_v48, %v2303_v27  ;;  %v1719_v10 = vrot.slane %v1718_v37, 2  ;;  %v441_v48 = vld [vmem:[%s5239_s1 + $0x3b8] sm:$0xff]  ;;  %v440_v27 = vld [vmem:[%s5239_s1 + $0x3b0] sm:$0xff] }
 0x128   :  { %v1688_v25 = vsel %vm33_vm0, %v1157_v39, 0.0  ;;  %v1681_v44 = vsel %vm33_vm0, %v1156_v47, 0.0  ;;  %v1664_v46 = vadd.f32 %v1663_v34, %v1662_v22  ;;  %3097 = vmatmul.msk.f32.vlgmr.msra.gmra.mxu1 %vm33_vm0, %v3451_v16  ;;  %v3260_v45 = vunpack.c.h.bf16 %v3404_v4  ;;  %v4483_v47 = vld [vmem:[%s5238_s0 + $0x140] sm:$0xff]  }
 0x129   :  { %v1689_v62 = vrot.slane %v1688_v25, 4  ;;  %v1682_v20 = vrot.slane %v1681_v44, 4  ;;  %v1672_v0 = vrot.slane %v1671_v18, 1  ;;  %v1680_v24 = vadd.f32 %v1679_v28, %v4436_v54  ;;  %v439_v28 = vld [vmem:[%s5239_s1 + $0x3a8] sm:$0xff] }
 0x12a   :  { %1017 = vperm.xlu2 %3447, %v435_v23   ;;  %v1665_v56 = vrot.slane %v1664_v46, 1  ;;  %v1739_v1 = vadd.f32 %v1738_v11, %v1737_v60  ;;  %v1167_v26 = vmul.f32 %v3268_v51, %v4427_v63  ;;  %v3275_v16 = vunpack.c.l.bf16 %v4483_v47 }
 0x12b   :  { %1012 = vperm.xlu1 %3446, %v434_v29   ;;  %v1690_v21 = vadd.f32 %v1689_v62, %v1688_v25  ;;  %1007 = vperm.xlu0 %3445, %v433_v38   ;;  %v1683_v57 = vadd.f32 %v1682_v20, %v1681_v44  ;;  %v1673_v2 = vadd.f32 %v1672_v0, %v1671_v18  ;;  %v1700_v25 = vrot.slane %v1699_v3, 1 }
 0x12c   :  { %v4459_v30 = vpop.permute.xlu2 %852  ;;  %v1666_v52 = vadd.f32 %v1665_v56, %v1664_v46  ;;  %v3259_v44 = vunpack.c.l.bf16 %v3404_v4  ;;  %v1720_v54 = vadd.f32 %v1719_v10, %v1718_v37  ;;  %v1740_v37 = vrot.slane %v1739_v1, 2 }
 0x12d   :  { %v803_v58 = vpop.permute.xlu1 %802  ;;  %v1691_v50 = vrot.slane %v1690_v21, 2  ;;  %v798_v49 = vpop.permute.xlu0 %797  ;;  %v1684_v41 = vrot.slane %v1683_v57, 2  ;;  %v2306_v18 = vsel %vm2243_vm1, %v1680_v24, %v1673_v2  ;;  %v1701_v63 = vadd.f32 %v1700_v25, %v1699_v3  ;;  %v314_v2 = vld [vmem:[#allocation2 + $0x40] sm:$0xff]  ;;  %v3407_v24 = vld [vmem:[%s5238_s0 + $0x138] sm:$0xff]  }
 0x12e   :  { %v1160_v61 = vmul.f32 %v3255_v32, %v803_v58  ;;  %v1159_v55 = vmul.f32 %v3252_v15, %v798_v49  ;;  %v2305_v12 = vsel %vm2255_vm7, %v1666_v52, %v2304_v7  ;;  %v1758_v56 = vsel %vm33_vm0, %v1167_v26, 0.0 }
 0x12f   :  { %v1692_v9 = vadd.f32 %v1691_v50, %v1690_v21  ;;  %v1685_v53 = vadd.f32 %v1684_v41, %v1683_v57  ;;  %v2385_v19 = vadd.f32 %v2305_v12, %v313_v33  ;;  %v4507_v50 = vld [vmem:[%s5238_s0 + $0x148] sm:$0xff]   ;;  %v3267_v0 = vunpack.c.l.bf16 %v4447_v35 }
 0x130   :  { %v1709_v59 = vsel %vm33_vm0, %v1160_v61, 0.0  ;;  %v1702_v39 = vsel %vm33_vm0, %v1159_v55, 0.0  ;;  %v1721_v33 = vrot.slane %v1720_v54, 1  ;;  %v1759_v4 = vrot.slane %v1758_v56, 4 }
 0x131   :  { %v1710_v40 = vrot.slane %v1709_v59, 4  ;;  %v1693_v36 = vrot.slane %v1692_v9, 1  ;;  %v1686_v22 = vrot.slane %v1685_v53, 1  ;;  %v1703_v23 = vrot.slane %v1702_v39, 4  ;;  %2401 = vst.msk [vmem:[#allocation2 + $0x38] sm:$0xff] %vm33_vm0, %v2385_v19 }
 0x132   :  { %1032 = vperm.xlu2 %3447, %v438_v31   ;;  %v3280_v35 = vunpack.c.h.bf16 %v4507_v50  ;;  %v1741_v12 = vadd.f32 %v1740_v37, %v1739_v1  ;;  %v1760_v25 = vadd.f32 %v1759_v4, %v1758_v56  ;;  %v4551_v56 = vld [vmem:[%s5238_s0 + $0x160] sm:$0xff]  }
 0x133   :  { %1027 = vperm.xlu1 %3446, %v437_v5   ;;  %v1711_v29 = vadd.f32 %v1710_v40, %v1709_v59  ;;  %1022 = vperm.xlu0 %3445, %v436_v17   ;;  %v1687_v13 = vadd.f32 %v1686_v22, %v1685_v53  ;;  %v1704_v34 = vadd.f32 %v1703_v23, %v1702_v39  ;;  %v3264_v40 = vunpack.c.h.bf16 %v4421_v14  ;;  %v444_v23 = vld [vmem:[%s5239_s1 + $0x3d0] sm:$0xff] }
 0x134   :  { %v4487_v32 = vpop.permute.xlu2 %867  ;;  %v1694_v46 = vadd.f32 %v1693_v36, %v1692_v9  ;;  %v1722_v39 = vadd.f32 %v1721_v33, %v1720_v54 }
 0x135   :  { %v818_v38 = vpop.permute.xlu1 %817  ;;  %v1712_v42 = vrot.slane %v1711_v29, 2  ;;  %v813_v62 = vpop.permute.xlu0 %812  ;;  %v1705_v20 = vrot.slane %v1704_v34, 2  ;;  %v2307_v6 = vsel %vm2245_vm2, %v1687_v13, %v2306_v18  ;;  %v1173_v18 = vmul.f32 %v3280_v35, %v4487_v32 }
 0x136   :  { %v1163_v43 = vmul.f32 %v3260_v45, %v818_v38  ;;  %v2505_v15 = vpop.f32.mrf.mxu0  ;;  %v1162_v61 = vmul.f32 %v3259_v44, %v813_v62  ;;  %v2308_v52 = vsel %vm2247_vm3, %v1694_v46, %v2307_v6  ;;  %v1170_v45 = vmul.f32 %v3275_v16, %v4459_v30  ;;  %v443_v30 = vld [vmem:[%s5239_s1 + $0x3c8] sm:$0xff]  ;;  %v442_v38 = vld [vmem:[%s5239_s1 + $0x3c0] sm:$0xff] }
 0x137   :  { %v1713_v51 = vadd.f32 %v1712_v42, %v1711_v29  ;;  %v1706_v57 = vadd.f32 %v1705_v20, %v1704_v34  ;;  %v2506_v49 = vadd.f32 %v4402_v8, %v2505_v15  ;;  %v2309_v53 = vsel %vm2249_vm4, %v1701_v63, %v2308_v52  ;;  %v4541_v20 = vld [vmem:[%s5238_s0 + $0x158] sm:$0xff]  }
 0x138   :  { %v1730_v21 = vsel %vm33_vm0, %v1163_v43, 0.0  ;;  %v2420_v31 = vld [vmem:[#allocation2 + $0x38] sm:$0xff]  ;;  %v1723_v7 = vsel %vm33_vm0, %v1162_v61, 0.0  ;;  %v1742_v42 = vrot.slane %v1741_v12, 1  ;;  %v3272_v44 = vunpack.c.h.bf16 %v3407_v24 }
 0x139   :  { %v1731_v58 = vrot.slane %v1730_v21, 4  ;;  %v1714_v60 = vrot.slane %v1713_v51, 1  ;;  %v1707_v41 = vrot.slane %v1706_v57, 1  ;;  %3452 = vtanh.f32 %v2506_v49  ;;  %3088 = vmatmul.msk.f32.gmra.mxu0 %vm33_vm0, %v2420_v31 }
 0x13a   :  { %1047 = vperm.xlu2 %3447, %v441_v48   ;;  %v1724_v10 = vrot.slane %v1723_v7, 4  ;;  %v1779_v54 = vsel %vm33_vm0, %v1170_v45, 0.0  ;;  %v1761_v48 = vrot.slane %v1760_v25, 2  ;;  %v1743_v49 = vadd.f32 %v1742_v42, %v1741_v12 }
 0x13b   :  { %v1732_v55 = vadd.f32 %v1731_v58, %v1730_v21  ;;  %1042 = vperm.xlu1 %3446, %v440_v27   ;;  %v1715_v3 = vadd.f32 %v1714_v60, %v1713_v51  ;;  %1037 = vperm.xlu0 %3445, %v439_v28   ;;  %v1708_v59 = vadd.f32 %v1707_v41, %v1706_v57  ;;  %v3271_v51 = vunpack.c.l.bf16 %v3407_v24  ;;  %v447_v41 = vld [vmem:[%s5239_s1 + $0x3e8] sm:$0xff] }
 0x13c   :  { %v4514_v9 = vpop.permute.xlu2 %882  ;;  %v1725_v22 = vadd.f32 %v1724_v10, %v1723_v7  ;;  %v1780_v58 = vrot.slane %v1779_v54, 4  ;;  %v3287_v28 = vunpack.c.l.bf16 %v4541_v20  ;;  %v3292_v31 = vunpack.c.h.bf16 %v4551_v56  ;;  %v446_v7 = vld [vmem:[%s5239_s1 + $0x3e0] sm:$0xff] }
 0x13d   :  { %v1733_v5 = vrot.slane %v1732_v55, 2  ;;  %v833_v11 = vpop.permute.xlu1 %832  ;;  %v828_v19 = vpop.permute.xlu0 %827  ;;  %v2310_v36 = vsel %vm2251_vm5, %v1708_v59, %v2309_v53 }
 0x13e   :  { %v1166_v17 = vmul.f32 %v3267_v0, %v833_v11  ;;  %v2311_v29 = vsel %vm2253_vm6, %v1715_v3, %v2310_v36  ;;  %v1726_v13 = vrot.slane %v1725_v22, 2  ;;  %v1165_v62 = vmul.f32 %v3264_v40, %v828_v19  ;;  %v445_v11 = vld [vmem:[%s5239_s1 + $0x3d8] sm:$0xff] }
 0x13f   :  { %v2312_v1 = vsel %vm2255_vm7, %v1722_v39, %v2311_v29  ;;  %v1734_v26 = vadd.f32 %v1733_v5, %v1732_v55  ;;  %v3453_v16 = vpop.eup %3452  ;;  %v1800_v0 = vsel %vm33_vm0, %v1173_v18, 0.0  ;;  %v4558_v55 = vadd.f32 %v1761_v48, %v1760_v25 }
 0x140   :  { %v1751_v14 = vsel %vm33_vm0, %v1166_v17, 0.0  ;;  %v2386_v43 = vadd.f32 %v2312_v1, %v314_v2  ;;  %v1727_v46 = vadd.f32 %v1726_v13, %v1725_v22  ;;  %3098 = vmatmul.msk.f32.gmra.mxu1 %vm33_vm0, %v3453_v16  ;;  %v1744_v63 = vsel %vm33_vm0, %v1165_v62, 0.0 }
 0x141   :  { %v1752_v34 = vrot.slane %v1751_v14, 4  ;;  %v1735_v32 = vrot.slane %v1734_v26, 1  ;;  %v1745_v37 = vrot.slane %v1744_v63, 4  ;;  %v1781_v12 = vadd.f32 %v1780_v58, %v1779_v54  ;;  %v2900_v54 = vld [vmem:[%s5244_s6 + $0x10] sm:$0xff] }
 0x142   :  { %1062 = vperm.xlu2 %3447, %v444_v23   ;;  %2402 = vst.msk [vmem:[#allocation2 + $0x40] sm:$0xff] %vm33_vm0, %v2386_v43  ;;  %v1728_v21 = vrot.slane %v1727_v46, 1  ;;  %v1801_v53 = vrot.slane %v1800_v0, 4  ;;  %v3279_v40 = vunpack.c.l.bf16 %v4507_v50  ;;  %v1763_v23 = vrot.slane %v4558_v55, 1 }
 0x143   :  { %v1753_v15 = vadd.f32 %v1752_v34, %v1751_v14  ;;  %1057 = vperm.xlu1 %3446, %v443_v30   ;;  %1052 = vperm.xlu0 %3445, %v442_v38   ;;  %v1746_v52 = vadd.f32 %v1745_v37, %v1744_v63  ;;  %v1736_v59 = vadd.f32 %v1735_v32, %v1734_v26  ;;  %v3276_v14 = vunpack.c.h.bf16 %v4483_v47  ;;  %v3410_v47 = vld [vmem:[%s5238_s0 + $0x150] sm:$0xff]   ;;  %v449_v63 = vld [vmem:[%s5239_s1 + $0x3f8] sm:$0xff] }
 0x144   :  { %v4546_v6 = vpop.permute.xlu2 %897  ;;  %v1729_v35 = vadd.f32 %v1728_v21, %v1727_v46  ;;  %v1176_v24 = vmul.f32 %v3287_v28, %v4514_v9  ;;  %v1782_v34 = vrot.slane %v1781_v12, 2  ;;  %v1802_v38 = vadd.f32 %v1801_v53, %v1800_v0  ;;  %v448_v37 = vld [vmem:[%s5239_s1 + $0x3f0] sm:$0xff]  ;;  %v315_v53 = vld [vmem:[#allocation2 + $0x48] sm:$0xff] }
 0x145   :  { %v1754_v27 = vrot.slane %v1753_v15, 2  ;;  %v848_v57 = vpop.permute.xlu1 %847  ;;  %v843_v61 = vpop.permute.xlu0 %842  ;;  %v1747_v5 = vrot.slane %v1746_v52, 2  ;;  %v3284_v28 = vunpack.c.h.bf16 %v3410_v47 }
 0x146   :  { %v1169_v60 = vmul.f32 %v3272_v44, %v848_v57  ;;  %v1168_v3 = vmul.f32 %v3271_v51, %v843_v61  ;;  %v2313_v50 = vsel %vm2243_vm1, %v1736_v59, %v1729_v35  ;;  %v1821_v18 = vsel %vm33_vm0, %v1176_v24, 0.0 }
 0x147   :  { %v1755_v33 = vadd.f32 %v1754_v27, %v1753_v15  ;;  %v1748_v45 = vadd.f32 %v1747_v5, %v1746_v52  ;;  %v2314_v46 = vsel %vm2245_vm2, %v1743_v49, %v2313_v50  ;;  %v1783_v57 = vadd.f32 %v1782_v34, %v1781_v12  ;;  %v2899_v50 = vld [vmem:[%s5244_s6 + $0x8] sm:$0xff]  ;;  %v2898_v34 = vld [vmem:[%s5244_s6] sm:$0xff] }
 0x148   :  { %v1772_v4 = vsel %vm33_vm0, %v1169_v60, 0.0  ;;  %v1765_v17 = vsel %vm33_vm0, %v1168_v3, 0.0  ;;  %v3283_v60 = vunpack.c.l.bf16 %v3410_v47  ;;  %v1822_v61 = vrot.slane %v1821_v18, 4 }
 0x149   :  { %v1773_v10 = vrot.slane %v1772_v4, 4  ;;  %v2508_v19 = vpop.f32.mrf.mxu0  ;;  %v1756_v39 = vrot.slane %v1755_v33, 1  ;;  %v1766_v36 = vrot.slane %v1765_v17, 4  ;;  %v2421_v22 = vld [vmem:[#allocation2 + $0x40] sm:$0xff]  ;;  %v1749_v30 = vrot.slane %v1748_v45, 1 }
 0x14a   :  { %1077 = vperm.xlu2 %3447, %v447_v41   ;;  %v2509_v25 = vadd.f32 %v4402_v8, %v2508_v19  ;;  %3089 = vmatmul.msk.f32.vlgmr.msra.gmra.mxu2 %vm33_vm0, %v2421_v22  ;;  %v1803_v3 = vrot.slane %v1802_v38, 2  ;;  %v1179_v5 = vmul.f32 %v3292_v31, %v4546_v6  ;;  %v4612_v6 = vld [vmem:[%s5238_s0 + $0x178] sm:$0xff]   ;;  %v2904_v22 = vld [vmem:[%s5244_s6 + $0x30] sm:$0xff] }
 0x14b   :  { %v1774_v2 = vadd.f32 %v1773_v10, %v1772_v4  ;;  %1072 = vperm.xlu1 %3446, %v446_v7   ;;  %1067 = vperm.xlu0 %3445, %v445_v11   ;;  %v1767_v26 = vadd.f32 %v1766_v36, %v1765_v17  ;;  %v1757_v42 = vadd.f32 %v1756_v39, %v1755_v33  ;;  %v4599_v33 = vld [vmem:[%s5238_s0 + $0x170] sm:$0xff]  }
 0x14c   :  { %v4574_v29 = vpop.permute.xlu2 %912  ;;  %3454 = vtanh.f32 %v2509_v25  ;;  %v1750_v43 = vadd.f32 %v1749_v30, %v1748_v45  ;;  %v1764_v4 = vadd.f32 %v1763_v23, %v4558_v55  ;;  %v3299_v19 = vunpack.c.l.bf16 %v4599_v33 }
 0x14d   :  { %v1775_v1 = vrot.slane %v1774_v2, 2  ;;  %v863_v13 = vpop.permute.xlu1 %862  ;;  %v858_v9 = vpop.permute.xlu0 %857  ;;  %v1768_v44 = vrot.slane %v1767_v26, 2  ;;  %v1784_v45 = vrot.slane %v1783_v57, 1  ;;  %v4617_v23 = vadd.f32 %v1803_v3, %v1802_v38 }
 0x14e   :  { %v1172_v16 = vmul.f32 %v3279_v40, %v863_v13  ;;  %v1171_v48 = vmul.f32 %v3276_v14, %v858_v9  ;;  %v2315_v51 = vsel %vm2247_vm3, %v1750_v43, %v2314_v46  ;;  %v1842_v30 = vsel %vm33_vm0, %v1179_v5, 0.0 }
 0x14f   :  { %v1776_v62 = vadd.f32 %v1775_v1, %v1774_v2  ;;  %v1769_v21 = vadd.f32 %v1768_v44, %v1767_v26  ;;  %v2316_v49 = vsel %vm2249_vm4, %v1757_v42, %v2315_v51  ;;  %v1823_v2 = vadd.f32 %v1822_v61, %v1821_v18 }
 0x150   :  { %v1793_v15 = vsel %vm33_vm0, %v1172_v16, 0.0  ;;  %v1786_v58 = vsel %vm33_vm0, %v1171_v48, 0.0  ;;  %v2317_v17 = vsel %vm2251_vm5, %v1764_v4, %v2316_v49  ;;  %v3304_v16 = vunpack.c.h.bf16 %v4612_v6  ;;  %v2902_v4 = vld [vmem:[%s5244_s6 + $0x20] sm:$0xff] }
 0x151   :  { %v1777_v32 = vrot.slane %v1776_v62, 1  ;;  %v1794_v27 = vrot.slane %v1793_v15, 4  ;;  %v1770_v0 = vrot.slane %v1769_v21, 1  ;;  %v1787_v59 = vrot.slane %v1786_v58, 4 }
 0x152   :  { %2921 = vperm.xlu2 %3447, %v2900_v54   ;;  %v3455_v41 = vpop.eup %3454  ;;  %v3291_v42 = vunpack.c.l.bf16 %v4551_v56  ;;  %v1824_v43 = vrot.slane %v1823_v2, 2  ;;  %v3288_v54 = vunpack.c.h.bf16 %v4541_v20  ;;  %v1843_v47 = vrot.slane %v1842_v30, 4 }
 0x153   :  { %v1795_v52 = vadd.f32 %v1794_v27, %v1793_v15  ;;  %1087 = vperm.xlu1 %3446, %v449_v63   ;;  %v1778_v7 = vadd.f32 %v1777_v32, %v1776_v62  ;;  %1082 = vperm.xlu0 %3445, %v448_v37   ;;  %v1771_v10 = vadd.f32 %v1770_v0, %v1769_v21  ;;  %v1805_v51 = vrot.slane %v4617_v23, 1  ;;  %v3413_v21 = vld [vmem:[%s5238_s0 + $0x168] sm:$0xff]  }
 0x154   :  { %v928_v35 = vpop.permute.xlu2 %927  ;;  %3099 = vmatmul.msk.f32.gmra.mxu1 %vm33_vm0, %v3455_v41  ;;  %v1788_v55 = vadd.f32 %v1787_v59, %v1786_v58  ;;  %v1182_v62 = vmul.f32 %v3299_v19, %v4574_v29  ;;  %v1785_v63 = vadd.f32 %v1784_v45, %v1783_v57  ;;  %v1844_v0 = vadd.f32 %v1843_v47, %v1842_v30 }
 0x155   :  { %v1796_v11 = vrot.slane %v1795_v52, 2  ;;  %v878_v12 = vpop.permute.xlu1 %877  ;;  %v873_v39 = vpop.permute.xlu0 %872  ;;  %v2318_v36 = vsel %vm2253_vm6, %v1771_v10, %v2317_v17  ;;  %v1185_v27 = vmul.f32 %v3304_v16, %v928_v35  ;;  %v3296_v3 = vunpack.c.h.bf16 %v3413_v21  ;;  %v4646_v35 = vld [vmem:[%s5238_s0 + $0x188] sm:$0xff]  }
 0x156   :  { %v1175_v40 = vmul.f32 %v3284_v28, %v878_v12  ;;  %v1174_v31 = vmul.f32 %v3283_v60, %v873_v39  ;;  %v2319_v24 = vsel %vm2255_vm7, %v1778_v7, %v2318_v36  ;;  %v1789_v14 = vrot.slane %v1788_v55, 2 }
 0x157   :  { %v1797_v25 = vadd.f32 %v1796_v11, %v1795_v52  ;;  %v2387_v1 = vadd.f32 %v2319_v24, %v315_v53  ;;  %v1825_v28 = vadd.f32 %v1824_v43, %v1823_v2  ;;  %v1863_v60 = vsel %vm33_vm0, %v1182_v62, 0.0  ;;  %v2901_v11 = vld [vmem:[%s5244_s6 + $0x18] sm:$0xff] }
 0x158   :  { %v1814_v26 = vsel %vm33_vm0, %v1175_v40, 0.0  ;;  %v1807_v13 = vsel %vm33_vm0, %v1174_v31, 0.0  ;;  %v1790_v38 = vadd.f32 %v1789_v14, %v1788_v55  ;;  %v1864_v12 = vrot.slane %v1863_v60, 4 }
 0x159   :  { %v1815_v9 = vrot.slane %v1814_v26, 4  ;;  %2403 = vst.msk [vmem:[#allocation2 + $0x48] sm:$0xff] %vm33_vm0, %v2387_v1  ;;  %v1808_v44 = vrot.slane %v1807_v13, 4  ;;  %v1798_v18 = vrot.slane %v1797_v25, 1  ;;  %v1884_v53 = vsel %vm33_vm0, %v1185_v27, 0.0 }
 0x15a   :  { %2933 = vperm.xlu2 %3447, %v2904_v22   ;;  %v1791_v46 = vrot.slane %v1790_v38, 1  ;;  %v3295_v55 = vunpack.c.l.bf16 %v3413_v21  ;;  %v1806_v36 = vadd.f32 %v1805_v51, %v4617_v23  ;;  %v1826_v31 = vrot.slane %v1825_v28, 1 }
 0x15b   :  { %2918 = vperm.xlu1 %3446, %v2899_v50   ;;  %v1816_v15 = vadd.f32 %v1815_v9, %v1814_v26  ;;  %2915 = vperm.xlu0 %3445, %v2898_v34   ;;  %v1809_v32 = vadd.f32 %v1808_v44, %v1807_v13  ;;  %v1799_v57 = vadd.f32 %v1798_v18, %v1797_v25  ;;  %v3311_v24 = vunpack.c.l.bf16 %v4646_v35  ;;  %v2905_v18 = vld [vmem:[%s5244_s6 + $0x38] sm:$0xff] }
 0x15c   :  { %v943_v48 = vpop.permute.xlu2 %942  ;;  %v1792_v29 = vadd.f32 %v1791_v46, %v1790_v38  ;;  %v1845_v26 = vrot.slane %v1844_v0, 2  ;;  %v1865_v13 = vadd.f32 %v1864_v12, %v1863_v60  ;;  %v1885_v34 = vrot.slane %v1884_v53, 4 }
 0x15d   :  { %v893_v56 = vpop.permute.xlu1 %892  ;;  %v1817_v37 = vrot.slane %v1816_v15, 2  ;;  %v888_v20 = vpop.permute.xlu0 %887  ;;  %v1810_v61 = vrot.slane %v1809_v32, 2  ;;  %v1188_v44 = vmul.f32 %v3311_v24, %v943_v48  ;;  %v1827_v46 = vadd.f32 %v1826_v31, %v1825_v28 }
 0x15e   :  { %v1178_v58 = vmul.f32 %v3291_v42, %v893_v56  ;;  %v1177_v49 = vmul.f32 %v3288_v54, %v888_v20  ;;  %v2511_v41 = vpop.f32.mrf.mxu0  ;;  %v2320_v7 = vsel %vm2243_vm1, %v1792_v29, %v1785_v63  ;;  %v2903_v63 = vld [vmem:[%s5244_s6 + $0x28] sm:$0xff]  ;;  %v1866_v51 = vrot.slane %v1865_v13, 2 }
 0x15f   :  { %v1818_v52 = vadd.f32 %v1817_v37, %v1816_v15  ;;  %v1811_v59 = vadd.f32 %v1810_v61, %v1809_v32  ;;  %v2512_v2 = vadd.f32 %v4402_v8, %v2511_v41  ;;  %v2321_v22 = vsel %vm2245_vm2, %v1799_v57, %v2320_v7  ;;  %v4673_v32 = vld [vmem:[%s5238_s0 + $0x190] sm:$0xff]  }
 0x160   :  { %v1835_v5 = vsel %vm33_vm0, %v1178_v58, 0.0  ;;  %v1828_v10 = vsel %vm33_vm0, %v1177_v49, 0.0  ;;  %v2422_v19 = vld [vmem:[#allocation2 + $0x48] sm:$0xff]  ;;  %v2322_v23 = vsel %vm2247_vm3, %v1806_v36, %v2321_v22  ;;  %v3303_v21 = vunpack.c.l.bf16 %v4612_v6 }
 0x161   :  { %v1819_v17 = vrot.slane %v1818_v52, 1  ;;  %v1812_v40 = vrot.slane %v1811_v59, 1  ;;  %v1836_v39 = vrot.slane %v1835_v5, 4  ;;  %v1829_v45 = vrot.slane %v1828_v10, 4  ;;  %3090 = vmatmul.msk.f32.gmra.mxu2 %vm33_vm0, %v2422_v19 }
 0x162   :  { %3456 = vtanh.f32 %v2512_v2  ;;  %v1886_v27 = vadd.f32 %v1885_v34, %v1884_v53  ;;  %v1846_v28 = vadd.f32 %v1845_v26, %v1844_v0  ;;  %v1905_v60 = vsel %vm33_vm0, %v1188_v44, 0.0 }
 0x163   :  { %2927 = vperm.xlu1 %3446, %v2902_v4   ;;  %2924 = vperm.xlu0 %3445, %v2901_v11   ;;  %v1813_v14 = vadd.f32 %v1812_v40, %v1811_v59  ;;  %v1837_v50 = vadd.f32 %v1836_v39, %v1835_v5  ;;  %v1830_v30 = vadd.f32 %v1829_v45, %v1828_v10  ;;  %v3316_v6 = vunpack.c.h.bf16 %v4673_v32 }
 0x164   :  { %v4659_v25 = vpop.permute.xlu2 %957  ;;  %v1820_v9 = vadd.f32 %v1819_v17, %v1818_v52  ;;  %v316_v52 = vld [vmem:[#allocation2 + $0x50] sm:$0xff]  ;;  %v3300_v7 = vunpack.c.h.bf16 %v4599_v33  ;;  %v1867_v59 = vadd.f32 %v1866_v51, %v1865_v13  ;;  %v1887_v12 = vrot.slane %v1886_v27, 2  ;;  %v4695_v13 = vld [vmem:[%s5238_s0 + $0x1a0] sm:$0xff]  }
 0x165   :  { %v908_v1 = vpop.permute.xlu1 %907  ;;  %v903_v16 = vpop.permute.xlu0 %902  ;;  %v1831_v42 = vrot.slane %v1830_v30, 2  ;;  %v2323_v62 = vsel %vm2249_vm4, %v1813_v14, %v2322_v23  ;;  %v1838_v54 = vrot.slane %v1837_v50, 2  ;;  %v1906_v53 = vrot.slane %v1905_v60, 4 }
 0x166   :  { %v1181_v38 = vmul.f32 %v3296_v3, %v908_v1  ;;  %v1180_v43 = vmul.f32 %v3295_v55, %v903_v16  ;;  %v2324_v37 = vsel %vm2251_vm5, %v1820_v9, %v2323_v62  ;;  %v3416_v55 = vld [vmem:[%s5238_s0 + $0x180] sm:$0xff]   ;;  %v1847_v40 = vrot.slane %v1846_v28, 1 }
 0x167   :  { %v1832_v15 = vadd.f32 %v1831_v42, %v1830_v30  ;;  %v1839_v61 = vadd.f32 %v1838_v54, %v1837_v50  ;;  %v2325_v0 = vsel %vm2253_vm6, %v1827_v46, %v2324_v37  ;;  %v1868_v22 = vrot.slane %v1867_v59, 1  ;;  %v4704_v37 = vld [vmem:[%s5238_s0 + $0x1a8] sm:$0xff]  }
 0x168   :  { %v1856_v47 = vsel %vm33_vm0, %v1181_v38, 0.0  ;;  %v1849_v56 = vsel %vm33_vm0, %v1180_v43, 0.0  ;;  %v3457_v29 = vpop.eup %3456  ;;  %v1191_v24 = vmul.f32 %v3316_v6, %v4659_v25  ;;  %v3308_v50 = vunpack.c.h.bf16 %v3416_v55 }
 0x169   :  { %v1857_v48 = vrot.slane %v1856_v47, 4  ;;  %v1833_v58 = vrot.slane %v1832_v15, 1  ;;  %v1850_v20 = vrot.slane %v1849_v56, 4  ;;  %3100 = vmatmul.msk.f32.gmra.mxu1 %vm33_vm0, %v3457_v29  ;;  %v1840_v39 = vrot.slane %v1839_v61, 1 }
 0x16a   :  { %v1888_v30 = vadd.f32 %v1887_v12, %v1886_v27  ;;  %v1907_v1 = vadd.f32 %v1906_v53, %v1905_v60  ;;  %v1848_v38 = vadd.f32 %v1847_v40, %v1846_v28  ;;  %v3307_v42 = vunpack.c.l.bf16 %v3416_v55 }
 0x16b   :  { %2936 = vperm.xlu1 %3446, %v2905_v18   ;;  %v1858_v49 = vadd.f32 %v1857_v48, %v1856_v47  ;;  %2930 = vperm.xlu0 %3445, %v2903_v63   ;;  %v1834_v41 = vadd.f32 %v1833_v58, %v1832_v15  ;;  %v1851_v4 = vadd.f32 %v1850_v20, %v1849_v56  ;;  %v1926_v18 = vsel %vm33_vm0, %v1191_v24, 0.0 }
 0x16c   :  { %v4680_v57 = vpop.permute.xlu2 %972  ;;  %v1841_v16 = vadd.f32 %v1840_v39, %v1839_v61  ;;  %v1869_v47 = vadd.f32 %v1868_v22, %v1867_v59  ;;  %v3323_v46 = vunpack.c.l.bf16 %v4695_v13  ;;  %v1889_v51 = vrot.slane %v1888_v30, 1 }
 0x16d   :  { %v923_v3 = vpop.permute.xlu1 %922  ;;  %v1859_v5 = vrot.slane %v1858_v49, 2  ;;  %v918_v11 = vpop.permute.xlu0 %917  ;;  %v2326_v17 = vsel %vm2255_vm7, %v1834_v41, %v2325_v0  ;;  %v1852_v19 = vrot.slane %v1851_v4, 2  ;;  %v1908_v48 = vrot.slane %v1907_v1, 2 }
 0x16e   :  { %v1184_v10 = vmul.f32 %v3303_v21, %v923_v3  ;;  %v2388_v45 = vadd.f32 %v2326_v17, %v316_v52  ;;  %v1183_v14 = vmul.f32 %v3300_v7, %v918_v11  ;;  %v2327_v27 = vsel %vm2243_vm1, %v1848_v38, %v1841_v16 }
 0x16f   :  { %v1860_v2 = vadd.f32 %v1859_v5, %v1858_v49  ;;  %v1853_v36 = vadd.f32 %v1852_v19, %v1851_v4  ;;  %v3315_v28 = vunpack.c.l.bf16 %v4673_v32  ;;  %v1927_v60 = vrot.slane %v1926_v18, 4 }
 0x170   :  { %v1877_v33 = vsel %vm33_vm0, %v1184_v10, 0.0  ;;  %2404 = vst.msk [vmem:[#allocation2 + $0x50] sm:$0xff] %vm33_vm0, %v2388_v45  ;;  %v1870_v9 = vsel %vm33_vm0, %v1183_v14, 0.0  ;;  %v3328_v0 = vunpack.c.h.bf16 %v4704_v37  ;;  %v3312_v32 = vunpack.c.h.bf16 %v4646_v35  ;;  %v3419_v14 = vld [vmem:[%s5238_s0 + $0x198] sm:$0xff]  }
 0x171   :  { %v1878_v31 = vrot.slane %v1877_v33, 4  ;;  %v1854_v26 = vrot.slane %v1853_v36, 1  ;;  %v1861_v43 = vrot.slane %v1860_v2, 1  ;;  %v1871_v44 = vrot.slane %v1870_v9, 4 }
 0x172   :  { %v1890_v10 = vadd.f32 %v1889_v51, %v1888_v30  ;;  %v1909_v11 = vadd.f32 %v1908_v48, %v1907_v1  ;;  %v1928_v53 = vadd.f32 %v1927_v60, %v1926_v18  ;;  %v1194_v39 = vmul.f32 %v3323_v46, %v4680_v57 }
 0x173   :  { %v1879_v34 = vadd.f32 %v1878_v31, %v1877_v33  ;;  %v1855_v62 = vadd.f32 %v1854_v26, %v1853_v36  ;;  %v1872_v21 = vadd.f32 %v1871_v44, %v1870_v9  ;;  %v1862_v61 = vadd.f32 %v1861_v43, %v1860_v2 }
 0x174   :  { %v988_v23 = vpop.permute.xlu2 %987  ;;  %v1947_v43 = vsel %vm33_vm0, %v1194_v39, 0.0 }
 0x175   :  { %v1880_v25 = vrot.slane %v1879_v34, 2  ;;  %v938_v54 = vpop.permute.xlu1 %937  ;;  %v933_v63 = vpop.permute.xlu0 %932  ;;  %v2328_v49 = vsel %vm2245_vm2, %v1855_v62, %v2327_v27  ;;  %v1873_v52 = vrot.slane %v1872_v21, 2  ;;  %v1197_v35 = vmul.f32 %v3328_v0, %v988_v23 }
 0x176   :  { %v1187_v15 = vmul.f32 %v3308_v50, %v938_v54  ;;  %v2514_v29 = vpop.f32.mrf.mxu0  ;;  %v1186_v20 = vmul.f32 %v3307_v42, %v933_v63  ;;  %v2329_v17 = vsel %vm2247_vm3, %v1862_v61, %v2328_v49  ;;  %v1910_v50 = vrot.slane %v1909_v11, 1  ;;  %v4733_v63 = vld [vmem:[%s5238_s0 + $0x1b8] sm:$0xff]  }
 0x177   :  { %v1881_v56 = vadd.f32 %v1880_v25, %v1879_v34  ;;  %v2423_v41 = vld [vmem:[#allocation2 + $0x50] sm:$0xff]  ;;  %v2515_v7 = vadd.f32 %v4402_v8, %v2514_v29  ;;  %v1874_v59 = vadd.f32 %v1873_v52, %v1872_v21  ;;  %v2330_v30 = vsel %vm2249_vm4, %v1869_v47, %v2329_v17  ;;  %v317_v34 = vld [vmem:[#allocation2 + $0x58] sm:$0xff]  ;;  %v4747_v17 = vld [vmem:[%s5241_s3] ss:$0 sm:$0xff] }
 0x178   :  { %v1898_v58 = vsel %vm33_vm0, %v1187_v15, 0.0  ;;  %v1891_v3 = vsel %vm33_vm0, %v1186_v20, 0.0  ;;  %3091 = vmatmul.msk.f32.gmra.mxu2 %vm33_vm0, %v2423_v41  ;;  %v1929_v42 = vrot.slane %v1928_v53, 2  ;;  %v3320_v25 = vunpack.c.h.bf16 %v3419_v14 }
 0x179   :  { %v1882_v6 = vrot.slane %v1881_v56, 1  ;;  %v1899_v4 = vrot.slane %v1898_v58, 4  ;;  %v1892_v5 = vrot.slane %v1891_v3, 4  ;;  %3458 = vtanh.f32 %v2515_v7 }
 0x17a   :  { %v1875_v19 = vrot.slane %v1874_v59, 1  ;;  %v1968_v54 = vsel %vm33_vm0, %v1197_v35, 0.0  ;;  %v3319_v29 = vunpack.c.l.bf16 %v3419_v14  ;;  %v1948_v27 = vrot.slane %v1947_v43, 4 }
 0x17b   :  { %v1900_v12 = vadd.f32 %v1899_v4, %v1898_v58  ;;  %v1893_v55 = vadd.f32 %v1892_v5, %v1891_v3  ;;  %v1883_v45 = vadd.f32 %v1882_v6, %v1881_v56  ;;  %v1969_v58 = vrot.slane %v1968_v54, 4  ;;  %v4742_v5 = vld [vmem:[%s5238_s0 + $0x1c0] sm:$0xff]  }
 0x17c   :  { %v4715_v40 = vpop.permute.xlu2 %1002  ;;  %v1876_v31 = vadd.f32 %v1875_v19, %v1874_v59  ;;  %v1911_v60 = vadd.f32 %v1910_v50, %v1909_v11  ;;  %v1930_v61 = vadd.f32 %v1929_v42, %v1928_v53  ;;  %v3335_v49 = vunpack.c.l.bf16 %v4733_v63 }
 0x17d   :  { %v953_v8 = vpop.permute.xlu1 %952  ;;  %v1901_v33 = vrot.slane %v1900_v12, 2  ;;  %v948_v36 = vpop.permute.xlu0 %947  ;;  %v1894_v22 = vrot.slane %v1893_v55, 2  ;;  %v3327_v7 = vunpack.c.l.bf16 %v4704_v37  ;;  %v1970_v53 = vadd.f32 %v1969_v58, %v1968_v54 }
 0x17e   :  { %v1190_v2 = vmul.f32 %v3315_v28, %v953_v8  ;;  %v1189_v24 = vmul.f32 %v3312_v32, %v948_v36  ;;  %v2331_v57 = vsel %vm2251_vm5, %v1876_v31, %v2330_v30  ;;  %v3324_v37 = vunpack.c.h.bf16 %v4695_v13 }
 0x17f   :  { %v1902_v1 = vadd.f32 %v1901_v33, %v1900_v12  ;;  %v1895_v38 = vadd.f32 %v1894_v22, %v1893_v55  ;;  %v3459_v23 = vpop.eup %3458  ;;  %v2332_v62 = vsel %vm2253_vm6, %v1883_v45, %v2331_v57  ;;  %v1949_v12 = vadd.f32 %v1948_v27, %v1947_v43  ;;  %v4756_v33 = vld [vmem:[%s5238_s0 + $0x1d0] sm:$0xff]  }
 0x180   :  { %v1919_v26 = vsel %vm33_vm0, %v1190_v2, 0.0  ;;  %v1912_v9 = vsel %vm33_vm0, %v1189_v24, 0.0  ;;  %v2333_v44 = vsel %vm2255_vm7, %v1890_v10, %v2332_v62  ;;  %3101 = vmatmul.msk.f32.gmra.mxu1 %vm33_vm0, %v3459_v23  ;;  %v1200_v55 = vmul.f32 %v3335_v49, %v4715_v40  ;;  %v3422_v23 = vld [vmem:[%s5238_s0 + $0x1b0] sm:$0xff]  }
 0x181   :  { %v1920_v16 = vrot.slane %v1919_v26, 4  ;;  %v1913_v18 = vrot.slane %v1912_v9, 4  ;;  %v2389_v46 = vadd.f32 %v2333_v44, %v317_v34  ;;  %v1903_v15 = vrot.slane %v1902_v1, 1 }
 0x182   :  { %v1896_v51 = vrot.slane %v1895_v38, 1  ;;  %v3340_v36 = vunpack.c.h.bf16 %v4742_v5  ;;  %v1931_v35 = vrot.slane %v1930_v61, 1  ;;  %v1950_v50 = vrot.slane %v1949_v12, 2 }
 0x183   :  { %v1921_v47 = vadd.f32 %v1920_v16, %v1919_v26  ;;  %v1914_v56 = vadd.f32 %v1913_v18, %v1912_v9  ;;  %2405 = vst.msk [vmem:[#allocation2 + $0x58] sm:$0xff] %vm33_vm0, %v2389_v46  ;;  %v1904_v6 = vadd.f32 %v1903_v15, %v1902_v1  ;;  %v3347_v1 = vunpack.c.l.bf16 %v4756_v33 }
 0x184   :  { %v1018_v41 = vpop.permute.xlu2 %1017  ;;  %v1897_v59 = vadd.f32 %v1896_v51, %v1895_v38  ;;  %v1971_v57 = vrot.slane %v1970_v53, 2  ;;  %v1989_v38 = vsel %vm33_vm0, %v1200_v55, 0.0  ;;  %v1951_v27 = vadd.f32 %v1950_v50, %v1949_v12  ;;  %v318_v12 = vld [vmem:[#allocation2 + $0x60] sm:$0xff] }
 0x185   :  { %v1922_v48 = vrot.slane %v1921_v47, 2  ;;  %v968_v21 = vpop.permute.xlu1 %967  ;;  %v963_v28 = vpop.permute.xlu0 %962  ;;  %v1915_v52 = vrot.slane %v1914_v56, 2  ;;  %v1203_v62 = vmul.f32 %v3340_v36, %v1018_v41  ;;  %v1990_v51 = vrot.slane %v1989_v38, 4 }
 0x186   :  { %v1193_v20 = vmul.f32 %v3320_v25, %v968_v21  ;;  %v1192_v10 = vmul.f32 %v3319_v29, %v963_v28  ;;  %v2334_v22 = vsel %vm2243_vm1, %v1904_v6, %v1897_v59  ;;  %v3332_v21 = vunpack.c.h.bf16 %v3422_v23 }
 0x187   :  { %v1923_v4 = vadd.f32 %v1922_v48, %v1921_v47  ;;  %v1916_v0 = vadd.f32 %v1915_v52, %v1914_v56  ;;  %v2517_v11 = vpop.f32.mrf.mxu0  ;;  %v2335_v43 = vsel %vm2245_vm2, %v1911_v60, %v2334_v22  ;;  %v1932_v29 = vadd.f32 %v1931_v35, %v1930_v61 }
 0x188   :  { %v1940_v3 = vsel %vm33_vm0, %v1193_v20, 0.0  ;;  %v2518_v19 = vadd.f32 %v4747_v17, %v2517_v11  ;;  %v1933_v45 = vsel %vm33_vm0, %v1192_v10, 0.0  ;;  %v3331_v20 = vunpack.c.l.bf16 %v3422_v23 }
 0x189   :  { %v1941_v32 = vrot.slane %v1940_v3, 4  ;;  %v1917_v8 = vrot.slane %v1916_v0, 1  ;;  %v1924_v2 = vrot.slane %v1923_v4, 1  ;;  %v1934_v31 = vrot.slane %v1933_v45, 4 }
 0x18a   :  { %3460 = vtanh.f32 %v2518_v19  ;;  %v2424_v40 = vld [vmem:[#allocation2 + $0x58] sm:$0xff]  ;;  %v1972_v41 = vadd.f32 %v1971_v57, %v1970_v53  ;;  %v2010_v6 = vsel %vm33_vm0, %v1203_v62, 0.0  ;;  %v1991_v59 = vadd.f32 %v1990_v51, %v1989_v38  ;;  %v3425_v51 = vld [vmem:[%s5238_s0 + $0x1c8] sm:$0xff]  }
 0x18b   :  { %v1942_v39 = vadd.f32 %v1941_v32, %v1940_v3  ;;  %v1918_v13 = vadd.f32 %v1917_v8, %v1916_v0  ;;  %v1935_v30 = vadd.f32 %v1934_v31, %v1933_v45  ;;  %3092 = vmatmul.msk.f32.gmra.mxu2 %vm33_vm0, %v2424_v40  ;;  %v1925_v42 = vadd.f32 %v1924_v2, %v1923_v4  ;;  %v4780_v31 = vld [vmem:[%s5238_s0 + $0x1d8] sm:$0xff]  }
 0x18c   :  { %v1033_v47 = vpop.permute.xlu2 %1032  ;;  %v1952_v11 = vrot.slane %v1951_v27, 1  ;;  %v2011_v8 = vrot.slane %v2010_v6, 4  ;;  %v3352_v57 = vunpack.c.h.bf16 %v4780_v31 }
 0x18d   :  { %v1943_v24 = vrot.slane %v1942_v39, 2  ;;  %v983_v14 = vpop.permute.xlu1 %982  ;;  %v978_v34 = vpop.permute.xlu0 %977  ;;  %v1936_v25 = vrot.slane %v1935_v30, 2  ;;  %v2336_v44 = vsel %vm2247_vm3, %v1918_v13, %v2335_v43  ;;  %v1206_v49 = vmul.f32 %v3347_v1, %v1033_v47 }
 0x18e   :  { %v1196_v26 = vmul.f32 %v3327_v7, %v983_v14  ;;  %v1195_v9 = vmul.f32 %v3324_v37, %v978_v34  ;;  %v2337_v28 = vsel %vm2249_vm4, %v1925_v42, %v2336_v44  ;;  %v1973_v13 = vrot.slane %v1972_v41, 1 }
 0x18f   :  { %v1944_v16 = vadd.f32 %v1943_v24, %v1942_v39  ;;  %v1937_v48 = vadd.f32 %v1936_v25, %v1935_v30  ;;  %v2338_v19 = vsel %vm2251_vm5, %v1932_v29, %v2337_v28  ;;  %v2031_v53 = vsel %vm33_vm0, %v1206_v49, 0.0 }
 0x190   :  { %v1961_v18 = vsel %vm33_vm0, %v1196_v26, 0.0  ;;  %v1954_v46 = vsel %vm33_vm0, %v1195_v9, 0.0  ;;  %v3461_v15 = vpop.eup %3460  ;;  %v1992_v24 = vrot.slane %v1991_v59, 2  ;;  %v3339_v14 = vunpack.c.l.bf16 %v4742_v5 }
 0x191   :  { %v1945_v54 = vrot.slane %v1944_v16, 1  ;;  %v1962_v56 = vrot.slane %v1961_v18, 4  ;;  %v1955_v58 = vrot.slane %v1954_v46, 4  ;;  %3102 = vmatmul.msk.f32.gmra.mxu1 %vm33_vm0, %v3461_v15  ;;  %v1938_v60 = vrot.slane %v1937_v48, 1 }
 0x192   :  { %v2032_v50 = vrot.slane %v2031_v53, 4  ;;  %v2012_v34 = vadd.f32 %v2011_v8, %v2010_v6  ;;  %v1953_v38 = vadd.f32 %v1952_v11, %v1951_v27  ;;  %v1974_v62 = vadd.f32 %v1973_v13, %v1972_v41 }
 0x193   :  { %v1963_v52 = vadd.f32 %v1962_v56, %v1961_v18  ;;  %v1946_v4 = vadd.f32 %v1945_v54, %v1944_v16  ;;  %v1956_v3 = vadd.f32 %v1955_v58, %v1954_v46  ;;  %v1939_v0 = vadd.f32 %v1938_v60, %v1937_v48 }
 0x194   :  { %v1048_v9 = vpop.permute.xlu2 %1047  ;;  %v3336_v5 = vunpack.c.h.bf16 %v4733_v63  ;;  %v4788_v47 = vadd.f32 %v1992_v24, %v1991_v59  ;;  %v2033_v18 = vadd.f32 %v2032_v50, %v2031_v53  ;;  %v2013_v48 = vrot.slane %v2012_v34, 2 }
 0x195   :  { %v998_v7 = vpop.permute.xlu1 %997  ;;  %v1964_v32 = vrot.slane %v1963_v52, 2  ;;  %v993_v10 = vpop.permute.xlu0 %992  ;;  %v1957_v37 = vrot.slane %v1956_v3, 2  ;;  %v2339_v39 = vsel %vm2253_vm6, %v1939_v0, %v2338_v19  ;;  %v1209_v56 = vmul.f32 %v3352_v57, %v1048_v9 }
 0x196   :  { %v1199_v61 = vmul.f32 %v3332_v21, %v998_v7  ;;  %v1198_v55 = vmul.f32 %v3331_v20, %v993_v10  ;;  %v2340_v2 = vsel %vm2255_vm7, %v1946_v4, %v2339_v39  ;;  %v2703_v29 = vlaneseq }
 0x197   :  { %v1965_v45 = vadd.f32 %v1964_v32, %v1963_v52  ;;  %v1958_v36 = vadd.f32 %v1957_v37, %v1956_v3  ;;  %v2390_v40 = vadd.f32 %v2340_v2, %v318_v12  ;;  %v3344_v41 = vunpack.c.h.bf16 %v3425_v51  ;;  %v4799_v3 = vld [vmem:[%s5238_s0 + $0x1e8] sm:$0xff]  }
 0x198   :  { %v1982_v35 = vsel %vm33_vm0, %v1199_v61, 0.0  ;;  %v1975_v22 = vsel %vm33_vm0, %v1198_v55, 0.0  ;;  %v2034_v6 = vrot.slane %v2033_v18, 2  ;;  %v3343_v0 = vunpack.c.l.bf16 %v3425_v51 }
 0x199   :  { %v1959_v30 = vrot.slane %v1958_v36, 1  ;;  %v1983_v1 = vrot.slane %v1982_v35, 4  ;;  %v1976_v26 = vrot.slane %v1975_v22, 4  ;;  %2406 = vst.msk [vmem:[#allocation2 + $0x60] sm:$0xff] %vm33_vm0, %v2390_v40  ;;  %v1966_v16 = vrot.slane %v1965_v45, 1 }
 0x19a   :  { %v2052_v32 = vsel %vm33_vm0, %v1209_v56, 0.0  ;;  %v4804_v10 = vand.u32 127, %v2703_v29  ;;  %v1994_v8 = vrot.slane %v4788_v47, 1  ;;  %v3359_v39 = vunpack.c.l.bf16 %v4799_v3 }
 0x19b   :  { %v1984_v23 = vadd.f32 %v1983_v1, %v1982_v35  ;;  %v1977_v42 = vadd.f32 %v1976_v26, %v1975_v22  ;;  %v1960_v25 = vadd.f32 %v1959_v30, %v1958_v36  ;;  %v1967_v27 = vadd.f32 %v1966_v16, %v1965_v45  ;;  %v4812_v36 = vld [vmem:[%s5243_s5] ss:$0 sm:$0xff] }
 0x19c   :  { %v4814_v35 = vadd.f32 %v2013_v48, %v2012_v34  ;;  %v2053_v22 = vrot.slane %v2052_v32, 4  ;;  %v4816_v40 = vadd.f32 %v2034_v6, %v2033_v18  ;;  %v1063_v50 = vpop.permute.xlu2 %1062  ;;  %v3351_v26 = vunpack.c.l.bf16 %v4780_v31  ;;  %v4825_v34 = vld [vmem:[%s5238_s0 + $0x1f0] sm:$0xff]  }
 0x19d   :  { %v1013_v43 = vpop.permute.xlu1 %1012  ;;  %v1008_v54 = vpop.permute.xlu0 %1007  ;;  %v1985_v46 = vrot.slane %v1984_v23, 2  ;;  %v1978_v15 = vrot.slane %v1977_v42, 2  ;;  %v2341_v63 = vsel %vm2243_vm1, %v1960_v25, %v1953_v38  ;;  %vm2705_vm8 = vcmp.lt.s32.totalorder %v4804_v10, 4 }
 0x19e   :  { %v1202_v44 = vmul.f32 %v3339_v14, %v1013_v43  ;;  %v1201_v49 = vmul.f32 %v3336_v5, %v1008_v54  ;;  %v2342_v11 = vsel %vm2245_vm2, %v1967_v27, %v2341_v63  ;;  %v2054_v25 = vadd.f32 %v2053_v22, %v2052_v32  ;;  %v319_v63 = vld [vmem:[#allocation2 + $0x68] sm:$0xff] }
 0x19f   :  { %v1986_v58 = vadd.f32 %v1985_v46, %v1984_v23  ;;  %v1979_v20 = vadd.f32 %v1978_v15, %v1977_v42  ;;  %v2520_v60 = vpop.f32.mrf.mxu0  ;;  %v2343_v14 = vsel %vm2247_vm3, %v1974_v62, %v2342_v11  ;;  %v3348_v54 = vunpack.c.h.bf16 %v4756_v33 }
 0x1a0   :  { %v2003_v21 = vsel %vm33_vm0, %v1202_v44, 0.0  ;;  %v2521_v52 = vadd.f32 %v4747_v17, %v2520_v60  ;;  %v2425_v59 = vld [vmem:[#allocation2 + $0x60] sm:$0xff]  ;;  %v1996_v61 = vsel %vm33_vm0, %v1201_v49, 0.0  ;;  %v1995_v5 = vadd.f32 %v1994_v8, %v4788_v47 }
 0x1a1   :  { %v2004_v28 = vrot.slane %v2003_v21, 4  ;;  %v1980_v4 = vrot.slane %v1979_v20, 1  ;;  %3093 = vmatmul.msk.f32.gmra.mxu2 %vm33_vm0, %v2425_v59  ;;  %v1987_v12 = vrot.slane %v1986_v58, 1  ;;  %v1997_v37 = vrot.slane %v1996_v61, 4 }
 0x1a2   :  { %3462 = vtanh.f32 %v2521_v52  ;;  %v3364_v18 = vunpack.c.h.bf16 %v4825_v34  ;;  %v2015_v51 = vrot.slane %v4814_v35, 1  ;;  %v2036_v33 = vrot.slane %v4816_v40, 1 }
 0x1a3   :  { %v2005_v7 = vadd.f32 %v2004_v28, %v2003_v21  ;;  %v1981_v19 = vadd.f32 %v1980_v4, %v1979_v20  ;;  %v1998_v13 = vadd.f32 %v1997_v37, %v1996_v61  ;;  %v1988_v57 = vadd.f32 %v1987_v12, %v1986_v58  ;;  %v3428_v28 = vld [vmem:[%s5238_s0 + $0x1e0] sm:$0xff]  }
 0x1a4   :  { %v2055_v60 = vrot.slane %v2054_v25, 2  ;;  %v1212_v6 = vmul.f32 %v3359_v39, %v1063_v50  ;;  %v3356_v11 = vunpack.c.h.bf16 %v3428_v28  ;;  %v1078_v37 = vpop.permute.xlu2 %1077  ;;  %v3355_v8 = vunpack.c.l.bf16 %v3428_v28 }
 0x1a5   :  { %v1028_v55 = vpop.permute.xlu1 %1027  ;;  %v2006_v53 = vrot.slane %v2005_v7, 2  ;;  %v1023_v2 = vpop.permute.xlu0 %1022  ;;  %v2344_v38 = vsel %vm2249_vm4, %v1981_v19, %v2343_v14  ;;  %v1999_v16 = vrot.slane %v1998_v13, 2  ;;  %v2016_v22 = vadd.f32 %v2015_v51, %v4814_v35 }
 0x1a6   :  { %v1205_v45 = vmul.f32 %v3344_v41, %v1028_v55  ;;  %v1204_v24 = vmul.f32 %v3343_v0, %v1023_v2  ;;  %v2639_v1 = vpop.f32.mrf.mxu1  ;;  %v2345_v48 = vsel %vm2251_vm5, %v1988_v57, %v2344_v38  ;;  %v1215_v14 = vmul.f32 %v3364_v18, %v1078_v37 }
 0x1a7   :  { %v2007_v23 = vadd.f32 %v2006_v53, %v2005_v7  ;;  %v2640_v62 = vadd.f32 %v4812_v36, %v2639_v1  ;;  %v2000_v31 = vadd.f32 %v1999_v16, %v1998_v13  ;;  %v2346_v4 = vsel %vm2253_vm6, %v1995_v5, %v2345_v48 }
 0x1a8   :  { %v2024_v30 = vsel %vm33_vm0, %v1205_v45, 0.0  ;;  %v3463_v9 = vpop.eup %3462  ;;  %v2017_v43 = vsel %vm33_vm0, %v1204_v24, 0.0  ;;  %v2056_v13 = vadd.f32 %v2055_v60, %v2054_v25  ;;  %v2073_v24 = vsel %vm33_vm0, %v1212_v6, 0.0 }
 0x1a9   :  { %v2025_v42 = vrot.slane %v2024_v30, 4  ;;  %v2018_v44 = vrot.slane %v2017_v43, 4  ;;  %3103 = vmatmul.msk.f32.gmra.mxu1 %vm33_vm0, %v3463_v9  ;;  %2687 = vst [vmem:[#allocation3] sm:$0xff] %v2640_v62  ;;  %v4836_v15 = vsel %vm2705_vm8, %v2640_v62, -1e+30  ;;  %v2001_v56 = vrot.slane %v2000_v31, 1 }
 0x1aa   :  { %2722 = vmax.xlane.f32.xlu2 %v4836_v15  ;;  %v2008_v47 = vrot.slane %v2007_v23, 1  ;;  %v2037_v57 = vadd.f32 %v2036_v33, %v4816_v40  ;;  %v2057_v62 = vrot.slane %v2056_v13, 1  ;;  %v2074_v25 = vrot.slane %v2073_v24, 4 }
 0x1ab   :  { %v2026_v46 = vadd.f32 %v2025_v42, %v2024_v30  ;;  %v2019_v21 = vadd.f32 %v2018_v44, %v2017_v43  ;;  %v2002_v49 = vadd.f32 %v2001_v56, %v2000_v31  ;;  %v3363_v56 = vunpack.c.l.bf16 %v4825_v34 }
 0x1ac   :  { %v2009_v12 = vadd.f32 %v2008_v47, %v2007_v23  ;;  %v2058_v6 = vadd.f32 %v2057_v62, %v2056_v13 }
 0x1ad   :  { %v1043_v29 = vpop.permute.xlu1 %1042  ;;  %v2027_v27 = vrot.slane %v2026_v46, 2  ;;  %v1038_v20 = vpop.permute.xlu0 %1037  ;;  %v2020_v52 = vrot.slane %v2019_v21, 2  ;;  %v2347_v0 = vsel %vm2255_vm7, %v2002_v49, %v2346_v4 }
 0x1ae   :  { %v1208_v58 = vmul.f32 %v3351_v26, %v1043_v29  ;;  %v1207_v41 = vmul.f32 %v3348_v54, %v1038_v20  ;;  %v2391_v19 = vadd.f32 %v2347_v0, %v319_v63  ;;  %v2348_v38 = vsel %vm2243_vm1, %v2016_v22, %v2009_v12 }
 0x1af   :  { %v2028_v7 = vadd.f32 %v2027_v27, %v2026_v46  ;;  %v2021_v32 = vadd.f32 %v2020_v52, %v2019_v21  ;;  %v2094_v54 = vsel %vm33_vm0, %v1215_v14, 0.0  ;;  %v3360_v21 = vunpack.c.h.bf16 %v4799_v3 }
 0x1b0   :  { %v2045_v59 = vsel %vm33_vm0, %v1208_v58, 0.0  ;;  %v2038_v55 = vsel %vm33_vm0, %v1207_v41, 0.0  ;;  %2407 = vst.msk [vmem:[#allocation2 + $0x68] sm:$0xff] %vm33_vm0, %v2391_v19  ;;  %v2075_v20 = vadd.f32 %v2074_v25, %v2073_v24  ;;  %v2095_v28 = vrot.slane %v2094_v54, 4 }
 0x1b1   :  { %v2046_v61 = vrot.slane %v2045_v59, 4  ;;  %v2029_v53 = vrot.slane %v2028_v7, 1  ;;  %v2022_v45 = vrot.slane %v2021_v32, 1  ;;  %v2039_v39 = vrot.slane %v2038_v55, 4 }
 0x1b2   :  { %v2076_v12 = vrot.slane %v2075_v20, 2  ;;  %v2096_v19 = vadd.f32 %v2095_v28, %v2094_v54 }
 0x1b3   :  { %v2047_v2 = vadd.f32 %v2046_v61, %v2045_v59  ;;  %v2023_v50 = vadd.f32 %v2022_v45, %v2021_v32  ;;  %v2040_v1 = vadd.f32 %v2039_v39, %v2038_v55  ;;  %v2030_v23 = vadd.f32 %v2029_v53, %v2028_v7  ;;  %v3431_v7 = vld [vmem:[%s5238_s0 + $0x1f8] sm:$0xff]   ;;  %v320_v59 = vld [vmem:[#allocation2 + $0x70] sm:$0xff] }
 0x1b4   :  { %v3368_v39 = vunpack.c.h.bf16 %v3431_v7 }
 0x1b5   :  { %v2048_v30 = vrot.slane %v2047_v2, 2  ;;  %v1058_v26 = vpop.permute.xlu1 %1057  ;;  %v1053_v9 = vpop.permute.xlu0 %1052  ;;  %v2041_v43 = vrot.slane %v2040_v1, 2  ;;  %v2349_v31 = vsel %vm2245_vm2, %v2023_v50, %v2348_v38  ;;  %v2907_v50 = vld [vmem:[%s5244_s6 + $0x48] sm:$0xff] }
 0x1b6   :  { %v1211_v16 = vmul.f32 %v3356_v11, %v1058_v26  ;;  %v1210_v35 = vmul.f32 %v3355_v8, %v1053_v9  ;;  %v2523_v40 = vpop.f32.mrf.mxu0  ;;  %v2350_v29 = vsel %vm2247_vm3, %v2030_v23, %v2349_v31 }
 0x1b7   :  { %v2049_v42 = vadd.f32 %v2048_v30, %v2047_v2  ;;  %v2042_v18 = vadd.f32 %v2041_v43, %v2040_v1  ;;  %v2524_v48 = vadd.f32 %v4747_v17, %v2523_v40  ;;  %v2426_v58 = vld [vmem:[#allocation2 + $0x68] sm:$0xff]  ;;  %v2351_v34 = vsel %vm2249_vm4, %v2037_v57, %v2350_v29 }
 0x1b8   :  { %v2066_v44 = vsel %vm33_vm0, %v1211_v16, 0.0  ;;  %v2059_v51 = vsel %vm33_vm0, %v1210_v35, 0.0  ;;  %3094 = vmatmul.msk.f32.gmra.mxu2 %vm33_vm0, %v2426_v58  ;;  %v3367_v30 = vunpack.c.l.bf16 %v3431_v7  ;;  %v2077_v16 = vadd.f32 %v2076_v12, %v2075_v20 }
 0x1b9   :  { %v2050_v5 = vrot.slane %v2049_v42, 1  ;;  %v2067_v46 = vrot.slane %v2066_v44, 4  ;;  %v2043_v33 = vrot.slane %v2042_v18, 1  ;;  %v2060_v27 = vrot.slane %v2059_v51, 4 }
 0x1ba   :  { %3464 = vtanh.f32 %v2524_v48  ;;  %v2097_v43 = vrot.slane %v2096_v19, 2 }
 0x1bb   :  { %v2068_v47 = vadd.f32 %v2067_v46, %v2066_v44  ;;  %v2051_v60 = vadd.f32 %v2050_v5, %v2049_v42  ;;  %v2044_v63 = vadd.f32 %v2043_v33, %v2042_v18  ;;  %v2061_v52 = vadd.f32 %v2060_v27, %v2059_v51 }
 0x1bc   :  { %v2078_v18 = vrot.slane %v2077_v16, 1  ;;  %v2098_v33 = vadd.f32 %v2097_v43, %v2096_v19 }
 0x1bd   :  { %v2069_v49 = vrot.slane %v2068_v47, 2  ;;  %v1073_v41 = vpop.permute.xlu1 %1072  ;;  %v1068_v4 = vpop.permute.xlu0 %1067  ;;  %v2352_v0 = vsel %vm2251_vm5, %v2044_v63, %v2351_v34  ;;  %v2062_v61 = vrot.slane %v2061_v52, 2 }
 0x1be   :  { %v1214_v3 = vmul.f32 %v3363_v56, %v1073_v41  ;;  %v1213_v11 = vmul.f32 %v3360_v21, %v1068_v4  ;;  %v2353_v37 = vsel %vm2253_vm6, %v2051_v60, %v2352_v0  ;;  %v2642_v55 = vpop.f32.mrf.mxu1  ;;  %v2079_v28 = vadd.f32 %v2078_v18, %v2077_v16 }
 0x1bf   :  { %v2070_v32 = vadd.f32 %v2069_v49, %v2068_v47  ;;  %v2354_v53 = vsel %vm2255_vm7, %v2058_v6, %v2353_v37  ;;  %v2063_v45 = vadd.f32 %v2062_v61, %v2061_v52  ;;  %v2643_v2 = vadd.f32 %v4812_v36, %v2642_v55 }
 0x1c0   :  { %v2087_v8 = vsel %vm33_vm0, %v1214_v3, 0.0  ;;  %v3465_v22 = vpop.eup %3464  ;;  %v2392_v13 = vadd.f32 %v2354_v53, %v320_v59  ;;  %v2080_v14 = vsel %vm33_vm0, %v1213_v11, 0.0  ;;  %v2099_v34 = vrot.slane %v2098_v33, 1  ;;  %v321_v53 = vld [vmem:[#allocation2 + $0x78] sm:$0xff] }
 0x1c1   :  { %v2088_v24 = vrot.slane %v2087_v8, 4  ;;  %v2071_v1 = vrot.slane %v2070_v32, 1  ;;  %v2064_v26 = vrot.slane %v2063_v45, 1  ;;  %2688 = vst [vmem:[#allocation3 + $0x8] sm:$0xff] %v2643_v2  ;;  %v2081_v57 = vrot.slane %v2080_v14, 4  ;;  %3104 = vmatmul.msk.f32.gmra.mxu1 %vm33_vm0, %v3465_v22 }
 0x1c2   :  { %v4879_v38 = vsel %vm2705_vm8, %v2643_v2, -1e+30  ;;  %2408 = vst.msk [vmem:[#allocation2 + $0x70] sm:$0xff] %vm33_vm0, %v2392_v13  ;;  %2942 = vperm.xlu2 %3447, %v2907_v50   ;;  %v2100_v19 = vadd.f32 %v2099_v34, %v2098_v33 }
 0x1c3   :  { %v2089_v9 = vadd.f32 %v2088_v24, %v2087_v8  ;;  %2724 = vmax.xlane.f32.xlu0 %v4879_v38  ;;  %v2082_v23 = vadd.f32 %v2081_v57, %v2080_v14  ;;  %v2072_v31 = vadd.f32 %v2071_v1, %v2070_v32  ;;  %v2065_v44 = vadd.f32 %v2064_v26, %v2063_v45 }
 0x1c5   :  { %v1088_v42 = vpop.permute.xlu1 %1087  ;;  %v2090_v35 = vrot.slane %v2089_v9, 2  ;;  %v1083_v25 = vpop.permute.xlu0 %1082  ;;  %v2083_v54 = vrot.slane %v2082_v23, 2  ;;  %v2355_v47 = vsel %vm2243_vm1, %v2072_v31, %v2065_v44 }
 0x1c6   :  { %v1217_v62 = vmul.f32 %v3368_v39, %v1088_v42  ;;  %v1216_v5 = vmul.f32 %v3367_v30, %v1083_v25  ;;  %v2356_v41 = vsel %vm2245_vm2, %v2079_v28, %v2355_v47 }
 0x1c7   :  { %v2091_v46 = vadd.f32 %v2090_v35, %v2089_v9  ;;  %v2084_v51 = vadd.f32 %v2083_v54, %v2082_v23 }
 0x1c8   :  { %v2108_v40 = vsel %vm33_vm0, %v1217_v62, 0.0  ;;  %v2101_v56 = vsel %vm33_vm0, %v1216_v5, 0.0 }
 0x1c9   :  { %v2109_v48 = vrot.slane %v2108_v40, 4  ;;  %v2092_v21 = vrot.slane %v2091_v46, 1  ;;  %v2102_v29 = vrot.slane %v2101_v56, 4  ;;  %v2085_v27 = vrot.slane %v2084_v51, 1  ;;  %v2427_v20 = vld [vmem:[#allocation2 + $0x70] sm:$0xff] }
 0x1ca   :  { %3095 = vmatmul.msk.f32.gmra.mxu2 %vm33_vm0, %v2427_v20 }
 0x1cb   :  { %v2110_v58 = vadd.f32 %v2109_v48, %v2108_v40  ;;  %v2103_v60 = vadd.f32 %v2102_v29, %v2101_v56  ;;  %v2086_v63 = vadd.f32 %v2085_v27, %v2084_v51  ;;  %v2093_v52 = vadd.f32 %v2092_v21, %v2091_v46 }
 0x1cd   :  { %v2111_v49 = vrot.slane %v2110_v58, 2  ;;  %v2104_v6 = vrot.slane %v2103_v60, 2  ;;  %v2357_v3 = vsel %vm2247_vm3, %v2086_v63, %v2356_v41  ;;  %v2526_v7 = vpop.f32.mrf.mxu2  ;;  %v2906_v41 = vld [vmem:[%s5244_s6 + $0x40] sm:$0xff] }
 0x1ce   :  { %v2527_v0 = vadd.f32 %v4747_v17, %v2526_v7  ;;  %v2358_v61 = vsel %vm2249_vm4, %v2093_v52, %v2357_v3 }
 0x1cf   :  { %v2112_v4 = vadd.f32 %v2111_v49, %v2110_v58  ;;  %v2105_v59 = vadd.f32 %v2104_v6, %v2103_v60  ;;  %v2359_v45 = vsel %vm2251_vm5, %v2100_v19, %v2358_v61  ;;  %v2910_v19 = vld [vmem:[%s5244_s6 + $0x60] sm:$0xff] }
 0x1d0   :  { %3466 = vtanh.f32 %v2527_v0 }
 0x1d1   :  { %v2113_v32 = vrot.slane %v2112_v4, 1  ;;  %v2106_v11 = vrot.slane %v2105_v59, 1  ;;  %v2645_v12 = vpop.f32.mrf.mxu1 }
 0x1d2   :  { %v2646_v55 = vadd.f32 %v4812_v36, %v2645_v12 }
 0x1d3   :  { %v2114_v37 = vadd.f32 %v2113_v32, %v2112_v4  ;;  %v2107_v8 = vadd.f32 %v2106_v11, %v2105_v59  ;;  %v2908_v59 = vld [vmem:[%s5244_s6 + $0x50] sm:$0xff] }
 0x1d4   :  { %2689 = vst [vmem:[#allocation3 + $0x10] sm:$0xff] %v2646_v55  ;;  %v4895_v2 = vsel %vm2705_vm8, %v2646_v55, -1e+30 }
 0x1d5   :  { %v2360_v39 = vsel %vm2253_vm6, %v2107_v8, %v2359_v45  ;;  %2726 = vmax.xlane.f32.xlu1 %v4895_v2 }
 0x1d6   :  { %v2361_v22 = vsel %vm2255_vm7, %v2114_v37, %v2360_v39  ;;  %v3467_v13 = vpop.eup %3466  ;;  %v4986_v39 = vpop.permute.xlu0 %2915 }
 0x1d7   :  { %v2393_v24 = vadd.f32 %v2361_v22, %v321_v53  ;;  %3105 = vmatmul.msk.f32.vlgmr.msra.gmra.mxu3 %vm33_vm0, %v3467_v13  ;;  %v2909_v53 = vld [vmem:[%s5244_s6 + $0x58] sm:$0xff]  ;;  %v4989_v22 = vpop.permute.xlu2 %2921  ;;  %v4991_v13 = vpop.permute.xlu1 %2918  ;;  %vm2962_vm11 = vcmp.eq.s32.totalorder %v4804_v10, %v4986_v39 }
 0x1d8   :  { %vm2963_vm9 = vcmp.eq.s32.totalorder %v4804_v10, %v4991_v13 }
 0x1d9   :  { %2409 = vst.msk [vmem:[#allocation2 + $0x78] sm:$0xff] %vm33_vm0, %v2393_v24 }
 0x1de   :  { %v4993_v24 = vpop.permute.xlu0 %2924 }
 0x1df   :  { %vm2965_vm15 = vcmp.eq.s32.totalorder %v4804_v10, %v4993_v24 }
 0x1e0   :  { %v2428_v14 = vld [vmem:[#allocation2 + $0x78] sm:$0xff] }
 0x1e1   :  { %3096 = vmatmul.msk.f32.gmra.mxu2 %vm33_vm0, %v2428_v14 }
 0x1e4   :  { %v2529_v50 = vpop.f32.mrf.mxu2 }
 0x1e5   :  { %v2530_v30 = vadd.f32 %v4747_v17, %v2529_v50  ;;  %v4995_v50 = vpop.permute.xlu2 %2933 }
 0x1e6   :  { %v2648_v1 = vpop.f32.mrf.mxu1  ;;  %vm2968_vm3 = vcmp.eq.s32.totalorder %v4804_v10, %v4995_v50 }
 0x1e7   :  { %3468 = vtanh.f32 %v2530_v30  ;;  %v2649_v26 = vadd.f32 %v4812_v36, %v2648_v1  ;;  %v4998_v1 = vpop.permute.xlu1 %2927 }
 0x1e8   :  { %vm2966_vm12 = vcmp.eq.s32.totalorder %v4804_v10, %v4998_v1 }
 0x1e9   :  { %2690 = vst [vmem:[#allocation3 + $0x18] sm:$0xff] %v2649_v26  ;;  %v4907_v57 = vsel %vm2705_vm8, %v2649_v26, -1e+30 }
 0x1eb   :  { %2728 = vmax.xlane.f32.xlu2 %v4907_v57 }
 0x1ed   :  { %v3469_v16 = vpop.eup %3468 }
 0x1ee   :  { %3106 = vmatmul.msk.f32.gmra.mxu3 %vm33_vm0, %v3469_v16  ;;  %v5002_v16 = vpop.permute.xlu0 %2930 }
 0x1ef   :  { %vm2967_vm4 = vcmp.eq.s32.totalorder %v4804_v10, %v5002_v16 }
 0x1fb   :  { %v2532_v9 = vpop.f32.mrf.mxu2 }
 0x1fc   :  { %v2533_v23 = vadd.f32 %v4747_v17, %v2532_v9 }
 0x1fd   :  { %v2651_v42 = vpop.f32.mrf.mxu1 }
 0x1fe   :  { %3470 = vtanh.f32 %v2533_v23  ;;  %v2652_v43 = vadd.f32 %v4812_v36, %v2651_v42  ;;  %v5011_v42 = vpop.permute.xlu1 %2936 }
 0x1ff   :  { %vm2969_vm5 = vcmp.eq.s32.totalorder %v4804_v10, %v5011_v42 }
 0x200   :  { %2691 = vst [vmem:[#allocation3 + $0x20] sm:$0xff] %v2652_v43  ;;  %v4956_v0 = vsel %vm2705_vm8, %v2652_v43, -1e+30 }
 0x204   :  { %v3471_v35 = vpop.eup %3470 }
 0x205   :  { %3107 = vmatmul.msk.f32.gmra.mxu3 %vm33_vm0, %v3471_v35 }
 0x20e   :  { %v2654_v62 = vpop.f32.mrf.mxu1  ;;  %v2535_v25 = vpop.f32.mrf.mxu2 }
 0x20f   :  { %v2655_v31 = vadd.f32 %v4812_v36, %v2654_v62  ;;  %v2536_v44 = vadd.f32 %v4747_v17, %v2535_v25 }
 0x211   :  { %2692 = vst [vmem:[#allocation3 + $0x28] sm:$0xff] %v2655_v31  ;;  %3472 = vtanh.f32 %v2536_v44  ;;  %v4967_v12 = vsel %vm2705_vm8, %v2655_v31, -1e+30 }
 0x217   :  { %v3473_v54 = vpop.eup %3472 }
 0x218   :  { %3108 = vmatmul.msk.f32.gmra.mxu3 %vm33_vm0, %v3473_v54 }
 0x21d   :  { %v5000_v26 = vpop.xlane.xlu2 %2722 }
 0x21e   :  { %v2754_v23 = vsub.f32 %v4836_v15, %v5000_v26 }
 0x220   :  { %v2770_v43 = vmul.f32 1.442695, %v2754_v23 }
 0x224   :  { %v2538_v5 = vpop.f32.mrf.mxu2 }
 0x225   :  { %v2539_v18 = vadd.f32 %v4747_v17, %v2538_v5  ;;  %v5026_v5 = vpop.permute.xlu2 %2942 }
 0x226   :  { %v2657_v46 = vpop.f32.mrf.mxu1  ;;  %vm2971_vm13 = vcmp.eq.s32.totalorder %v4804_v10, %v5026_v5 }
 0x227   :  { %v2658_v40 = vadd.f32 %v4812_v36, %v2657_v46  ;;  %3474 = vtanh.f32 %v2539_v18 }
 0x229   :  { %2693 = vst [vmem:[#allocation3 + $0x30] sm:$0xff] %v2658_v40  ;;  %v4984_v45 = vsel %vm2705_vm8, %v2658_v40, -1e+30 }
 0x22d   :  { %v3475_v51 = vpop.eup %3474 }
 0x22e   :  { %3109 = vmatmul.msk.f32.gmra.mxu3 %vm33_vm0, %v3475_v51 }
 0x236   :  { %v5014_v25 = vpop.xlane.xlu0 %2724 }
 0x237   :  { %v2755_v44 = vsub.f32 %v4879_v38, %v5014_v25 }
 0x239   :  { %v2772_v18 = vmul.f32 1.442695, %v2755_v44 }
 0x23b   :  { %v2541_v48 = vpop.f32.mrf.mxu2 }
 0x23c   :  { %v2542_v56 = vadd.f32 %v4747_v17, %v2541_v48 }
 0x23e   :  { %v2660_v21 = vpop.f32.mrf.mxu1  ;;  %3476 = vtanh.f32 %v2542_v56 }
 0x23f   :  { %v4922_v29 = vadd.f32 %v4812_v36, %v2660_v21 }
 0x241   :  { %2694 = vst [vmem:[#allocation3 + $0x38] sm:$0xff] %v4922_v29  ;;  %v5019_v31 = vsel %vm2705_vm8, %v4922_v29, -1e+30 }
 0x244   :  { %v3477_v33 = vpop.eup %3476 }
 0x245   :  { %3110 = vmatmul.msk.f32.gmra.mxu3 %vm33_vm0, %v3477_v33 }
 0x248   :  { %v5024_v54 = vpop.xlane.xlu1 %2726 }
 0x24d   :  { %v2544_v47 = vpop.f32.mrf.mxu2 }
 0x24e   :  { %v2545_v27 = vadd.f32 %v4747_v17, %v2544_v47 }
 0x250   :  { %3478 = vtanh.f32 %v2545_v27 }
 0x256   :  { %v3479_v58 = vpop.eup %3478 }
 0x257   :  { %3111 = vmatmul.msk.f32.gmra.mxu3 %vm33_vm0, %v3479_v58 }
 0x25a   :  { %v2663_v20 = vpop.f32.mrf.mxu3 }
 0x25b   :  { %v2664_v28 = vadd.f32 %v4812_v36, %v2663_v20 }
 0x25d   :  { %2695 = vst [vmem:[#allocation3 + $0x40] sm:$0xff] %v2664_v28  ;;  %v4931_v60 = vsel %vm2705_vm8, %v2664_v28, -1e+30 }
 0x25e   :  { %2738 = vmax.xlane.f32.xlu0 %v4931_v60  ;;  %v5035_v48 = vpop.xlane.xlu2 %2728 }
 0x25f   :  { %v2757_v33 = vsub.f32 %v4907_v57, %v5035_v48 }
 0x261   :  { %v2776_v58 = vmul.f32 1.442695, %v2757_v33 }
 0x264   :  { %v2547_v63 = vpop.f32.mrf.mxu2 }
 0x265   :  { %v2548_v49 = vadd.f32 %v4747_v17, %v2547_v63 }
 0x267   :  { %3480 = vtanh.f32 %v2548_v49 }
 0x268   :  { %3482 = vpow2.f32 %v2770_v43 }
 0x269   :  { %3484 = vpow2.f32 %v2772_v18 }
 0x26d   :  { %v3481_v52 = vpop.eup %3480 }
 0x26e   :  { %3112 = vmatmul.msk.f32.gmra.mxu3 %vm33_vm0, %v3481_v52  ;;  %v3483_v46 = vpop.eup %3482  ;;  %vm2964_vm0 = vcmp.eq.s32.totalorder %v4804_v10, %v4989_v22 }
 0x26f   :  { %v3485_v47 = vpop.eup %3484 }
 0x271   :  { %v2666_v6 = vpop.f32.mrf.mxu3 }
 0x272   :  { %v2667_v34 = vadd.f32 %v4812_v36, %v2666_v6  ;;  %2939 = vperm.xlu0 %3445, %v2906_v41   ;;  %v2756_v41 = vsub.f32 %v4895_v2, %v5024_v54 }
 0x274   :  { %2696 = vst [vmem:[#allocation3 + $0x48] sm:$0xff] %v2667_v34  ;;  %v4942_v3 = vsel %vm2705_vm8, %v2667_v34, -1e+30  ;;  %v2774_v6 = vmul.f32 1.442695, %v2756_v41 }
 0x275   :  { %2740 = vmax.xlane.f32.xlu1 %v4942_v3 }
 0x288   :  { %v2669_v17 = vpop.f32.mrf.mxu3 }
 0x289   :  { %v2670_v4 = vadd.f32 %v4812_v36, %v2669_v17 }
 0x28b   :  { %2697 = vst [vmem:[#allocation3 + $0x50] sm:$0xff] %v2670_v4  ;;  %v4948_v7 = vsel %vm2705_vm8, %v2670_v4, -1e+30 }
 0x28c   :  { %2742 = vmax.xlane.f32.xlu2 %v4948_v7 }
 0x28e   :  { %2945 = vperm.xlu1 %3446, %v2908_v59  }
 0x294   :  { %2730 = vmax.xlane.f32.xlu2 %v4956_v0 }
 0x29b   :  { %v2672_v32 = vpop.f32.mrf.mxu3 }
 0x29c   :  { %v2673_v61 = vadd.f32 %v4812_v36, %v2672_v32 }
 0x29e   :  { %2698 = vst [vmem:[#allocation3 + $0x58] sm:$0xff] %v2673_v61  ;;  %v4962_v11 = vsel %vm2705_vm8, %v2673_v61, -1e+30 }
 0x29f   :  { %2744 = vmax.xlane.f32.xlu0 %v4962_v11 }
 0x2a7   :  { %2732 = vmax.xlane.f32.xlu0 %v4967_v12 }
 0x2ac   :  { %2951 = vperm.xlu2 %3447, %v2910_v19  }
 0x2b1   :  { %v2675_v37 = vpop.f32.mrf.mxu3 }
 0x2b2   :  { %v2676_v55 = vadd.f32 %v4812_v36, %v2675_v37 }
 0x2b4   :  { %2699 = vst [vmem:[#allocation3 + $0x60] sm:$0xff] %v2676_v55  ;;  %v4976_v8 = vsel %vm2705_vm8, %v2676_v55, -1e+30 }
 0x2b8   :  { %2746 = vmax.xlane.f32.xlu1 %v4976_v8 }
 0x2bb   :  { %2948 = vperm.xlu0 %3445, %v2909_v53  }
 0x2c0   :  { %2734 = vmax.xlane.f32.xlu1 %v4984_v45 }
 0x2c8   :  { %v2678_v14 = vpop.f32.mrf.mxu3 }
 0x2c9   :  { %v2679_v30 = vadd.f32 %v4812_v36, %v2678_v14 }
 0x2cb   :  { %2700 = vst [vmem:[#allocation3 + $0x68] sm:$0xff] %v2679_v30  ;;  %v5006_v9 = vsel %vm2705_vm8, %v2679_v30, -1e+30 }
 0x2d1   :  { %v5039_v21 = vpop.xlane.xlu0 %2738 }
 0x2d2   :  { %v2762_v27 = vsub.f32 %v4931_v60, %v5039_v21 }
 0x2d4   :  { %v2786_v28 = vmul.f32 1.442695, %v2762_v27 }
 0x2d5   :  { %2748 = vmax.xlane.f32.xlu2 %v5006_v9 }
 0x2da   :  { %v2681_v35 = vpop.f32.mrf.mxu3 }
 0x2db   :  { %v2682_v62 = vadd.f32 %v4812_v36, %v2681_v35 }
 0x2dd   :  { %2701 = vst [vmem:[#allocation3 + $0x70] sm:$0xff] %v2682_v62  ;;  %2736 = vmax.xlane.f32.xlu2 %v5019_v31  ;;  %v5030_v40 = vsel %vm2705_vm8, %v2682_v62, -1e+30 }
 0x2e4   :  { %v5061_v53 = vpop.permute.xlu0 %2939 }
 0x2e5   :  { %2802 = vadd.xlane.f32.xlu2 %v3483_v46  ;;  %2750 = vmax.xlane.f32.xlu0 %v5030_v40  ;;  %vm2970_vm14 = vcmp.eq.s32.totalorder %v4804_v10, %v5061_v53 }
 0x2e8   :  { %v5033_v51 = vpop.xlane.xlu1 %2740 }
 0x2e9   :  { %v2763_v56 = vsub.f32 %v4942_v3, %v5033_v51 }
 0x2eb   :  { %v2788_v29 = vmul.f32 1.442695, %v2763_v56 }
 0x2ed   :  { %3486 = vpow2.f32 %v2788_v29  ;;  %2804 = vadd.xlane.f32.xlu0 %v3485_v47 }
 0x2ee   :  { %3488 = vpow2.f32 %v2776_v58 }
 0x2ef   :  { %3490 = vpow2.f32 %v2786_v28 }
 0x2f0   :  { %3492 = vpow2.f32 %v2774_v6 }
 0x2f1   :  { %v2684_v20 = vpop.f32.mrf.mxu3 }
 0x2f2   :  { %v2685_v63 = vadd.f32 %v4812_v36, %v2684_v20 }
 0x2f3   :  { %v3487_v49 = vpop.eup %3486 }
 0x2f4   :  { %2702 = vst [vmem:[#allocation3 + $0x78] sm:$0xff] %v2685_v63  ;;  %v5048_v52 = vsel %vm2705_vm8, %v2685_v63, -1e+30  ;;  %2820 = vadd.xlane.f32.xlu2 %v3487_v49  ;;  %v3489_v34 = vpop.eup %3488 }
 0x2f5   :  { %2752 = vmax.xlane.f32.xlu1 %v5048_v52  ;;  %v3491_v17 = vpop.eup %3490  ;;  %3071 = dma.vmem_to_hbm [thread:$0]  %s3064_s22, 2048, %s3066_s20, [#allocation4], %s3576_s23, %s3576_s23, %s3577_s24  }
 0x2f6   :  { %v3493_v32 = vpop.eup %3492 }
 0x2fc   :  { %2808 = vadd.xlane.f32.xlu2 %v3489_v34 }
 0x2fd   :  { %2818 = vadd.xlane.f32.xlu1 %v3491_v17 }
 0x2ff   :  { %v5053_v36 = vpop.xlane.xlu2 %2742 }
 0x300   :  { %v2764_v4 = vsub.f32 %v4948_v7, %v5053_v36  ;;  %v5071_v46 = vpop.permute.xlu1 %2945 }
 0x301   :  { %vm2972_vm10 = vcmp.eq.s32.totalorder %v4804_v10, %v5071_v46 }
 0x302   :  { %v2790_v59 = vmul.f32 1.442695, %v2764_v4 }
 0x304   :  { %3494 = vpow2.f32 %v2790_v59 }
 0x305   :  { %2806 = vadd.xlane.f32.xlu1 %v3493_v32 }
 0x307   :  { %v5057_v61 = vpop.xlane.xlu2 %2730 }
 0x308   :  { %v2758_v19 = vsub.f32 %v4956_v0, %v5057_v61 }
 0x30a   :  { %v3495_v37 = vpop.eup %3494  ;;  %v2778_v55 = vmul.f32 1.442695, %v2758_v19 }
 0x30b   :  { %2822 = vadd.xlane.f32.xlu0 %v3495_v37 }
 0x30c   :  { %3496 = vpow2.f32 %v2778_v55 }
 0x30f   :  { %v5081_v49 = vpop.permute.xlu2 %2951 }
 0x310   :  { %vm2974_vm1 = vcmp.eq.s32.totalorder %v4804_v10, %v5081_v49 }
 0x312   :  { %v3497_v14 = vpop.eup %3496  ;;  %v5063_v30 = vpop.xlane.xlu0 %2744 }
 0x313   :  { %2810 = vadd.xlane.f32.xlu0 %v3497_v14  ;;  %v2765_v23 = vsub.f32 %v4962_v11, %v5063_v30 }
 0x315   :  { %v2792_v43 = vmul.f32 1.442695, %v2765_v23 }
 0x317   :  { %3498 = vpow2.f32 %v2792_v43 }
 0x31a   :  { %v5067_v35 = vpop.xlane.xlu0 %2732 }
 0x31b   :  { %v2759_v62 = vsub.f32 %v4967_v12, %v5067_v35 }
 0x31d   :  { %v3499_v44 = vpop.eup %3498  ;;  %v2780_v18 = vmul.f32 1.442695, %v2759_v62 }
 0x31e   :  { %2824 = vadd.xlane.f32.xlu1 %v3499_v44 }
 0x31f   :  { %3500 = vpow2.f32 %v2780_v18 }
 0x325   :  { %v3501_v56 = vpop.eup %3500 }
 0x326   :  { %2812 = vadd.xlane.f32.xlu1 %v3501_v56  ;;  %v2912_v56 = vld [vmem:[%s5244_s6 + $0x70] sm:$0xff] }
 0x32b   :  { %v5073_v29 = vpop.xlane.xlu1 %2746 }
 0x32c   :  { %v2766_v33 = vsub.f32 %v4976_v8, %v5073_v29 }
 0x32d   :  { %v5089_v4 = vpop.permute.xlu0 %2948 }
 0x32e   :  { %v2794_v47 = vmul.f32 1.442695, %v2766_v33  ;;  %vm2973_vm2 = vcmp.eq.s32.totalorder %v4804_v10, %v5089_v4 }
 0x330   :  { %3502 = vpow2.f32 %v2794_v47  ;;  %v2911_v47 = vld [vmem:[%s5244_s6 + $0x68] sm:$0xff] }
 0x333   :  { %v5077_v27 = vpop.xlane.xlu1 %2734 }
 0x334   :  { %v2760_v58 = vsub.f32 %v4984_v45, %v5077_v27 }
 0x336   :  { %v3503_v20 = vpop.eup %3502  ;;  %v2782_v28 = vmul.f32 1.442695, %v2760_v58 }
 0x337   :  { %2826 = vadd.xlane.f32.xlu2 %v3503_v20 }
 0x338   :  { %3504 = vpow2.f32 %v2782_v28  ;;  %v2913_v28 = vld [vmem:[%s5244_s6 + $0x78] sm:$0xff] }
 0x33e   :  { %v3505_v63 = vpop.eup %3504 }
 0x33f   :  { %2814 = vadd.xlane.f32.xlu2 %v3505_v63 }
 0x348   :  { %v5083_v41 = vpop.xlane.xlu2 %2748 }
 0x349   :  { %v2767_v6 = vsub.f32 %v5006_v9, %v5083_v41 }
 0x34b   :  { %v2796_v34 = vmul.f32 1.442695, %v2767_v6 }
 0x34d   :  { %3506 = vpow2.f32 %v2796_v34 }
 0x350   :  { %v5087_v17 = vpop.xlane.xlu2 %2736 }
 0x351   :  { %v2761_v59 = vsub.f32 %v5019_v31, %v5087_v17 }
 0x353   :  { %v3507_v32 = vpop.eup %3506  ;;  %v2784_v19 = vmul.f32 1.442695, %v2761_v59 }
 0x354   :  { %2828 = vadd.xlane.f32.xlu0 %v3507_v32 }
 0x355   :  { %3508 = vpow2.f32 %v2784_v19 }
 0x358   :  { %v5093_v37 = vpop.xlane.xlu0 %2750  ;;  %v2803_v6 = vpop.xlane.xlu2 %2802 }
 0x359   :  { %v2768_v55 = vsub.f32 %v5030_v40, %v5093_v37 }
 0x35b   :  { %v3509_v14 = vpop.eup %3508  ;;  %v2798_v23 = vmul.f32 1.442695, %v2768_v55 }
 0x35c   :  { %2816 = vadd.xlane.f32.xlu0 %v3509_v14 }
 0x35d   :  { %3510 = vpow2.f32 %v2798_v23 }
 0x360   :  { %v2805_v58 = vpop.xlane.xlu0 %2804 }
 0x363   :  { %v3511_v43 = vpop.eup %3510 }
 0x364   :  { %2830 = vadd.xlane.f32.xlu1 %v3511_v43 }
 0x367   :  { %v2821_v55 = vpop.xlane.xlu2 %2820 }
 0x368   :  { %v5097_v62 = vpop.xlane.xlu1 %2752 }
 0x369   :  { %v2769_v44 = vsub.f32 %v5048_v52, %v5097_v62 }
 0x36b   :  { %v2800_v18 = vmul.f32 1.442695, %v2769_v44 }
 0x36d   :  { %3512 = vpow2.f32 %v2800_v18 }
 0x36e   :  { %3514 = vlog2.f32 %v2805_v58 }
 0x370   :  { %2957 = vperm.xlu0 %3445, %v2912_v56   ;;  %v2819_v43 = vpop.xlane.xlu1 %2818 }
 0x373   :  { %v3513_v33 = vpop.eup %3512 }
 0x374   :  { %2832 = vadd.xlane.f32.xlu2 %v3513_v33  ;;  %v3515_v63 = vpop.eup %3514 }
 0x375   :  { %v2837_v34 = vmul.f32 0.6931472, %v3515_v63 }
 0x377   :  { %v2867_v59 = vadd.f32 %v2837_v34, %v5014_v25 }
 0x378   :  { %v2807_v13 = vpop.xlane.xlu1 %2806 }
 0x379   :  { %v2883_v23 = vsub.f32 %v4879_v38, %v2867_v59 }
 0x37b   :  { %v2979_v56 = vsel %vm2963_vm9, %v2883_v23, 0.0  ;;  %vm3042_vm9 = vcmask 7168  }
 0x37d   :  { %2954 = vperm.xlu1 %3446, %v2911_v47  }
 0x37e   :  { %v2823_v20 = vpop.xlane.xlu0 %2822 }
 0x37f   :  { %3516 = vlog2.f32 %v2823_v20  ;;  %v2809_v20 = vpop.xlane.xlu2 %2808 }
 0x380   :  { %3518 = vlog2.f32 %v2803_v6 }
 0x385   :  { %v3517_v19 = vpop.eup %3516 }
 0x386   :  { %v2811_v32 = vpop.xlane.xlu0 %2810  ;;  %v2855_v14 = vmul.f32 0.6931472, %v3517_v19  ;;  %v3519_v44 = vpop.eup %3518 }
 0x387   :  { %3520 = vlog2.f32 %v2811_v32  ;;  %v2835_v25 = vmul.f32 0.6931472, %v3519_v44 }
 0x388   :  { %v2876_v18 = vadd.f32 %v2855_v14, %v5053_v36  ;;  %3522 = vlog2.f32 %v2821_v55 }
 0x389   :  { %3524 = vlog2.f32 %v2819_v43 }
 0x38a   :  { %v2892_v58 = vsub.f32 %v4948_v7, %v2876_v18  ;;  %3526 = vlog2.f32 %v2809_v20 }
 0x38b   :  { %3528 = vlog2.f32 %v2807_v13 }
 0x38c   :  { %2960 = vperm.xlu2 %3447, %v2913_v28   ;;  %v2866_v28 = vadd.f32 %v2835_v25, %v5000_v26  ;;  %v2988_v63 = vsel %vm2972_vm10, %v2892_v58, 0.0 }
 0x38d   :  { %v3521_v33 = vpop.eup %3520 }
 0x38e   :  { %v2843_v47 = vmul.f32 0.6931472, %v3521_v33  ;;  %v3523_v38 = vpop.eup %3522  ;;  %v2882_v34 = vsub.f32 %v4836_v15, %v2866_v28 }
 0x38f   :  { %v2853_v6 = vmul.f32 0.6931472, %v3523_v38  ;;  %v3525_v59 = vpop.eup %3524 }
 0x390   :  { %v2870_v36 = vadd.f32 %v2843_v47, %v5057_v61  ;;  %v3527_v26 = vpop.eup %3526  ;;  %v2851_v46 = vmul.f32 0.6931472, %v3525_v59  ;;  %v2978_v19 = vsel %vm2962_vm11, %v2882_v34, 0.0 }
 0x391   :  { %v2875_v32 = vadd.f32 %v2853_v6, %v5033_v51  ;;  %v2825_v61 = vpop.xlane.xlu1 %2824  ;;  %v2841_v14 = vmul.f32 0.6931472, %v3527_v26  ;;  %v3529_v23 = vpop.eup %3528 }
 0x392   :  { %v2886_v7 = vsub.f32 %v4956_v0, %v2870_v36  ;;  %v2874_v0 = vadd.f32 %v2851_v46, %v5039_v21  ;;  %v2839_v43 = vmul.f32 0.6931472, %v3529_v23 }
 0x393   :  { %v2891_v39 = vsub.f32 %v4942_v3, %v2875_v32  ;;  %v2869_v51 = vadd.f32 %v2841_v14, %v5035_v48 }
 0x394   :  { %v2982_v55 = vsel %vm2966_vm12, %v2886_v7, 0.0  ;;  %v2890_v44 = vsub.f32 %v4931_v60, %v2874_v0  ;;  %v2868_v3 = vadd.f32 %v2839_v43, %v5024_v54 }
 0x395   :  { %v2987_v1 = vsel %vm2971_vm13, %v2891_v39, 0.0 }
 0x396   :  { %v2986_v5 = vsel %vm2970_vm14, %v2890_v44, 0.0  ;;  %v2884_v53 = vsub.f32 %v4895_v2, %v2868_v3 }
 0x398   :  { %v2980_v28 = vsel %vm2964_vm0, %v2884_v53, 0.0 }
 0x399   :  { %v2813_v33 = vpop.xlane.xlu1 %2812 }
 0x39a   :  { %2996 = vadd.xlane.f32.xlu0 %v2979_v56  ;;  %v2885_v56 = vsub.f32 %v4907_v57, %v2869_v51 }
 0x39c   :  { %v2981_v58 = vsel %vm2965_vm15, %v2885_v56, 0.0 }
 0x3a2   :  { %3014 = vadd.xlane.f32.xlu0 %v2988_v63 }
 0x3a7   :  { %2994 = vadd.xlane.f32.xlu1 %v2978_v19 }
 0x3aa   :  { %3002 = vadd.xlane.f32.xlu0 %v2982_v55  ;;  %v2827_v15 = vpop.xlane.xlu2 %2826 }
 0x3ab   :  { %3530 = vlog2.f32 %v2827_v15 }
 0x3ac   :  { %3532 = vlog2.f32 %v2825_v61 }
 0x3af   :  { %3012 = vadd.xlane.f32.xlu1 %v2987_v1 }
 0x3b1   :  { %v3531_v18 = vpop.eup %3530 }
 0x3b2   :  { %v2815_v21 = vpop.xlane.xlu2 %2814  ;;  %v2859_v25 = vmul.f32 0.6931472, %v3531_v18  ;;  %v3533_v48 = vpop.eup %3532 }
 0x3b3   :  { %3534 = vlog2.f32 %v2815_v21  ;;  %v2857_v60 = vmul.f32 0.6931472, %v3533_v48 }
 0x3b4   :  { %3536 = vlog2.f32 %v2813_v33  ;;  %v2878_v47 = vadd.f32 %v2859_v25, %v5073_v29 }
 0x3b5   :  { %3010 = vadd.xlane.f32.xlu2 %v2986_v5  ;;  %v2877_v54 = vadd.f32 %v2857_v60, %v5063_v30 }
 0x3b6   :  { %v2894_v38 = vsub.f32 %v4976_v8, %v2878_v47 }
 0x3b7   :  { %3000 = vadd.xlane.f32.xlu1 %v2981_v58  ;;  %v2893_v36 = vsub.f32 %v4962_v11, %v2877_v54 }
 0x3b8   :  { %v2990_v2 = vsel %vm2974_vm1, %v2894_v38, 0.0 }
 0x3b9   :  { %v3535_v57 = vpop.eup %3534  ;;  %v2989_v30 = vsel %vm2973_vm2, %v2893_v36, 0.0 }
 0x3ba   :  { %v2847_v20 = vmul.f32 0.6931472, %v3535_v57  ;;  %v3537_v13 = vpop.eup %3536 }
 0x3bb   :  { %v2845_v24 = vmul.f32 0.6931472, %v3537_v13 }
 0x3bc   :  { %v2872_v29 = vadd.f32 %v2847_v20, %v5077_v27 }
 0x3bd   :  { %2998 = vadd.xlane.f32.xlu2 %v2980_v28  ;;  %v2871_v22 = vadd.f32 %v2845_v24, %v5067_v35 }
 0x3be   :  { %v2888_v8 = vsub.f32 %v4984_v45, %v2872_v29 }
 0x3bf   :  { %3018 = vadd.xlane.f32.xlu1 %v2990_v2  ;;  %v2887_v27 = vsub.f32 %v4967_v12, %v2871_v22 }
 0x3c0   :  { %v2984_v49 = vsel %vm2968_vm3, %v2888_v8, 0.0 }
 0x3c1   :  { %v2983_v11 = vsel %vm2967_vm4, %v2887_v27, 0.0 }
 0x3c5   :  { %3016 = vadd.xlane.f32.xlu2 %v2989_v30 }
 0x3c7   :  { %v2829_v63 = vpop.xlane.xlu0 %2828  ;;  %3006 = vadd.xlane.f32.xlu1 %v2984_v49 }
 0x3cd   :  { %3004 = vadd.xlane.f32.xlu2 %v2983_v11 }
 0x3cf   :  { %v2817_v4 = vpop.xlane.xlu0 %2816 }
 0x3d0   :  { %3538 = vlog2.f32 %v2817_v4 }
 0x3d6   :  { %v3539_v35 = vpop.eup %3538 }
 0x3d7   :  { %v2849_v6 = vmul.f32 0.6931472, %v3539_v35  ;;  %v2831_v34 = vpop.xlane.xlu1 %2830 }
 0x3d8   :  { %3540 = vlog2.f32 %v2831_v34 }
 0x3d9   :  { %v2873_v45 = vadd.f32 %v2849_v6, %v5087_v17  ;;  %3542 = vlog2.f32 %v2829_v63 }
 0x3db   :  { %v2889_v50 = vsub.f32 %v5019_v31, %v2873_v45 }
 0x3dd   :  { %v2985_v12 = vsel %vm2969_vm5, %v2889_v50, 0.0 }
 0x3de   :  { %3008 = vadd.xlane.f32.xlu0 %v2985_v12  ;;  %v3541_v59 = vpop.eup %3540 }
 0x3df   :  { %v2863_v16 = vmul.f32 0.6931472, %v3541_v59  ;;  %v3543_v46 = vpop.eup %3542 }
 0x3e0   :  { %v2861_v31 = vmul.f32 0.6931472, %v3543_v46 }
 0x3e1   :  { %v2880_v7 = vadd.f32 %v2863_v16, %v5093_v37 }
 0x3e2   :  { %v2958_v26 = vpop.permute.xlu0 %2957  ;;  %v2879_v42 = vadd.f32 %v2861_v31, %v5083_v41 }
 0x3e3   :  { %vm2976_vm6 = vcmp.eq.s32.totalorder %v4804_v10, %v2958_v26  ;;  %v2896_v32 = vsub.f32 %v5030_v40, %v2880_v7 }
 0x3e4   :  { %v2895_v14 = vsub.f32 %v5006_v9, %v2879_v42 }
 0x3e5   :  { %v2992_v17 = vsel %vm2976_vm6, %v2896_v32, 0.0 }
 0x3e6   :  { %3022 = vadd.xlane.f32.xlu2 %v2992_v17 }
 0x3e7   :  { %v2833_v19 = vpop.xlane.xlu2 %2832 }
 0x3e8   :  { %3544 = vlog2.f32 %v2833_v19 }
 0x3ee   :  { %v3545_v37 = vpop.eup %3544 }
 0x3ef   :  { %v2865_v61 = vmul.f32 0.6931472, %v3545_v37  ;;  %v2955_v55 = vpop.permute.xlu1 %2954  ;;  %v2961_v15 = vpop.permute.xlu2 %2960 }
 0x3f0   :  { %vm2975_vm7 = vcmp.eq.s32.totalorder %v4804_v10, %v2955_v55  ;;  %vm2977_vm8 = vcmp.eq.s32.totalorder %v4804_v10, %v2961_v15 }
 0x3f1   :  { %v2881_v40 = vadd.f32 %v2865_v61, %v5097_v62  ;;  %v2991_v0 = vsel %vm2975_vm7, %v2895_v14, 0.0 }
 0x3f2   :  { %3020 = vadd.xlane.f32.xlu0 %v2991_v0 }
 0x3f3   :  { %v2897_v41 = vsub.f32 %v5048_v52, %v2881_v40 }
 0x3f5   :  { %v2993_v39 = vsel %vm2977_vm8, %v2897_v41, 0.0 }
 0x3f6   :  { %3024 = vadd.xlane.f32.xlu1 %v2993_v39 }
 0x40d   :  { %v2997_v23 = vpop.xlane.xlu0 %2996 }
 0x40e   :  { %v3027_v51 = vsub.f32 0.0, %v2997_v23 }
 0x410   :  { %3044 = vst.msk [vmem:[%s5246_s8 + $0x8] sm:$0xff] %vm3042_vm9, %v3027_v51 }
 0x415   :  { %v3015_v9 = vpop.xlane.xlu0 %3014 }
 0x416   :  { %v3036_v62 = vsub.f32 0.0, %v3015_v9 }
 0x418   :  { %3053 = vst.msk [vmem:[%s5246_s8 + $0x50] sm:$0xff] %vm3042_vm9, %v3036_v62 }
 0x41a   :  { %v2995_v52 = vpop.xlane.xlu1 %2994 }
 0x41b   :  { %v3026_v10 = vsub.f32 0.0, %v2995_v52 }
 0x41d   :  { %v3003_v43 = vpop.xlane.xlu0 %3002  ;;  %3043 = vst.msk [vmem:[%s5246_s8] sm:$0xff] %vm3042_vm9, %v3026_v10 }
 0x41e   :  { %v3030_v1 = vsub.f32 0.0, %v3003_v43 }
 0x420   :  { %3047 = vst.msk [vmem:[%s5246_s8 + $0x20] sm:$0xff] %vm3042_vm9, %v3030_v1 }
 0x422   :  { %v3013_v44 = vpop.xlane.xlu1 %3012 }
 0x423   :  { %v3035_v18 = vsub.f32 0.0, %v3013_v44 }
 0x425   :  { %3052 = vst.msk [vmem:[%s5246_s8 + $0x48] sm:$0xff] %vm3042_vm9, %v3035_v18 }
 0x428   :  { %v3011_v21 = vpop.xlane.xlu2 %3010 }
 0x429   :  { %v3034_v56 = vsub.f32 0.0, %v3011_v21 }
 0x42a   :  { %v3001_v3 = vpop.xlane.xlu1 %3000 }
 0x42b   :  { %3051 = vst.msk [vmem:[%s5246_s8 + $0x40] sm:$0xff] %vm3042_vm9, %v3034_v56  ;;  %v3029_v33 = vsub.f32 0.0, %v3001_v3 }
 0x42d   :  { %3046 = vst.msk [vmem:[%s5246_s8 + $0x18] sm:$0xff] %vm3042_vm9, %v3029_v33 }
 0x430   :  { %v2999_v25 = vpop.xlane.xlu2 %2998 }
 0x431   :  { %v3028_v5 = vsub.f32 0.0, %v2999_v25 }
 0x432   :  { %v3019_v48 = vpop.xlane.xlu1 %3018 }
 0x433   :  { %3045 = vst.msk [vmem:[%s5246_s8 + $0x10] sm:$0xff] %vm3042_vm9, %v3028_v5  ;;  %v3038_v60 = vsub.f32 0.0, %v3019_v48 }
 0x435   :  { %3055 = vst.msk [vmem:[%s5246_s8 + $0x60] sm:$0xff] %vm3042_vm9, %v3038_v60 }
 0x438   :  { %v3017_v47 = vpop.xlane.xlu2 %3016 }
 0x439   :  { %v3037_v58 = vsub.f32 0.0, %v3017_v47 }
 0x43a   :  { %v3007_v53 = vpop.xlane.xlu1 %3006 }
 0x43b   :  { %3054 = vst.msk [vmem:[%s5246_s8 + $0x58] sm:$0xff] %vm3042_vm9, %v3037_v58  ;;  %v3032_v57 = vsub.f32 0.0, %v3007_v53 }
 0x43d   :  { %3049 = vst.msk [vmem:[%s5246_s8 + $0x30] sm:$0xff] %vm3042_vm9, %v3032_v57 }
 0x440   :  { %v3005_v54 = vpop.xlane.xlu2 %3004 }
 0x441   :  { %v3031_v20 = vsub.f32 0.0, %v3005_v54 }
 0x443   :  { %3048 = vst.msk [vmem:[%s5246_s8 + $0x28] sm:$0xff] %vm3042_vm9, %v3031_v20 }
 0x451   :  { %v3009_v28 = vpop.xlane.xlu0 %3008 }
 0x452   :  { %v3033_v38 = vsub.f32 0.0, %v3009_v28 }
 0x454   :  { %3050 = vst.msk [vmem:[%s5246_s8 + $0x38] sm:$0xff] %vm3042_vm9, %v3033_v38 }
 0x459   :  { %v3023_v13 = vpop.xlane.xlu2 %3022 }
 0x45a   :  { %v3040_v24 = vsub.f32 0.0, %v3023_v13 }
 0x45c   :  { %3057 = vst.msk [vmem:[%s5246_s8 + $0x70] sm:$0xff] %vm3042_vm9, %v3040_v24 }
 0x465   :  { %v3021_v29 = vpop.xlane.xlu0 %3020 }
 0x466   :  { %v3039_v2 = vsub.f32 0.0, %v3021_v29 }
 0x468   :  { %3056 = vst.msk [vmem:[%s5246_s8 + $0x68] sm:$0xff] %vm3042_vm9, %v3039_v2 }
 0x469   :  { %v3025_v36 = vpop.xlane.xlu1 %3024 }
 0x46a   :  { %v3041_v22 = vsub.f32 0.0, %v3025_v36 }
 0x46c   :  { %3058 = vst.msk [vmem:[%s5246_s8 + $0x78] sm:$0xff] %vm3042_vm9, %v3041_v22 }
 0x46d   :  { %3571 = dma.done.wait [#allocation4], 2048  }
 0x46e   :  { %3572 = vsyncadd [#allocation4], 4294965248 }
 0x46f   :  { %3080 = vsyncpa [#allocation4], 1 }

</bundles_post_ra>
